<compile_context>
chip_gen: v7x
topology: tpu7x:2x2x1
jax: 0.10.0
libtpu: 0.0.40
codegen_flags: <defaults>
</compile_context>

<pallas_src>
import functools

import jax
import jax.numpy as jnp
from jax import lax
from jax.experimental import pallas as pl
from jax.experimental.pallas import tpu as pltpu

NEG_SLOPE = 0.2


# ---------------------------------------------------------------------------
# Architecture description (matches the PyTorch Discriminator)
# ---------------------------------------------------------------------------
def discriminator_configs(ndf, n_layers=5):
    """(cin, cout, kernel, stride, padding, apply_leaky_relu) per conv layer."""
    cfgs = [(1, ndf, 4, 2, 1, True)]
    out_dims = ndf
    for i in range(n_layers):
        in_dims = out_dims
        out_dims = ndf * min(2 ** (i + 1), 8)
        cfgs.append((in_dims, out_dims, 4, 2, 1, True))
    cfgs.append((out_dims, 1, 3, 1, 1, False))
    return cfgs


def init_discriminator_params(key, ndf, n_layers=5):
    params = []
    for (cin, cout, k, _s, _p, _a) in discriminator_configs(ndf, n_layers):
        key, kw_, kb_ = jax.random.split(key, 3)
        w = 0.05 * jax.random.normal(kw_, (cout, cin, k, k), dtype=jnp.float32)
        b = 0.01 * jax.random.normal(kb_, (cout,), dtype=jnp.float32)
        params.append((w, b))
    return params


def _layer_geometry(cfgs, H, W):
    geoms = []
    h, w = H, W
    for (cin, cout, k, s, p, act) in cfgs:
        ho = (h + 2 * p - k) // s + 1
        wo = (w + 2 * p - k) // s + 1
        geoms.append(dict(cin=cin, cout=cout, k=k, s=s, p=p, act=act,
                          hi=h, wi=w, ho=ho, wo=wo))
        h, w = ho, wo
    return geoms


# ---------------------------------------------------------------------------
# Host-side weight expansion: fold the W-direction conv (incl. its padding)
# into a banded matrix so the in-kernel op is a single dense GEMM per tap.
#   Wband[kh, w*Cin + ci, j*Cout + co] = w[co, ci, kh, w + pad - stride*j]
#   (zero when the tap index is out of [0, KW))
# ---------------------------------------------------------------------------
def _expand_weight(w_oihw, stride, pad, w_in, w_out, dtype):
    cout, cin, KH, KW = w_oihw.shape
    w_t = jnp.transpose(w_oihw, (2, 3, 1, 0)).astype(jnp.float32)  # (KH,KW,Cin,Cout)
    wpos = jnp.arange(w_in)[None, :, None]
    jpos = jnp.arange(w_out)[None, None, :]
    kpos = jnp.arange(KW)[:, None, None]
    band = (wpos + pad == stride * jpos + kpos).astype(jnp.float32)  # (KW,Win,Wout)
    wbig = jnp.einsum('hkcd,kwj->hwcjd', w_t, band)  # (KH,Win,Cin,Wout,Cout)
    return wbig.reshape(KH, w_in * cin, w_out * cout).astype(dtype)


# ---------------------------------------------------------------------------
# The fused Pallas kernel: all conv layers for one batch sample.
# ---------------------------------------------------------------------------
def _disc_fused_kernel(*refs, geoms, compute_dtype):
    nl = len(geoms)
    x_ref = refs[0]
    w_refs = refs[1:1 + nl]
    b_refs = refs[1 + nl:1 + 2 * nl]
    o_ref = refs[1 + 2 * nl]

    cur = x_ref[0]  # (H0, W0*Cin0): one sample, f32
    for l, g in enumerate(geoms):
        hi, ho = g['hi'], g['ho']
        wo_c = g['wo'] * g['cout']
        k, s, p = g['k'], g['s'], g['p']

        cur_c = cur.astype(compute_dtype)  # bf16 MXU operand
        rows = lax.broadcasted_iota(jnp.int32, (ho, hi), 0)
        cols = lax.broadcasted_iota(jnp.int32, (ho, hi), 1)
        acc = jnp.zeros((ho, wo_c), jnp.float32)

        for kh in range(k):
            shift = kh - p
            # Static skip: taps that only ever hit the zero padding rows.
            if not any(0 <= s * i + shift < hi for i in range(ho)):
                continue
            if s == 1 and shift == 0 and ho == hi:
                xg = cur_c  # identity row pick
            else:
                # 0/1 selection matmul == exact row gather (zero rows encode
                # the vertical zero padding).  Avoids strided sublane loads.
                sel = (cols == s * rows + shift).astype(compute_dtype)
                xg = jnp.dot(sel, cur_c, preferred_element_type=jnp.float32)
                xg = xg.astype(compute_dtype)
            acc = acc + jnp.dot(xg, w_refs[l][kh],
                                preferred_element_type=jnp.float32)

        acc = acc + b_refs[l][...]                 # bias in f32
        if g['act']:
            acc = jnp.where(acc >= 0.0, acc, NEG_SLOPE * acc)  # LeakyReLU, f32
        cur = acc                                  # stays on-chip (no HBM)

    o_ref[...] = cur.reshape(o_ref.shape).astype(o_ref.dtype)


# ---------------------------------------------------------------------------
# Wrapper: layout prep + single pallas_call over a batch-parallel grid.
# ---------------------------------------------------------------------------
def discriminator_forward(x_nchw, params, ndf, n_layers=5,
                          compute_dtype=jnp.bfloat16):
    """Fused Pallas forward. Input NCHW (PyTorch convention), output NCHW."""
    cfgs = discriminator_configs(ndf, n_layers)
    N, C, H, W = x_nchw.shape
    geoms = _layer_geometry(cfgs, H, W)
    nl = len(geoms)
    g0, gl = geoms[0], geoms[-1]
    assert C == g0['cin']

    # Layer-0 activation layout: (N, H, W*Cin) with W*Cin on the lane axis.
    x = jnp.transpose(x_nchw, (0, 2, 3, 1)).reshape(N, H, W * C)
    x = x.astype(jnp.float32)

    wbigs, bbigs = [], []
    for (w, b), g in zip(params, geoms):
        wbigs.append(_expand_weight(w, g['s'], g['p'], g['wi'], g['wo'],
                                    compute_dtype))
        bbigs.append(jnp.tile(b.astype(jnp.float32), g['wo'])
                     .reshape(1, g['wo'] * g['cout']))

    in_specs = [pl.BlockSpec((1, H, W * C), lambda n: (n, 0, 0))]
    for wb in wbigs:   # whole-array blocks, constant index_map (fetched once)
        in_specs.append(pl.BlockSpec(wb.shape, lambda n, nd=wb.ndim: (0,) * nd))
    for bb in bbigs:
        in_specs.append(pl.BlockSpec(bb.shape, lambda n, nd=bb.ndim: (0,) * nd))

    out_lanes = gl['wo'] * gl['cout']
    out_shape = jax.ShapeDtypeStruct((N, gl['ho'], out_lanes), jnp.float32)
    out_spec = pl.BlockSpec((1, gl['ho'], out_lanes), lambda n: (n, 0, 0))

    # Advisory cost estimate (two dots per kept tap per layer per sample).
    flops = 0
    for g in geoms:
        kdim = g['wi'] * g['cin']
        flops += N * g['k'] * 2 * g['ho'] * kdim * (g['hi'] + g['wo'] * g['cout'])
    bytes_accessed = int(
        x.size * x.dtype.itemsize
        + sum(a.size * a.dtype.itemsize for a in wbigs)
        + sum(a.size * a.dtype.itemsize for a in bbigs)
        + N * gl['ho'] * out_lanes * 4)

    kernel = functools.partial(_disc_fused_kernel, geoms=geoms,
                               compute_dtype=compute_dtype)
    out = pl.pallas_call(
        kernel,
        out_shape=out_shape,
        grid=(N,),
        in_specs=in_specs,
        out_specs=out_spec,
        compiler_params=pltpu.CompilerParams(
            dimension_semantics=("parallel",),   # 2 TCs on v7x split the batch
            vmem_limit_bytes=32 * 1024 * 1024,
        ),
        cost_estimate=pl.CostEstimate(flops=int(flops), transcendentals=0,
                                      bytes_accessed=bytes_accessed),
    )(x, *wbigs, *bbigs)

    y = out.reshape(N, gl['ho'], gl['wo'], gl['cout'])
    return jnp.transpose(y, (0, 3, 1, 2))  # NHWC -> NCHW


# ---------------------------------------------------------------------------
# Pure-JAX reference (no Pallas) for the numerical sanity check.
# ---------------------------------------------------------------------------
def discriminator_forward_ref(x_nchw, params, ndf, n_layers=5):
    y = x_nchw
    for (w, b), (_cin, _cout, _k, s, p, act) in zip(
            params, discriminator_configs(ndf, n_layers)):
        y = lax.conv_general_dilated(
            y, w, window_strides=(s, s), padding=[(p, p), (p, p)],
            dimension_numbers=("NCHW", "OIHW", "NCHW"),
        ) + b[None, :, None, None]
        if act:
            y = jnp.where(y >= 0.0, y, NEG_SLOPE * y)
    return y


if __name__ == "__main__":
    ndf = 8
    n_layers = 5
    key = jax.random.PRNGKey(0)
    k_x, k_p = jax.random.split(key)

    # 6 stride-2 convs require 64x64: 64->32->16->8->4->2->1, then 3x3 s1 conv.
    x = jax.random.normal(k_x, (2, 1, 64, 64), dtype=jnp.float32)
    params = init_discriminator_params(k_p, ndf, n_layers)

    fwd = jax.jit(functools.partial(discriminator_forward, ndf=ndf,
                                    n_layers=n_layers))
    out = jax.block_until_ready(fwd(x, params))

    ref = jax.block_until_ready(
        discriminator_forward_ref(x, params, ndf, n_layers))
    assert out.shape == ref.shape == (2, 1, 1, 1), (out.shape, ref.shape)
    # bf16 MXU operands with f32 accumulation -> slightly loosened tolerance.
    assert jnp.allclose(out, ref, rtol=2e-2, atol=2e-2), (
        float(jnp.max(jnp.abs(out - ref))))
    print("KERNEL_OK")
</pallas_src>

<mosaic_0001>
module attributes {stable_mosaic.version = 11 : i64} {
  func.func @_disc_fused_kernel(%arg0: i32, %arg1: memref<1x64x64xf32, #tpu.memory_space<vmem>>, %arg2: memref<4x64x256xbf16, #tpu.memory_space<vmem>>, %arg3: memref<4x256x256xbf16, #tpu.memory_space<vmem>>, %arg4: memref<4x256x256xbf16, #tpu.memory_space<vmem>>, %arg5: memref<4x256x256xbf16, #tpu.memory_space<vmem>>, %arg6: memref<4x256x128xbf16, #tpu.memory_space<vmem>>, %arg7: memref<4x128x64xbf16, #tpu.memory_space<vmem>>, %arg8: memref<3x64x1xbf16, #tpu.memory_space<vmem>>, %arg9: memref<1x256xf32, #tpu.memory_space<vmem>>, %arg10: memref<1x256xf32, #tpu.memory_space<vmem>>, %arg11: memref<1x256xf32, #tpu.memory_space<vmem>>, %arg12: memref<1x256xf32, #tpu.memory_space<vmem>>, %arg13: memref<1x128xf32, #tpu.memory_space<vmem>>, %arg14: memref<1x64xf32, #tpu.memory_space<vmem>>, %arg15: memref<1x1xf32, #tpu.memory_space<vmem>>, %arg16: memref<1x1x1xf32, #tpu.memory_space<vmem>>) attributes {dimension_semantics = [#tpu.dimension_semantics<parallel>], iteration_bounds = array<i64: 2>, scalar_prefetch = 0 : i64, scratch_operands = 0 : i64, tpu.core_type = #tpu.core_type<tc>, window_params = [{transform_indices = @transform_0, window_bounds = array<i64: 1, 64, 64>}, {pipeline_mode = #tpu.pipeline_mode<synchronous>, transform_indices = @transform_1, window_bounds = array<i64: 4, 64, 256>}, {pipeline_mode = #tpu.pipeline_mode<synchronous>, transform_indices = @transform_2, window_bounds = array<i64: 4, 256, 256>}, {pipeline_mode = #tpu.pipeline_mode<synchronous>, transform_indices = @transform_3, window_bounds = array<i64: 4, 256, 256>}, {pipeline_mode = #tpu.pipeline_mode<synchronous>, transform_indices = @transform_4, window_bounds = array<i64: 4, 256, 256>}, {pipeline_mode = #tpu.pipeline_mode<synchronous>, transform_indices = @transform_5, window_bounds = array<i64: 4, 256, 128>}, {pipeline_mode = #tpu.pipeline_mode<synchronous>, transform_indices = @transform_6, window_bounds = array<i64: 4, 128, 64>}, {pipeline_mode = #tpu.pipeline_mode<synchronous>, transform_indices = @transform_7, window_bounds = array<i64: 3, 64, 1>}, {pipeline_mode = #tpu.pipeline_mode<synchronous>, transform_indices = @transform_8, window_bounds = array<i64: 1, 256>}, {pipeline_mode = #tpu.pipeline_mode<synchronous>, transform_indices = @transform_9, window_bounds = array<i64: 1, 256>}, {pipeline_mode = #tpu.pipeline_mode<synchronous>, transform_indices = @transform_10, window_bounds = array<i64: 1, 256>}, {pipeline_mode = #tpu.pipeline_mode<synchronous>, transform_indices = @transform_11, window_bounds = array<i64: 1, 256>}, {pipeline_mode = #tpu.pipeline_mode<synchronous>, transform_indices = @transform_12, window_bounds = array<i64: 1, 128>}, {pipeline_mode = #tpu.pipeline_mode<synchronous>, transform_indices = @transform_13, window_bounds = array<i64: 1, 64>}, {pipeline_mode = #tpu.pipeline_mode<synchronous>, transform_indices = @transform_14, window_bounds = array<i64: 1, 1>}, {transform_indices = @transform_15, window_bounds = array<i64: 1, 1, 1>}]} {
    %c0 = arith.constant 0 : index
    %c0_0 = arith.constant 0 : index
    %c0_1 = arith.constant 0 : index
    %0 = vector.load %arg1[%c0, %c0_0, %c0_1] : memref<1x64x64xf32, #tpu.memory_space<vmem>>, vector<1x64x64xf32>
    %1 = vector.shape_cast %0 : vector<1x64x64xf32> to vector<64x64xf32>
    %2 = arith.truncf %1 : vector<64x64xf32> to vector<64x64xbf16>
    %3 = tpu.iota {dimensions = array<i32: 0>} : vector<32x64xi32>
    %4 = tpu.iota {dimensions = array<i32: 1>} : vector<32x64xi32>
    %cst = arith.constant 0.000000e+00 : f32
    %5 = vector.broadcast %cst : f32 to vector<32x256xf32>
    %c2_i32 = arith.constant 2 : i32
    %6 = vector.broadcast %c2_i32 : i32 to vector<32x64xi32>
    %7 = arith.muli %6, %3 : vector<32x64xi32>
    %c-1_i32 = arith.constant -1 : i32
    %8 = vector.broadcast %c-1_i32 : i32 to vector<32x64xi32>
    %9 = arith.addi %7, %8 : vector<32x64xi32>
    %10 = arith.cmpi eq, %4, %9 : vector<32x64xi32>
    %11 = arith.extui %10 : vector<32x64xi1> to vector<32x64xi32>
    %12 = arith.sitofp %11 : vector<32x64xi32> to vector<32x64xf32>
    %13 = arith.truncf %12 : vector<32x64xf32> to vector<32x64xbf16>
    %cst_2 = arith.constant dense<0.000000e+00> : vector<32x64xf32>
    %14 = tpu.matmul %13, %2, %cst_2 {dimension_numbers = #tpu.dot_dimension_numbers<[1], [0], [0], [1], [0, 0, 1, 1], [], []>} : vector<32x64xbf16>, vector<64x64xbf16>, vector<32x64xf32> -> vector<32x64xf32>
    %15 = arith.truncf %14 : vector<32x64xf32> to vector<32x64xbf16>
    %c0_3 = arith.constant 0 : index
    %c0_4 = arith.constant 0 : index
    %c0_5 = arith.constant 0 : index
    %16 = vector.load %arg2[%c0_3, %c0_4, %c0_5] : memref<4x64x256xbf16, #tpu.memory_space<vmem>>, vector<1x64x256xbf16>
    %17 = vector.shape_cast %16 : vector<1x64x256xbf16> to vector<64x256xbf16>
    %cst_6 = arith.constant dense<0.000000e+00> : vector<32x256xf32>
    %18 = tpu.matmul %15, %17, %cst_6 {dimension_numbers = #tpu.dot_dimension_numbers<[1], [0], [0], [1], [0, 0, 1, 1], [], []>} : vector<32x64xbf16>, vector<64x256xbf16>, vector<32x256xf32> -> vector<32x256xf32>
    %19 = arith.addf %5, %18 : vector<32x256xf32>
    %c2_i32_7 = arith.constant 2 : i32
    %20 = vector.broadcast %c2_i32_7 : i32 to vector<32x64xi32>
    %21 = arith.muli %20, %3 : vector<32x64xi32>
    %c0_i32 = arith.constant 0 : i32
    %22 = vector.broadcast %c0_i32 : i32 to vector<32x64xi32>
    %23 = arith.addi %21, %22 : vector<32x64xi32>
    %24 = arith.cmpi eq, %4, %23 : vector<32x64xi32>
    %25 = arith.extui %24 : vector<32x64xi1> to vector<32x64xi32>
    %26 = arith.sitofp %25 : vector<32x64xi32> to vector<32x64xf32>
    %27 = arith.truncf %26 : vector<32x64xf32> to vector<32x64xbf16>
    %cst_8 = arith.constant dense<0.000000e+00> : vector<32x64xf32>
    %28 = tpu.matmul %27, %2, %cst_8 {dimension_numbers = #tpu.dot_dimension_numbers<[1], [0], [0], [1], [0, 0, 1, 1], [], []>} : vector<32x64xbf16>, vector<64x64xbf16>, vector<32x64xf32> -> vector<32x64xf32>
    %29 = arith.truncf %28 : vector<32x64xf32> to vector<32x64xbf16>
    %c1 = arith.constant 1 : index
    %c0_9 = arith.constant 0 : index
    %c0_10 = arith.constant 0 : index
    %30 = vector.load %arg2[%c1, %c0_9, %c0_10] : memref<4x64x256xbf16, #tpu.memory_space<vmem>>, vector<1x64x256xbf16>
    %31 = vector.shape_cast %30 : vector<1x64x256xbf16> to vector<64x256xbf16>
    %cst_11 = arith.constant dense<0.000000e+00> : vector<32x256xf32>
    %32 = tpu.matmul %29, %31, %cst_11 {dimension_numbers = #tpu.dot_dimension_numbers<[1], [0], [0], [1], [0, 0, 1, 1], [], []>} : vector<32x64xbf16>, vector<64x256xbf16>, vector<32x256xf32> -> vector<32x256xf32>
    %33 = arith.addf %19, %32 : vector<32x256xf32>
    %c2_i32_12 = arith.constant 2 : i32
    %34 = vector.broadcast %c2_i32_12 : i32 to vector<32x64xi32>
    %35 = arith.muli %34, %3 : vector<32x64xi32>
    %c1_i32 = arith.constant 1 : i32
    %36 = vector.broadcast %c1_i32 : i32 to vector<32x64xi32>
    %37 = arith.addi %35, %36 : vector<32x64xi32>
    %38 = arith.cmpi eq, %4, %37 : vector<32x64xi32>
    %39 = arith.extui %38 : vector<32x64xi1> to vector<32x64xi32>
    %40 = arith.sitofp %39 : vector<32x64xi32> to vector<32x64xf32>
    %41 = arith.truncf %40 : vector<32x64xf32> to vector<32x64xbf16>
    %cst_13 = arith.constant dense<0.000000e+00> : vector<32x64xf32>
    %42 = tpu.matmul %41, %2, %cst_13 {dimension_numbers = #tpu.dot_dimension_numbers<[1], [0], [0], [1], [0, 0, 1, 1], [], []>} : vector<32x64xbf16>, vector<64x64xbf16>, vector<32x64xf32> -> vector<32x64xf32>
    %43 = arith.truncf %42 : vector<32x64xf32> to vector<32x64xbf16>
    %c2 = arith.constant 2 : index
    %c0_14 = arith.constant 0 : index
    %c0_15 = arith.constant 0 : index
    %44 = vector.load %arg2[%c2, %c0_14, %c0_15] : memref<4x64x256xbf16, #tpu.memory_space<vmem>>, vector<1x64x256xbf16>
    %45 = vector.shape_cast %44 : vector<1x64x256xbf16> to vector<64x256xbf16>
    %cst_16 = arith.constant dense<0.000000e+00> : vector<32x256xf32>
    %46 = tpu.matmul %43, %45, %cst_16 {dimension_numbers = #tpu.dot_dimension_numbers<[1], [0], [0], [1], [0, 0, 1, 1], [], []>} : vector<32x64xbf16>, vector<64x256xbf16>, vector<32x256xf32> -> vector<32x256xf32>
    %47 = arith.addf %33, %46 : vector<32x256xf32>
    %c2_i32_17 = arith.constant 2 : i32
    %48 = vector.broadcast %c2_i32_17 : i32 to vector<32x64xi32>
    %49 = arith.muli %48, %3 : vector<32x64xi32>
    %c2_i32_18 = arith.constant 2 : i32
    %50 = vector.broadcast %c2_i32_18 : i32 to vector<32x64xi32>
    %51 = arith.addi %49, %50 : vector<32x64xi32>
    %52 = arith.cmpi eq, %4, %51 : vector<32x64xi32>
    %53 = arith.extui %52 : vector<32x64xi1> to vector<32x64xi32>
    %54 = arith.sitofp %53 : vector<32x64xi32> to vector<32x64xf32>
    %55 = arith.truncf %54 : vector<32x64xf32> to vector<32x64xbf16>
    %cst_19 = arith.constant dense<0.000000e+00> : vector<32x64xf32>
    %56 = tpu.matmul %55, %2, %cst_19 {dimension_numbers = #tpu.dot_dimension_numbers<[1], [0], [0], [1], [0, 0, 1, 1], [], []>} : vector<32x64xbf16>, vector<64x64xbf16>, vector<32x64xf32> -> vector<32x64xf32>
    %57 = arith.truncf %56 : vector<32x64xf32> to vector<32x64xbf16>
    %c3 = arith.constant 3 : index
    %c0_20 = arith.constant 0 : index
    %c0_21 = arith.constant 0 : index
    %58 = vector.load %arg2[%c3, %c0_20, %c0_21] : memref<4x64x256xbf16, #tpu.memory_space<vmem>>, vector<1x64x256xbf16>
    %59 = vector.shape_cast %58 : vector<1x64x256xbf16> to vector<64x256xbf16>
    %cst_22 = arith.constant dense<0.000000e+00> : vector<32x256xf32>
    %60 = tpu.matmul %57, %59, %cst_22 {dimension_numbers = #tpu.dot_dimension_numbers<[1], [0], [0], [1], [0, 0, 1, 1], [], []>} : vector<32x64xbf16>, vector<64x256xbf16>, vector<32x256xf32> -> vector<32x256xf32>
    %61 = arith.addf %47, %60 : vector<32x256xf32>
    %c0_23 = arith.constant 0 : index
    %c0_24 = arith.constant 0 : index
    %62 = vector.load %arg9[%c0_23, %c0_24] : memref<1x256xf32, #tpu.memory_space<vmem>>, vector<1x256xf32>
    %63 = vector.broadcast %62 : vector<1x256xf32> to vector<32x256xf32>
    %64 = arith.addf %61, %63 : vector<32x256xf32>
    %cst_25 = arith.constant 0.000000e+00 : f32
    %65 = vector.broadcast %cst_25 : f32 to vector<32x256xf32>
    %66 = arith.cmpf oge, %64, %65 : vector<32x256xf32>
    %cst_26 = arith.constant 2.000000e-01 : f32
    %67 = vector.broadcast %cst_26 : f32 to vector<32x256xf32>
    %68 = arith.mulf %67, %64 : vector<32x256xf32>
    %69 = arith.select %66, %64, %68 : vector<32x256xi1>, vector<32x256xf32>
    %70 = arith.truncf %69 : vector<32x256xf32> to vector<32x256xbf16>
    %71 = tpu.iota {dimensions = array<i32: 0>} : vector<16x32xi32>
    %72 = tpu.iota {dimensions = array<i32: 1>} : vector<16x32xi32>
    %cst_27 = arith.constant 0.000000e+00 : f32
    %73 = vector.broadcast %cst_27 : f32 to vector<16x256xf32>
    %c2_i32_28 = arith.constant 2 : i32
    %74 = vector.broadcast %c2_i32_28 : i32 to vector<16x32xi32>
    %75 = arith.muli %74, %71 : vector<16x32xi32>
    %c-1_i32_29 = arith.constant -1 : i32
    %76 = vector.broadcast %c-1_i32_29 : i32 to vector<16x32xi32>
    %77 = arith.addi %75, %76 : vector<16x32xi32>
    %78 = arith.cmpi eq, %72, %77 : vector<16x32xi32>
    %79 = arith.extui %78 : vector<16x32xi1> to vector<16x32xi32>
    %80 = arith.sitofp %79 : vector<16x32xi32> to vector<16x32xf32>
    %81 = arith.truncf %80 : vector<16x32xf32> to vector<16x32xbf16>
    %cst_30 = arith.constant dense<0.000000e+00> : vector<16x256xf32>
    %82 = tpu.matmul %81, %70, %cst_30 {dimension_numbers = #tpu.dot_dimension_numbers<[1], [0], [0], [1], [0, 0, 1, 1], [], []>} : vector<16x32xbf16>, vector<32x256xbf16>, vector<16x256xf32> -> vector<16x256xf32>
    %83 = arith.truncf %82 : vector<16x256xf32> to vector<16x256xbf16>
    %c0_31 = arith.constant 0 : index
    %c0_32 = arith.constant 0 : index
    %c0_33 = arith.constant 0 : index
    %84 = vector.load %arg3[%c0_31, %c0_32, %c0_33] : memref<4x256x256xbf16, #tpu.memory_space<vmem>>, vector<1x256x256xbf16>
    %85 = vector.shape_cast %84 : vector<1x256x256xbf16> to vector<256x256xbf16>
    %cst_34 = arith.constant dense<0.000000e+00> : vector<16x256xf32>
    %86 = tpu.matmul %83, %85, %cst_34 {dimension_numbers = #tpu.dot_dimension_numbers<[1], [0], [0], [1], [0, 0, 1, 1], [], []>} : vector<16x256xbf16>, vector<256x256xbf16>, vector<16x256xf32> -> vector<16x256xf32>
    %87 = arith.addf %73, %86 : vector<16x256xf32>
    %c2_i32_35 = arith.constant 2 : i32
    %88 = vector.broadcast %c2_i32_35 : i32 to vector<16x32xi32>
    %89 = arith.muli %88, %71 : vector<16x32xi32>
    %c0_i32_36 = arith.constant 0 : i32
    %90 = vector.broadcast %c0_i32_36 : i32 to vector<16x32xi32>
    %91 = arith.addi %89, %90 : vector<16x32xi32>
    %92 = arith.cmpi eq, %72, %91 : vector<16x32xi32>
    %93 = arith.extui %92 : vector<16x32xi1> to vector<16x32xi32>
    %94 = arith.sitofp %93 : vector<16x32xi32> to vector<16x32xf32>
    %95 = arith.truncf %94 : vector<16x32xf32> to vector<16x32xbf16>
    %cst_37 = arith.constant dense<0.000000e+00> : vector<16x256xf32>
    %96 = tpu.matmul %95, %70, %cst_37 {dimension_numbers = #tpu.dot_dimension_numbers<[1], [0], [0], [1], [0, 0, 1, 1], [], []>} : vector<16x32xbf16>, vector<32x256xbf16>, vector<16x256xf32> -> vector<16x256xf32>
    %97 = arith.truncf %96 : vector<16x256xf32> to vector<16x256xbf16>
    %c1_38 = arith.constant 1 : index
    %c0_39 = arith.constant 0 : index
    %c0_40 = arith.constant 0 : index
    %98 = vector.load %arg3[%c1_38, %c0_39, %c0_40] : memref<4x256x256xbf16, #tpu.memory_space<vmem>>, vector<1x256x256xbf16>
    %99 = vector.shape_cast %98 : vector<1x256x256xbf16> to vector<256x256xbf16>
    %cst_41 = arith.constant dense<0.000000e+00> : vector<16x256xf32>
    %100 = tpu.matmul %97, %99, %cst_41 {dimension_numbers = #tpu.dot_dimension_numbers<[1], [0], [0], [1], [0, 0, 1, 1], [], []>} : vector<16x256xbf16>, vector<256x256xbf16>, vector<16x256xf32> -> vector<16x256xf32>
    %101 = arith.addf %87, %100 : vector<16x256xf32>
    %c2_i32_42 = arith.constant 2 : i32
    %102 = vector.broadcast %c2_i32_42 : i32 to vector<16x32xi32>
    %103 = arith.muli %102, %71 : vector<16x32xi32>
    %c1_i32_43 = arith.constant 1 : i32
    %104 = vector.broadcast %c1_i32_43 : i32 to vector<16x32xi32>
    %105 = arith.addi %103, %104 : vector<16x32xi32>
    %106 = arith.cmpi eq, %72, %105 : vector<16x32xi32>
    %107 = arith.extui %106 : vector<16x32xi1> to vector<16x32xi32>
    %108 = arith.sitofp %107 : vector<16x32xi32> to vector<16x32xf32>
    %109 = arith.truncf %108 : vector<16x32xf32> to vector<16x32xbf16>
    %cst_44 = arith.constant dense<0.000000e+00> : vector<16x256xf32>
    %110 = tpu.matmul %109, %70, %cst_44 {dimension_numbers = #tpu.dot_dimension_numbers<[1], [0], [0], [1], [0, 0, 1, 1], [], []>} : vector<16x32xbf16>, vector<32x256xbf16>, vector<16x256xf32> -> vector<16x256xf32>
    %111 = arith.truncf %110 : vector<16x256xf32> to vector<16x256xbf16>
    %c2_45 = arith.constant 2 : index
    %c0_46 = arith.constant 0 : index
    %c0_47 = arith.constant 0 : index
    %112 = vector.load %arg3[%c2_45, %c0_46, %c0_47] : memref<4x256x256xbf16, #tpu.memory_space<vmem>>, vector<1x256x256xbf16>
    %113 = vector.shape_cast %112 : vector<1x256x256xbf16> to vector<256x256xbf16>
    %cst_48 = arith.constant dense<0.000000e+00> : vector<16x256xf32>
    %114 = tpu.matmul %111, %113, %cst_48 {dimension_numbers = #tpu.dot_dimension_numbers<[1], [0], [0], [1], [0, 0, 1, 1], [], []>} : vector<16x256xbf16>, vector<256x256xbf16>, vector<16x256xf32> -> vector<16x256xf32>
    %115 = arith.addf %101, %114 : vector<16x256xf32>
    %c2_i32_49 = arith.constant 2 : i32
    %116 = vector.broadcast %c2_i32_49 : i32 to vector<16x32xi32>
    %117 = arith.muli %116, %71 : vector<16x32xi32>
    %c2_i32_50 = arith.constant 2 : i32
    %118 = vector.broadcast %c2_i32_50 : i32 to vector<16x32xi32>
    %119 = arith.addi %117, %118 : vector<16x32xi32>
    %120 = arith.cmpi eq, %72, %119 : vector<16x32xi32>
    %121 = arith.extui %120 : vector<16x32xi1> to vector<16x32xi32>
    %122 = arith.sitofp %121 : vector<16x32xi32> to vector<16x32xf32>
    %123 = arith.truncf %122 : vector<16x32xf32> to vector<16x32xbf16>
    %cst_51 = arith.constant dense<0.000000e+00> : vector<16x256xf32>
    %124 = tpu.matmul %123, %70, %cst_51 {dimension_numbers = #tpu.dot_dimension_numbers<[1], [0], [0], [1], [0, 0, 1, 1], [], []>} : vector<16x32xbf16>, vector<32x256xbf16>, vector<16x256xf32> -> vector<16x256xf32>
    %125 = arith.truncf %124 : vector<16x256xf32> to vector<16x256xbf16>
    %c3_52 = arith.constant 3 : index
    %c0_53 = arith.constant 0 : index
    %c0_54 = arith.constant 0 : index
    %126 = vector.load %arg3[%c3_52, %c0_53, %c0_54] : memref<4x256x256xbf16, #tpu.memory_space<vmem>>, vector<1x256x256xbf16>
    %127 = vector.shape_cast %126 : vector<1x256x256xbf16> to vector<256x256xbf16>
    %cst_55 = arith.constant dense<0.000000e+00> : vector<16x256xf32>
    %128 = tpu.matmul %125, %127, %cst_55 {dimension_numbers = #tpu.dot_dimension_numbers<[1], [0], [0], [1], [0, 0, 1, 1], [], []>} : vector<16x256xbf16>, vector<256x256xbf16>, vector<16x256xf32> -> vector<16x256xf32>
    %129 = arith.addf %115, %128 : vector<16x256xf32>
    %c0_56 = arith.constant 0 : index
    %c0_57 = arith.constant 0 : index
    %130 = vector.load %arg10[%c0_56, %c0_57] : memref<1x256xf32, #tpu.memory_space<vmem>>, vector<1x256xf32>
    %131 = vector.broadcast %130 : vector<1x256xf32> to vector<16x256xf32>
    %132 = arith.addf %129, %131 : vector<16x256xf32>
    %cst_58 = arith.constant 0.000000e+00 : f32
    %133 = vector.broadcast %cst_58 : f32 to vector<16x256xf32>
    %134 = arith.cmpf oge, %132, %133 : vector<16x256xf32>
    %cst_59 = arith.constant 2.000000e-01 : f32
    %135 = vector.broadcast %cst_59 : f32 to vector<16x256xf32>
    %136 = arith.mulf %135, %132 : vector<16x256xf32>
    %137 = arith.select %134, %132, %136 : vector<16x256xi1>, vector<16x256xf32>
    %138 = arith.truncf %137 : vector<16x256xf32> to vector<16x256xbf16>
    %139 = tpu.iota {dimensions = array<i32: 0>} : vector<8x16xi32>
    %140 = tpu.iota {dimensions = array<i32: 1>} : vector<8x16xi32>
    %cst_60 = arith.constant 0.000000e+00 : f32
    %141 = vector.broadcast %cst_60 : f32 to vector<8x256xf32>
    %c2_i32_61 = arith.constant 2 : i32
    %142 = vector.broadcast %c2_i32_61 : i32 to vector<8x16xi32>
    %143 = arith.muli %142, %139 : vector<8x16xi32>
    %c-1_i32_62 = arith.constant -1 : i32
    %144 = vector.broadcast %c-1_i32_62 : i32 to vector<8x16xi32>
    %145 = arith.addi %143, %144 : vector<8x16xi32>
    %146 = arith.cmpi eq, %140, %145 : vector<8x16xi32>
    %147 = arith.extui %146 : vector<8x16xi1> to vector<8x16xi32>
    %148 = arith.sitofp %147 : vector<8x16xi32> to vector<8x16xf32>
    %149 = arith.truncf %148 : vector<8x16xf32> to vector<8x16xbf16>
    %cst_63 = arith.constant dense<0.000000e+00> : vector<8x256xf32>
    %150 = tpu.matmul %149, %138, %cst_63 {dimension_numbers = #tpu.dot_dimension_numbers<[1], [0], [0], [1], [0, 0, 1, 1], [], []>} : vector<8x16xbf16>, vector<16x256xbf16>, vector<8x256xf32> -> vector<8x256xf32>
    %151 = arith.truncf %150 : vector<8x256xf32> to vector<8x256xbf16>
    %c0_64 = arith.constant 0 : index
    %c0_65 = arith.constant 0 : index
    %c0_66 = arith.constant 0 : index
    %152 = vector.load %arg4[%c0_64, %c0_65, %c0_66] : memref<4x256x256xbf16, #tpu.memory_space<vmem>>, vector<1x256x256xbf16>
    %153 = vector.shape_cast %152 : vector<1x256x256xbf16> to vector<256x256xbf16>
    %cst_67 = arith.constant dense<0.000000e+00> : vector<8x256xf32>
    %154 = tpu.matmul %151, %153, %cst_67 {dimension_numbers = #tpu.dot_dimension_numbers<[1], [0], [0], [1], [0, 0, 1, 1], [], []>} : vector<8x256xbf16>, vector<256x256xbf16>, vector<8x256xf32> -> vector<8x256xf32>
    %155 = arith.addf %141, %154 : vector<8x256xf32>
    %c2_i32_68 = arith.constant 2 : i32
    %156 = vector.broadcast %c2_i32_68 : i32 to vector<8x16xi32>
    %157 = arith.muli %156, %139 : vector<8x16xi32>
    %c0_i32_69 = arith.constant 0 : i32
    %158 = vector.broadcast %c0_i32_69 : i32 to vector<8x16xi32>
    %159 = arith.addi %157, %158 : vector<8x16xi32>
    %160 = arith.cmpi eq, %140, %159 : vector<8x16xi32>
    %161 = arith.extui %160 : vector<8x16xi1> to vector<8x16xi32>
    %162 = arith.sitofp %161 : vector<8x16xi32> to vector<8x16xf32>
    %163 = arith.truncf %162 : vector<8x16xf32> to vector<8x16xbf16>
    %cst_70 = arith.constant dense<0.000000e+00> : vector<8x256xf32>
    %164 = tpu.matmul %163, %138, %cst_70 {dimension_numbers = #tpu.dot_dimension_numbers<[1], [0], [0], [1], [0, 0, 1, 1], [], []>} : vector<8x16xbf16>, vector<16x256xbf16>, vector<8x256xf32> -> vector<8x256xf32>
    %165 = arith.truncf %164 : vector<8x256xf32> to vector<8x256xbf16>
    %c1_71 = arith.constant 1 : index
    %c0_72 = arith.constant 0 : index
    %c0_73 = arith.constant 0 : index
    %166 = vector.load %arg4[%c1_71, %c0_72, %c0_73] : memref<4x256x256xbf16, #tpu.memory_space<vmem>>, vector<1x256x256xbf16>
    %167 = vector.shape_cast %166 : vector<1x256x256xbf16> to vector<256x256xbf16>
    %cst_74 = arith.constant dense<0.000000e+00> : vector<8x256xf32>
    %168 = tpu.matmul %165, %167, %cst_74 {dimension_numbers = #tpu.dot_dimension_numbers<[1], [0], [0], [1], [0, 0, 1, 1], [], []>} : vector<8x256xbf16>, vector<256x256xbf16>, vector<8x256xf32> -> vector<8x256xf32>
    %169 = arith.addf %155, %168 : vector<8x256xf32>
    %c2_i32_75 = arith.constant 2 : i32
    %170 = vector.broadcast %c2_i32_75 : i32 to vector<8x16xi32>
    %171 = arith.muli %170, %139 : vector<8x16xi32>
    %c1_i32_76 = arith.constant 1 : i32
    %172 = vector.broadcast %c1_i32_76 : i32 to vector<8x16xi32>
    %173 = arith.addi %171, %172 : vector<8x16xi32>
    %174 = arith.cmpi eq, %140, %173 : vector<8x16xi32>
    %175 = arith.extui %174 : vector<8x16xi1> to vector<8x16xi32>
    %176 = arith.sitofp %175 : vector<8x16xi32> to vector<8x16xf32>
    %177 = arith.truncf %176 : vector<8x16xf32> to vector<8x16xbf16>
    %cst_77 = arith.constant dense<0.000000e+00> : vector<8x256xf32>
    %178 = tpu.matmul %177, %138, %cst_77 {dimension_numbers = #tpu.dot_dimension_numbers<[1], [0], [0], [1], [0, 0, 1, 1], [], []>} : vector<8x16xbf16>, vector<16x256xbf16>, vector<8x256xf32> -> vector<8x256xf32>
    %179 = arith.truncf %178 : vector<8x256xf32> to vector<8x256xbf16>
    %c2_78 = arith.constant 2 : index
    %c0_79 = arith.constant 0 : index
    %c0_80 = arith.constant 0 : index
    %180 = vector.load %arg4[%c2_78, %c0_79, %c0_80] : memref<4x256x256xbf16, #tpu.memory_space<vmem>>, vector<1x256x256xbf16>
    %181 = vector.shape_cast %180 : vector<1x256x256xbf16> to vector<256x256xbf16>
    %cst_81 = arith.constant dense<0.000000e+00> : vector<8x256xf32>
    %182 = tpu.matmul %179, %181, %cst_81 {dimension_numbers = #tpu.dot_dimension_numbers<[1], [0], [0], [1], [0, 0, 1, 1], [], []>} : vector<8x256xbf16>, vector<256x256xbf16>, vector<8x256xf32> -> vector<8x256xf32>
    %183 = arith.addf %169, %182 : vector<8x256xf32>
    %c2_i32_82 = arith.constant 2 : i32
    %184 = vector.broadcast %c2_i32_82 : i32 to vector<8x16xi32>
    %185 = arith.muli %184, %139 : vector<8x16xi32>
    %c2_i32_83 = arith.constant 2 : i32
    %186 = vector.broadcast %c2_i32_83 : i32 to vector<8x16xi32>
    %187 = arith.addi %185, %186 : vector<8x16xi32>
    %188 = arith.cmpi eq, %140, %187 : vector<8x16xi32>
    %189 = arith.extui %188 : vector<8x16xi1> to vector<8x16xi32>
    %190 = arith.sitofp %189 : vector<8x16xi32> to vector<8x16xf32>
    %191 = arith.truncf %190 : vector<8x16xf32> to vector<8x16xbf16>
    %cst_84 = arith.constant dense<0.000000e+00> : vector<8x256xf32>
    %192 = tpu.matmul %191, %138, %cst_84 {dimension_numbers = #tpu.dot_dimension_numbers<[1], [0], [0], [1], [0, 0, 1, 1], [], []>} : vector<8x16xbf16>, vector<16x256xbf16>, vector<8x256xf32> -> vector<8x256xf32>
    %193 = arith.truncf %192 : vector<8x256xf32> to vector<8x256xbf16>
    %c3_85 = arith.constant 3 : index
    %c0_86 = arith.constant 0 : index
    %c0_87 = arith.constant 0 : index
    %194 = vector.load %arg4[%c3_85, %c0_86, %c0_87] : memref<4x256x256xbf16, #tpu.memory_space<vmem>>, vector<1x256x256xbf16>
    %195 = vector.shape_cast %194 : vector<1x256x256xbf16> to vector<256x256xbf16>
    %cst_88 = arith.constant dense<0.000000e+00> : vector<8x256xf32>
    %196 = tpu.matmul %193, %195, %cst_88 {dimension_numbers = #tpu.dot_dimension_numbers<[1], [0], [0], [1], [0, 0, 1, 1], [], []>} : vector<8x256xbf16>, vector<256x256xbf16>, vector<8x256xf32> -> vector<8x256xf32>
    %197 = arith.addf %183, %196 : vector<8x256xf32>
    %c0_89 = arith.constant 0 : index
    %c0_90 = arith.constant 0 : index
    %198 = vector.load %arg11[%c0_89, %c0_90] : memref<1x256xf32, #tpu.memory_space<vmem>>, vector<1x256xf32>
    %199 = vector.broadcast %198 : vector<1x256xf32> to vector<8x256xf32>
    %200 = arith.addf %197, %199 : vector<8x256xf32>
    %cst_91 = arith.constant 0.000000e+00 : f32
    %201 = vector.broadcast %cst_91 : f32 to vector<8x256xf32>
    %202 = arith.cmpf oge, %200, %201 : vector<8x256xf32>
    %cst_92 = arith.constant 2.000000e-01 : f32
    %203 = vector.broadcast %cst_92 : f32 to vector<8x256xf32>
    %204 = arith.mulf %203, %200 : vector<8x256xf32>
    %205 = arith.select %202, %200, %204 : vector<8x256xi1>, vector<8x256xf32>
    %206 = arith.truncf %205 : vector<8x256xf32> to vector<8x256xbf16>
    %207 = tpu.iota {dimensions = array<i32: 0>} : vector<4x8xi32>
    %208 = tpu.iota {dimensions = array<i32: 1>} : vector<4x8xi32>
    %cst_93 = arith.constant 0.000000e+00 : f32
    %209 = vector.broadcast %cst_93 : f32 to vector<4x256xf32>
    %c2_i32_94 = arith.constant 2 : i32
    %210 = vector.broadcast %c2_i32_94 : i32 to vector<4x8xi32>
    %211 = arith.muli %210, %207 : vector<4x8xi32>
    %c-1_i32_95 = arith.constant -1 : i32
    %212 = vector.broadcast %c-1_i32_95 : i32 to vector<4x8xi32>
    %213 = arith.addi %211, %212 : vector<4x8xi32>
    %214 = arith.cmpi eq, %208, %213 : vector<4x8xi32>
    %215 = arith.extui %214 : vector<4x8xi1> to vector<4x8xi32>
    %216 = arith.sitofp %215 : vector<4x8xi32> to vector<4x8xf32>
    %217 = arith.truncf %216 : vector<4x8xf32> to vector<4x8xbf16>
    %cst_96 = arith.constant dense<0.000000e+00> : vector<4x256xf32>
    %218 = tpu.matmul %217, %206, %cst_96 {dimension_numbers = #tpu.dot_dimension_numbers<[1], [0], [0], [1], [0, 0, 1, 1], [], []>} : vector<4x8xbf16>, vector<8x256xbf16>, vector<4x256xf32> -> vector<4x256xf32>
    %219 = arith.truncf %218 : vector<4x256xf32> to vector<4x256xbf16>
    %c0_97 = arith.constant 0 : index
    %c0_98 = arith.constant 0 : index
    %c0_99 = arith.constant 0 : index
    %220 = vector.load %arg5[%c0_97, %c0_98, %c0_99] : memref<4x256x256xbf16, #tpu.memory_space<vmem>>, vector<1x256x256xbf16>
    %221 = vector.shape_cast %220 : vector<1x256x256xbf16> to vector<256x256xbf16>
    %cst_100 = arith.constant dense<0.000000e+00> : vector<4x256xf32>
    %222 = tpu.matmul %219, %221, %cst_100 {dimension_numbers = #tpu.dot_dimension_numbers<[1], [0], [0], [1], [0, 0, 1, 1], [], []>} : vector<4x256xbf16>, vector<256x256xbf16>, vector<4x256xf32> -> vector<4x256xf32>
    %223 = arith.addf %209, %222 : vector<4x256xf32>
    %c2_i32_101 = arith.constant 2 : i32
    %224 = vector.broadcast %c2_i32_101 : i32 to vector<4x8xi32>
    %225 = arith.muli %224, %207 : vector<4x8xi32>
    %c0_i32_102 = arith.constant 0 : i32
    %226 = vector.broadcast %c0_i32_102 : i32 to vector<4x8xi32>
    %227 = arith.addi %225, %226 : vector<4x8xi32>
    %228 = arith.cmpi eq, %208, %227 : vector<4x8xi32>
    %229 = arith.extui %228 : vector<4x8xi1> to vector<4x8xi32>
    %230 = arith.sitofp %229 : vector<4x8xi32> to vector<4x8xf32>
    %231 = arith.truncf %230 : vector<4x8xf32> to vector<4x8xbf16>
    %cst_103 = arith.constant dense<0.000000e+00> : vector<4x256xf32>
    %232 = tpu.matmul %231, %206, %cst_103 {dimension_numbers = #tpu.dot_dimension_numbers<[1], [0], [0], [1], [0, 0, 1, 1], [], []>} : vector<4x8xbf16>, vector<8x256xbf16>, vector<4x256xf32> -> vector<4x256xf32>
    %233 = arith.truncf %232 : vector<4x256xf32> to vector<4x256xbf16>
    %c1_104 = arith.constant 1 : index
    %c0_105 = arith.constant 0 : index
    %c0_106 = arith.constant 0 : index
    %234 = vector.load %arg5[%c1_104, %c0_105, %c0_106] : memref<4x256x256xbf16, #tpu.memory_space<vmem>>, vector<1x256x256xbf16>
    %235 = vector.shape_cast %234 : vector<1x256x256xbf16> to vector<256x256xbf16>
    %cst_107 = arith.constant dense<0.000000e+00> : vector<4x256xf32>
    %236 = tpu.matmul %233, %235, %cst_107 {dimension_numbers = #tpu.dot_dimension_numbers<[1], [0], [0], [1], [0, 0, 1, 1], [], []>} : vector<4x256xbf16>, vector<256x256xbf16>, vector<4x256xf32> -> vector<4x256xf32>
    %237 = arith.addf %223, %236 : vector<4x256xf32>
    %c2_i32_108 = arith.constant 2 : i32
    %238 = vector.broadcast %c2_i32_108 : i32 to vector<4x8xi32>
    %239 = arith.muli %238, %207 : vector<4x8xi32>
    %c1_i32_109 = arith.constant 1 : i32
    %240 = vector.broadcast %c1_i32_109 : i32 to vector<4x8xi32>
    %241 = arith.addi %239, %240 : vector<4x8xi32>
    %242 = arith.cmpi eq, %208, %241 : vector<4x8xi32>
    %243 = arith.extui %242 : vector<4x8xi1> to vector<4x8xi32>
    %244 = arith.sitofp %243 : vector<4x8xi32> to vector<4x8xf32>
    %245 = arith.truncf %244 : vector<4x8xf32> to vector<4x8xbf16>
    %cst_110 = arith.constant dense<0.000000e+00> : vector<4x256xf32>
    %246 = tpu.matmul %245, %206, %cst_110 {dimension_numbers = #tpu.dot_dimension_numbers<[1], [0], [0], [1], [0, 0, 1, 1], [], []>} : vector<4x8xbf16>, vector<8x256xbf16>, vector<4x256xf32> -> vector<4x256xf32>
    %247 = arith.truncf %246 : vector<4x256xf32> to vector<4x256xbf16>
    %c2_111 = arith.constant 2 : index
    %c0_112 = arith.constant 0 : index
    %c0_113 = arith.constant 0 : index
    %248 = vector.load %arg5[%c2_111, %c0_112, %c0_113] : memref<4x256x256xbf16, #tpu.memory_space<vmem>>, vector<1x256x256xbf16>
    %249 = vector.shape_cast %248 : vector<1x256x256xbf16> to vector<256x256xbf16>
    %cst_114 = arith.constant dense<0.000000e+00> : vector<4x256xf32>
    %250 = tpu.matmul %247, %249, %cst_114 {dimension_numbers = #tpu.dot_dimension_numbers<[1], [0], [0], [1], [0, 0, 1, 1], [], []>} : vector<4x256xbf16>, vector<256x256xbf16>, vector<4x256xf32> -> vector<4x256xf32>
    %251 = arith.addf %237, %250 : vector<4x256xf32>
    %c2_i32_115 = arith.constant 2 : i32
    %252 = vector.broadcast %c2_i32_115 : i32 to vector<4x8xi32>
    %253 = arith.muli %252, %207 : vector<4x8xi32>
    %c2_i32_116 = arith.constant 2 : i32
    %254 = vector.broadcast %c2_i32_116 : i32 to vector<4x8xi32>
    %255 = arith.addi %253, %254 : vector<4x8xi32>
    %256 = arith.cmpi eq, %208, %255 : vector<4x8xi32>
    %257 = arith.extui %256 : vector<4x8xi1> to vector<4x8xi32>
    %258 = arith.sitofp %257 : vector<4x8xi32> to vector<4x8xf32>
    %259 = arith.truncf %258 : vector<4x8xf32> to vector<4x8xbf16>
    %cst_117 = arith.constant dense<0.000000e+00> : vector<4x256xf32>
    %260 = tpu.matmul %259, %206, %cst_117 {dimension_numbers = #tpu.dot_dimension_numbers<[1], [0], [0], [1], [0, 0, 1, 1], [], []>} : vector<4x8xbf16>, vector<8x256xbf16>, vector<4x256xf32> -> vector<4x256xf32>
    %261 = arith.truncf %260 : vector<4x256xf32> to vector<4x256xbf16>
    %c3_118 = arith.constant 3 : index
    %c0_119 = arith.constant 0 : index
    %c0_120 = arith.constant 0 : index
    %262 = vector.load %arg5[%c3_118, %c0_119, %c0_120] : memref<4x256x256xbf16, #tpu.memory_space<vmem>>, vector<1x256x256xbf16>
    %263 = vector.shape_cast %262 : vector<1x256x256xbf16> to vector<256x256xbf16>
    %cst_121 = arith.constant dense<0.000000e+00> : vector<4x256xf32>
    %264 = tpu.matmul %261, %263, %cst_121 {dimension_numbers = #tpu.dot_dimension_numbers<[1], [0], [0], [1], [0, 0, 1, 1], [], []>} : vector<4x256xbf16>, vector<256x256xbf16>, vector<4x256xf32> -> vector<4x256xf32>
    %265 = arith.addf %251, %264 : vector<4x256xf32>
    %c0_122 = arith.constant 0 : index
    %c0_123 = arith.constant 0 : index
    %266 = vector.load %arg12[%c0_122, %c0_123] : memref<1x256xf32, #tpu.memory_space<vmem>>, vector<1x256xf32>
    %267 = vector.broadcast %266 : vector<1x256xf32> to vector<4x256xf32>
    %268 = arith.addf %265, %267 : vector<4x256xf32>
    %cst_124 = arith.constant 0.000000e+00 : f32
    %269 = vector.broadcast %cst_124 : f32 to vector<4x256xf32>
    %270 = arith.cmpf oge, %268, %269 : vector<4x256xf32>
    %cst_125 = arith.constant 2.000000e-01 : f32
    %271 = vector.broadcast %cst_125 : f32 to vector<4x256xf32>
    %272 = arith.mulf %271, %268 : vector<4x256xf32>
    %273 = arith.select %270, %268, %272 : vector<4x256xi1>, vector<4x256xf32>
    %274 = arith.truncf %273 : vector<4x256xf32> to vector<4x256xbf16>
    %275 = tpu.iota {dimensions = array<i32: 0>} : vector<2x4xi32>
    %276 = tpu.iota {dimensions = array<i32: 1>} : vector<2x4xi32>
    %cst_126 = arith.constant 0.000000e+00 : f32
    %277 = vector.broadcast %cst_126 : f32 to vector<2x128xf32>
    %c2_i32_127 = arith.constant 2 : i32
    %278 = vector.broadcast %c2_i32_127 : i32 to vector<2x4xi32>
    %279 = arith.muli %278, %275 : vector<2x4xi32>
    %c-1_i32_128 = arith.constant -1 : i32
    %280 = vector.broadcast %c-1_i32_128 : i32 to vector<2x4xi32>
    %281 = arith.addi %279, %280 : vector<2x4xi32>
    %282 = arith.cmpi eq, %276, %281 : vector<2x4xi32>
    %283 = arith.extui %282 : vector<2x4xi1> to vector<2x4xi32>
    %284 = arith.sitofp %283 : vector<2x4xi32> to vector<2x4xf32>
    %285 = arith.truncf %284 : vector<2x4xf32> to vector<2x4xbf16>
    %cst_129 = arith.constant dense<0.000000e+00> : vector<2x256xf32>
    %286 = tpu.matmul %285, %274, %cst_129 {dimension_numbers = #tpu.dot_dimension_numbers<[1], [0], [0], [1], [0, 0, 1, 1], [], []>} : vector<2x4xbf16>, vector<4x256xbf16>, vector<2x256xf32> -> vector<2x256xf32>
    %287 = arith.truncf %286 : vector<2x256xf32> to vector<2x256xbf16>
    %c0_130 = arith.constant 0 : index
    %c0_131 = arith.constant 0 : index
    %c0_132 = arith.constant 0 : index
    %288 = vector.load %arg6[%c0_130, %c0_131, %c0_132] : memref<4x256x128xbf16, #tpu.memory_space<vmem>>, vector<1x256x128xbf16>
    %289 = vector.shape_cast %288 : vector<1x256x128xbf16> to vector<256x128xbf16>
    %cst_133 = arith.constant dense<0.000000e+00> : vector<2x128xf32>
    %290 = tpu.matmul %287, %289, %cst_133 {dimension_numbers = #tpu.dot_dimension_numbers<[1], [0], [0], [1], [0, 0, 1, 1], [], []>} : vector<2x256xbf16>, vector<256x128xbf16>, vector<2x128xf32> -> vector<2x128xf32>
    %291 = arith.addf %277, %290 : vector<2x128xf32>
    %c2_i32_134 = arith.constant 2 : i32
    %292 = vector.broadcast %c2_i32_134 : i32 to vector<2x4xi32>
    %293 = arith.muli %292, %275 : vector<2x4xi32>
    %c0_i32_135 = arith.constant 0 : i32
    %294 = vector.broadcast %c0_i32_135 : i32 to vector<2x4xi32>
    %295 = arith.addi %293, %294 : vector<2x4xi32>
    %296 = arith.cmpi eq, %276, %295 : vector<2x4xi32>
    %297 = arith.extui %296 : vector<2x4xi1> to vector<2x4xi32>
    %298 = arith.sitofp %297 : vector<2x4xi32> to vector<2x4xf32>
    %299 = arith.truncf %298 : vector<2x4xf32> to vector<2x4xbf16>
    %cst_136 = arith.constant dense<0.000000e+00> : vector<2x256xf32>
    %300 = tpu.matmul %299, %274, %cst_136 {dimension_numbers = #tpu.dot_dimension_numbers<[1], [0], [0], [1], [0, 0, 1, 1], [], []>} : vector<2x4xbf16>, vector<4x256xbf16>, vector<2x256xf32> -> vector<2x256xf32>
    %301 = arith.truncf %300 : vector<2x256xf32> to vector<2x256xbf16>
    %c1_137 = arith.constant 1 : index
    %c0_138 = arith.constant 0 : index
    %c0_139 = arith.constant 0 : index
    %302 = vector.load %arg6[%c1_137, %c0_138, %c0_139] : memref<4x256x128xbf16, #tpu.memory_space<vmem>>, vector<1x256x128xbf16>
    %303 = vector.shape_cast %302 : vector<1x256x128xbf16> to vector<256x128xbf16>
    %cst_140 = arith.constant dense<0.000000e+00> : vector<2x128xf32>
    %304 = tpu.matmul %301, %303, %cst_140 {dimension_numbers = #tpu.dot_dimension_numbers<[1], [0], [0], [1], [0, 0, 1, 1], [], []>} : vector<2x256xbf16>, vector<256x128xbf16>, vector<2x128xf32> -> vector<2x128xf32>
    %305 = arith.addf %291, %304 : vector<2x128xf32>
    %c2_i32_141 = arith.constant 2 : i32
    %306 = vector.broadcast %c2_i32_141 : i32 to vector<2x4xi32>
    %307 = arith.muli %306, %275 : vector<2x4xi32>
    %c1_i32_142 = arith.constant 1 : i32
    %308 = vector.broadcast %c1_i32_142 : i32 to vector<2x4xi32>
    %309 = arith.addi %307, %308 : vector<2x4xi32>
    %310 = arith.cmpi eq, %276, %309 : vector<2x4xi32>
    %311 = arith.extui %310 : vector<2x4xi1> to vector<2x4xi32>
    %312 = arith.sitofp %311 : vector<2x4xi32> to vector<2x4xf32>
    %313 = arith.truncf %312 : vector<2x4xf32> to vector<2x4xbf16>
    %cst_143 = arith.constant dense<0.000000e+00> : vector<2x256xf32>
    %314 = tpu.matmul %313, %274, %cst_143 {dimension_numbers = #tpu.dot_dimension_numbers<[1], [0], [0], [1], [0, 0, 1, 1], [], []>} : vector<2x4xbf16>, vector<4x256xbf16>, vector<2x256xf32> -> vector<2x256xf32>
    %315 = arith.truncf %314 : vector<2x256xf32> to vector<2x256xbf16>
    %c2_144 = arith.constant 2 : index
    %c0_145 = arith.constant 0 : index
    %c0_146 = arith.constant 0 : index
    %316 = vector.load %arg6[%c2_144, %c0_145, %c0_146] : memref<4x256x128xbf16, #tpu.memory_space<vmem>>, vector<1x256x128xbf16>
    %317 = vector.shape_cast %316 : vector<1x256x128xbf16> to vector<256x128xbf16>
    %cst_147 = arith.constant dense<0.000000e+00> : vector<2x128xf32>
    %318 = tpu.matmul %315, %317, %cst_147 {dimension_numbers = #tpu.dot_dimension_numbers<[1], [0], [0], [1], [0, 0, 1, 1], [], []>} : vector<2x256xbf16>, vector<256x128xbf16>, vector<2x128xf32> -> vector<2x128xf32>
    %319 = arith.addf %305, %318 : vector<2x128xf32>
    %c2_i32_148 = arith.constant 2 : i32
    %320 = vector.broadcast %c2_i32_148 : i32 to vector<2x4xi32>
    %321 = arith.muli %320, %275 : vector<2x4xi32>
    %c2_i32_149 = arith.constant 2 : i32
    %322 = vector.broadcast %c2_i32_149 : i32 to vector<2x4xi32>
    %323 = arith.addi %321, %322 : vector<2x4xi32>
    %324 = arith.cmpi eq, %276, %323 : vector<2x4xi32>
    %325 = arith.extui %324 : vector<2x4xi1> to vector<2x4xi32>
    %326 = arith.sitofp %325 : vector<2x4xi32> to vector<2x4xf32>
    %327 = arith.truncf %326 : vector<2x4xf32> to vector<2x4xbf16>
    %cst_150 = arith.constant dense<0.000000e+00> : vector<2x256xf32>
    %328 = tpu.matmul %327, %274, %cst_150 {dimension_numbers = #tpu.dot_dimension_numbers<[1], [0], [0], [1], [0, 0, 1, 1], [], []>} : vector<2x4xbf16>, vector<4x256xbf16>, vector<2x256xf32> -> vector<2x256xf32>
    %329 = arith.truncf %328 : vector<2x256xf32> to vector<2x256xbf16>
    %c3_151 = arith.constant 3 : index
    %c0_152 = arith.constant 0 : index
    %c0_153 = arith.constant 0 : index
    %330 = vector.load %arg6[%c3_151, %c0_152, %c0_153] : memref<4x256x128xbf16, #tpu.memory_space<vmem>>, vector<1x256x128xbf16>
    %331 = vector.shape_cast %330 : vector<1x256x128xbf16> to vector<256x128xbf16>
    %cst_154 = arith.constant dense<0.000000e+00> : vector<2x128xf32>
    %332 = tpu.matmul %329, %331, %cst_154 {dimension_numbers = #tpu.dot_dimension_numbers<[1], [0], [0], [1], [0, 0, 1, 1], [], []>} : vector<2x256xbf16>, vector<256x128xbf16>, vector<2x128xf32> -> vector<2x128xf32>
    %333 = arith.addf %319, %332 : vector<2x128xf32>
    %c0_155 = arith.constant 0 : index
    %c0_156 = arith.constant 0 : index
    %334 = vector.load %arg13[%c0_155, %c0_156] : memref<1x128xf32, #tpu.memory_space<vmem>>, vector<1x128xf32>
    %335 = vector.broadcast %334 : vector<1x128xf32> to vector<2x128xf32>
    %336 = arith.addf %333, %335 : vector<2x128xf32>
    %cst_157 = arith.constant 0.000000e+00 : f32
    %337 = vector.broadcast %cst_157 : f32 to vector<2x128xf32>
    %338 = arith.cmpf oge, %336, %337 : vector<2x128xf32>
    %cst_158 = arith.constant 2.000000e-01 : f32
    %339 = vector.broadcast %cst_158 : f32 to vector<2x128xf32>
    %340 = arith.mulf %339, %336 : vector<2x128xf32>
    %341 = arith.select %338, %336, %340 : vector<2x128xi1>, vector<2x128xf32>
    %342 = arith.truncf %341 : vector<2x128xf32> to vector<2x128xbf16>
    %343 = tpu.iota {dimensions = array<i32: 0>} : vector<1x2xi32>
    %344 = tpu.iota {dimensions = array<i32: 1>} : vector<1x2xi32>
    %cst_159 = arith.constant 0.000000e+00 : f32
    %345 = vector.broadcast %cst_159 : f32 to vector<1x64xf32>
    %c2_i32_160 = arith.constant 2 : i32
    %346 = vector.broadcast %c2_i32_160 : i32 to vector<1x2xi32>
    %347 = arith.muli %346, %343 : vector<1x2xi32>
    %c0_i32_161 = arith.constant 0 : i32
    %348 = vector.broadcast %c0_i32_161 : i32 to vector<1x2xi32>
    %349 = arith.addi %347, %348 : vector<1x2xi32>
    %350 = arith.cmpi eq, %344, %349 : vector<1x2xi32>
    %351 = arith.extui %350 : vector<1x2xi1> to vector<1x2xi32>
    %352 = arith.sitofp %351 : vector<1x2xi32> to vector<1x2xf32>
    %353 = arith.truncf %352 : vector<1x2xf32> to vector<1x2xbf16>
    %cst_162 = arith.constant dense<0.000000e+00> : vector<1x128xf32>
    %354 = tpu.matmul %353, %342, %cst_162 {dimension_numbers = #tpu.dot_dimension_numbers<[1], [0], [0], [1], [0, 0, 1, 1], [], []>} : vector<1x2xbf16>, vector<2x128xbf16>, vector<1x128xf32> -> vector<1x128xf32>
    %355 = arith.truncf %354 : vector<1x128xf32> to vector<1x128xbf16>
    %c1_163 = arith.constant 1 : index
    %c0_164 = arith.constant 0 : index
    %c0_165 = arith.constant 0 : index
    %356 = vector.load %arg7[%c1_163, %c0_164, %c0_165] : memref<4x128x64xbf16, #tpu.memory_space<vmem>>, vector<1x128x64xbf16>
    %357 = vector.shape_cast %356 : vector<1x128x64xbf16> to vector<128x64xbf16>
    %cst_166 = arith.constant dense<0.000000e+00> : vector<1x64xf32>
    %358 = tpu.matmul %355, %357, %cst_166 {dimension_numbers = #tpu.dot_dimension_numbers<[1], [0], [0], [1], [0, 0, 1, 1], [], []>} : vector<1x128xbf16>, vector<128x64xbf16>, vector<1x64xf32> -> vector<1x64xf32>
    %359 = arith.addf %345, %358 : vector<1x64xf32>
    %c2_i32_167 = arith.constant 2 : i32
    %360 = vector.broadcast %c2_i32_167 : i32 to vector<1x2xi32>
    %361 = arith.muli %360, %343 : vector<1x2xi32>
    %c1_i32_168 = arith.constant 1 : i32
    %362 = vector.broadcast %c1_i32_168 : i32 to vector<1x2xi32>
    %363 = arith.addi %361, %362 : vector<1x2xi32>
    %364 = arith.cmpi eq, %344, %363 : vector<1x2xi32>
    %365 = arith.extui %364 : vector<1x2xi1> to vector<1x2xi32>
    %366 = arith.sitofp %365 : vector<1x2xi32> to vector<1x2xf32>
    %367 = arith.truncf %366 : vector<1x2xf32> to vector<1x2xbf16>
    %cst_169 = arith.constant dense<0.000000e+00> : vector<1x128xf32>
    %368 = tpu.matmul %367, %342, %cst_169 {dimension_numbers = #tpu.dot_dimension_numbers<[1], [0], [0], [1], [0, 0, 1, 1], [], []>} : vector<1x2xbf16>, vector<2x128xbf16>, vector<1x128xf32> -> vector<1x128xf32>
    %369 = arith.truncf %368 : vector<1x128xf32> to vector<1x128xbf16>
    %c2_170 = arith.constant 2 : index
    %c0_171 = arith.constant 0 : index
    %c0_172 = arith.constant 0 : index
    %370 = vector.load %arg7[%c2_170, %c0_171, %c0_172] : memref<4x128x64xbf16, #tpu.memory_space<vmem>>, vector<1x128x64xbf16>
    %371 = vector.shape_cast %370 : vector<1x128x64xbf16> to vector<128x64xbf16>
    %cst_173 = arith.constant dense<0.000000e+00> : vector<1x64xf32>
    %372 = tpu.matmul %369, %371, %cst_173 {dimension_numbers = #tpu.dot_dimension_numbers<[1], [0], [0], [1], [0, 0, 1, 1], [], []>} : vector<1x128xbf16>, vector<128x64xbf16>, vector<1x64xf32> -> vector<1x64xf32>
    %373 = arith.addf %359, %372 : vector<1x64xf32>
    %c0_174 = arith.constant 0 : index
    %c0_175 = arith.constant 0 : index
    %374 = vector.load %arg14[%c0_174, %c0_175] : memref<1x64xf32, #tpu.memory_space<vmem>>, vector<1x64xf32>
    %375 = arith.addf %373, %374 : vector<1x64xf32>
    %cst_176 = arith.constant 0.000000e+00 : f32
    %376 = vector.broadcast %cst_176 : f32 to vector<1x64xf32>
    %377 = arith.cmpf oge, %375, %376 : vector<1x64xf32>
    %cst_177 = arith.constant 2.000000e-01 : f32
    %378 = vector.broadcast %cst_177 : f32 to vector<1x64xf32>
    %379 = arith.mulf %378, %375 : vector<1x64xf32>
    %380 = arith.select %377, %375, %379 : vector<1x64xi1>, vector<1x64xf32>
    %381 = arith.truncf %380 : vector<1x64xf32> to vector<1x64xbf16>
    %cst_178 = arith.constant 0.000000e+00 : f32
    %382 = vector.broadcast %cst_178 : f32 to vector<1x1xf32>
    %c1_179 = arith.constant 1 : index
    %c0_180 = arith.constant 0 : index
    %c0_181 = arith.constant 0 : index
    %383 = vector.load %arg8[%c1_179, %c0_180, %c0_181] : memref<3x64x1xbf16, #tpu.memory_space<vmem>>, vector<1x64x1xbf16>
    %384 = vector.shape_cast %383 : vector<1x64x1xbf16> to vector<64x1xbf16>
    %cst_182 = arith.constant dense<0.000000e+00> : vector<1x1xf32>
    %385 = tpu.matmul %381, %384, %cst_182 {dimension_numbers = #tpu.dot_dimension_numbers<[1], [0], [0], [1], [0, 0, 1, 1], [], []>} : vector<1x64xbf16>, vector<64x1xbf16>, vector<1x1xf32> -> vector<1x1xf32>
    %386 = arith.addf %382, %385 : vector<1x1xf32>
    %c0_183 = arith.constant 0 : index
    %c0_184 = arith.constant 0 : index
    %387 = vector.load %arg15[%c0_183, %c0_184] : memref<1x1xf32, #tpu.memory_space<vmem>>, vector<1x1xf32>
    %388 = arith.addf %386, %387 : vector<1x1xf32>
    %389 = vector.shape_cast %388 : vector<1x1xf32> to vector<1x1x1xf32>
    %c0_185 = arith.constant 0 : index
    %c0_186 = arith.constant 0 : index
    %c0_187 = arith.constant 0 : index
    %390 = vector.load %arg16[%c0_185, %c0_186, %c0_187] : memref<1x1x1xf32, #tpu.memory_space<vmem>>, vector<1x1x1xf32>
    tpu.vector_store %arg16[%c0_185, %c0_186, %c0_187], %389 {strides = array<i32>} : memref<1x1x1xf32, #tpu.memory_space<vmem>>, vector<1x1x1xf32>,
    return
  }
  func.func @transform_0(%arg0: i32) -> (i32, i32, i32) {
    %c0_i32 = arith.constant 0 : i32
    %c0_i32_0 = arith.constant 0 : i32
    %c0_i32_1 = arith.constant 0 : i32
    return %arg0, %c0_i32, %c0_i32_0 : i32, i32, i32
  }
  func.func @transform_1(%arg0: i32) -> (i32, i32, i32) {
    %c0_i32 = arith.constant 0 : i32
    %c0_i32_0 = arith.constant 0 : i32
    %c0_i32_1 = arith.constant 0 : i32
    %c0_i32_2 = arith.constant 0 : i32
    return %c0_i32, %c0_i32_0, %c0_i32_1 : i32, i32, i32
  }
  func.func @transform_2(%arg0: i32) -> (i32, i32, i32) {
    %c0_i32 = arith.constant 0 : i32
    %c0_i32_0 = arith.constant 0 : i32
    %c0_i32_1 = arith.constant 0 : i32
    %c0_i32_2 = arith.constant 0 : i32
    return %c0_i32, %c0_i32_0, %c0_i32_1 : i32, i32, i32
  }
  func.func @transform_3(%arg0: i32) -> (i32, i32, i32) {
    %c0_i32 = arith.constant 0 : i32
    %c0_i32_0 = arith.constant 0 : i32
    %c0_i32_1 = arith.constant 0 : i32
    %c0_i32_2 = arith.constant 0 : i32
    return %c0_i32, %c0_i32_0, %c0_i32_1 : i32, i32, i32
  }
  func.func @transform_4(%arg0: i32) -> (i32, i32, i32) {
    %c0_i32 = arith.constant 0 : i32
    %c0_i32_0 = arith.constant 0 : i32
    %c0_i32_1 = arith.constant 0 : i32
    %c0_i32_2 = arith.constant 0 : i32
    return %c0_i32, %c0_i32_0, %c0_i32_1 : i32, i32, i32
  }
  func.func @transform_5(%arg0: i32) -> (i32, i32, i32) {
    %c0_i32 = arith.constant 0 : i32
    %c0_i32_0 = arith.constant 0 : i32
    %c0_i32_1 = arith.constant 0 : i32
    %c0_i32_2 = arith.constant 0 : i32
    return %c0_i32, %c0_i32_0, %c0_i32_1 : i32, i32, i32
  }
  func.func @transform_6(%arg0: i32) -> (i32, i32, i32) {
    %c0_i32 = arith.constant 0 : i32
    %c0_i32_0 = arith.constant 0 : i32
    %c0_i32_1 = arith.constant 0 : i32
    %c0_i32_2 = arith.constant 0 : i32
    return %c0_i32, %c0_i32_0, %c0_i32_1 : i32, i32, i32
  }
  func.func @transform_7(%arg0: i32) -> (i32, i32, i32) {
    %c0_i32 = arith.constant 0 : i32
    %c0_i32_0 = arith.constant 0 : i32
    %c0_i32_1 = arith.constant 0 : i32
    %c0_i32_2 = arith.constant 0 : i32
    return %c0_i32, %c0_i32_0, %c0_i32_1 : i32, i32, i32
  }
  func.func @transform_8(%arg0: i32) -> (i32, i32) {
    %c0_i32 = arith.constant 0 : i32
    %c0_i32_0 = arith.constant 0 : i32
    %c0_i32_1 = arith.constant 0 : i32
    return %c0_i32, %c0_i32_0 : i32, i32
  }
  func.func @transform_9(%arg0: i32) -> (i32, i32) {
    %c0_i32 = arith.constant 0 : i32
    %c0_i32_0 = arith.constant 0 : i32
    %c0_i32_1 = arith.constant 0 : i32
    return %c0_i32, %c0_i32_0 : i32, i32
  }
  func.func @transform_10(%arg0: i32) -> (i32, i32) {
    %c0_i32 = arith.constant 0 : i32
    %c0_i32_0 = arith.constant 0 : i32
    %c0_i32_1 = arith.constant 0 : i32
    return %c0_i32, %c0_i32_0 : i32, i32
  }
  func.func @transform_11(%arg0: i32) -> (i32, i32) {
    %c0_i32 = arith.constant 0 : i32
    %c0_i32_0 = arith.constant 0 : i32
    %c0_i32_1 = arith.constant 0 : i32
    return %c0_i32, %c0_i32_0 : i32, i32
  }
  func.func @transform_12(%arg0: i32) -> (i32, i32) {
    %c0_i32 = arith.constant 0 : i32
    %c0_i32_0 = arith.constant 0 : i32
    %c0_i32_1 = arith.constant 0 : i32
    return %c0_i32, %c0_i32_0 : i32, i32
  }
  func.func @transform_13(%arg0: i32) -> (i32, i32) {
    %c0_i32 = arith.constant 0 : i32
    %c0_i32_0 = arith.constant 0 : i32
    %c0_i32_1 = arith.constant 0 : i32
    return %c0_i32, %c0_i32_0 : i32, i32
  }
  func.func @transform_14(%arg0: i32) -> (i32, i32) {
    %c0_i32 = arith.constant 0 : i32
    %c0_i32_0 = arith.constant 0 : i32
    %c0_i32_1 = arith.constant 0 : i32
    return %c0_i32, %c0_i32_0 : i32, i32
  }
  func.func @transform_15(%arg0: i32) -> (i32, i32, i32) {
    %c0_i32 = arith.constant 0 : i32
    %c0_i32_0 = arith.constant 0 : i32
    %c0_i32_1 = arith.constant 0 : i32
    return %arg0, %c0_i32, %c0_i32_0 : i32, i32, i32
  }
}

</mosaic_0001>

<bundles_post_ra>
// kernel: tile.30
= control target key start
LH: loop header
LB: loop body
LE: loop exit
PB: predicated region body
PF: predicated region fallthrough
CT: control target
= control target key end

     0   :  { %s40_s0 = inlined_call_operand.vmem [shape: f32[8], index: 0, kind: input, shape index: {}]   ;;  %s41_s1 = inlined_call_operand.vmem [shape: f32[32,8], index: 1, kind: output, shape index: {}]  }
   0x1   :  { %v4_v0 = vld [vmem:[%s40_s0] ss:$0 sm:$0xff] }
   0x2   :  { %5 = vst [vmem:[%s41_s1] sm:$0xff] %v4_v0  ;;  %12 = vst [vmem:[%s41_s1 + $0x8] sm:$0xff] %v4_v0 }
   0x3   :  { %13 = vst [vmem:[%s41_s1 + $0x10] sm:$0xff] %v4_v0  ;;  %14 = vst [vmem:[%s41_s1 + $0x18] sm:$0xff] %v4_v0 }

// kernel: tile.31
= control target key start
LH: loop header
LB: loop body
LE: loop exit
PB: predicated region body
PF: predicated region fallthrough
CT: control target
= control target key end

     0   :  { %s7_s6 = smov 3  ;;  %s21_s9 = smov 3  ;;  %vm4_vm0 = vcmask 64512   ;;  %vm11_vm1 = vcmask 1048512   ;;  %vm18_vm2 = vcmask 982912   ;;  %vm25_vm3 = vcmask 917312   ;;  %s232_s0 = inlined_call_operand.vmem [shape: f32[32,8], index: 0, kind: input, shape index: {}]   ;;  %s233_s1 = inlined_call_operand.vmem [shape: f32[1,256], index: 1, kind: output, shape index: {}]  }
   0x1   :  { %v122_v0 = vld [vmem:[%s232_s0 + $0xf] ss:$16 sm:%s7_s6]   ;;  %s153_s10 = smov 120   ;;  %v124_v1 = vld [vmem:[%s232_s0 + $0xd] ss:$16 sm:%s21_s9]   ;;  %s14_s13 = smov 3 }
   0x2   :  { %9 = vrot.lane.b32.xlu0 %v122_v0, %s153_s10  ;;  %s154_s14 = smov 104   ;;  %v123_v2 = vld [vmem:[%s232_s0 + $0xe] ss:$16 sm:%s14_s13]   ;;  %s28_s17 = smov 3  ;;  %vm32_vm4 = vcmask 851712   ;;  %vm39_vm5 = vcmask 786112  }
   0x3   :  { %23 = vrot.lane.b32.xlu1 %v124_v1, %s154_s14  ;;  %v125_v3 = vld [vmem:[%s232_s0 + $0xc] ss:$16 sm:%s28_s17]   ;;  %s35_s20 = smov 3  ;;  %s42_s21 = smov 3  ;;  %vm46_vm6 = vcmask 720512   ;;  %vm53_vm7 = vcmask 654912  }
   0x4   :  { %s155_s22 = smov 112   ;;  %s156_s23 = smov 96   ;;  %v126_v4 = vld [vmem:[%s232_s0 + $0xb] ss:$16 sm:%s35_s20]   ;;  %v127_v5 = vld [vmem:[%s232_s0 + $0xa] ss:$16 sm:%s42_s21]  }
   0x5   :  { %s49_s28 = smov 3  ;;  %s56_s29 = smov 3  ;;  %vm60_vm8 = vcmask 589312   ;;  %vm67_vm9 = vcmask 523712   ;;  %vm74_vm10 = vcmask 458112   ;;  %vm81_vm11 = vcmask 392512  }
   0x6   :  { %16 = vrot.lane.b32.xlu0 %v123_v2, %s155_s22  ;;  %s157_s30 = smov 88   ;;  %s158_s2 = smov 80   ;;  %v128_v6 = vld [vmem:[%s232_s0 + $0x9] ss:$16 sm:%s49_s28]   ;;  %vm88_vm12 = vcmask 326912   ;;  %vm95_vm13 = vcmask 261312  }
   0x7   :  { %30 = vrot.lane.b32.xlu1 %v125_v3, %s156_s23  ;;  %v129_v7 = vld [vmem:[%s232_s0 + $0x8] ss:$16 sm:%s56_s29]   ;;  %s63_s7 = smov 3  ;;  %s70_s8 = smov 3  ;;  %vm102_vm14 = vcmask 195712   ;;  %vm109_vm15 = vcmask 130112  }
   0x8   :  { %s159_s9 = smov 72   ;;  %s160_s10 = smov 64   ;;  %v130_v8 = vld [vmem:[%s232_s0 + $0x7] ss:$16 sm:%s63_s7]   ;;  %v131_v9 = vld [vmem:[%s232_s0 + $0x6] ss:$16 sm:%s70_s8]  }
   0x9   :  { %s2_s13 = smov 3  ;;  %s77_s16 = smov 3 }
   0xa   :  { %37 = vrot.lane.b32.xlu0 %v126_v4, %s157_s30  ;;  %v3_v10 = vld [vmem:[%s232_s0] ss:$16 sm:%s2_s13]   ;;  %s84_s19 = smov 3  ;;  %s161_s20 = smov 56  }
   0xb   :  { %44 = vrot.lane.b32.xlu1 %v127_v5, %s158_s2  ;;  %5 = vst.msk [vmem:[#allocation0] ss:$8 sm:$0x3] %vm4_vm0, %v3_v10   ;;  %s162_s21 = smov 48   ;;  %v132_v11 = vld [vmem:[%s232_s0 + $0x5] ss:$16 sm:%s77_s16]  }
   0xc   :  { %v133_v12 = vld [vmem:[%s232_s0 + $0x4] ss:$16 sm:%s84_s19]   ;;  %s91_s26 = smov 3  ;;  %s98_s27 = smov 3 }
   0xd   :  { %s163_s28 = smov 40   ;;  %s164_s29 = smov 32   ;;  %v134_v13 = vld [vmem:[%s232_s0 + $0x3] ss:$16 sm:%s91_s26]   ;;  %v135_v14 = vld [vmem:[%s232_s0 + $0x2] ss:$16 sm:%s98_s27]  }
   0xe   :  { %51 = vrot.lane.b32.xlu0 %v128_v6, %s159_s9  ;;  %s105_s5 = smov 3  ;;  %s165_s6 = smov 24  }
   0xf   :  { %58 = vrot.lane.b32.xlu1 %v129_v7, %s160_s10  ;;  %s166_s7 = smov 16   ;;  %v136_v15 = vld [vmem:[%s232_s0 + $0x1] ss:$16 sm:%s105_s5]   ;;  %s167_s0 = smov 8  }
  0x12   :  { %65 = vrot.lane.b32.xlu0 %v130_v8, %s161_s20 }
  0x13   :  { %72 = vrot.lane.b32.xlu1 %v131_v9, %s162_s21 }
  0x16   :  { %79 = vrot.lane.b32.xlu0 %v132_v11, %s163_s28 }
  0x17   :  { %86 = vrot.lane.b32.xlu1 %v133_v12, %s164_s29 }
  0x1a   :  { %93 = vrot.lane.b32.xlu0 %v134_v13, %s165_s6 }
  0x1b   :  { %100 = vrot.lane.b32.xlu1 %v135_v14, %s166_s7 }
  0x1e   :  { %107 = vrot.lane.b32.xlu0 %v136_v15, %s167_s0 }
  0x74   :  { %v10_v16 = vpop.permute.xlu0 %9  }
  0x75   :  { %12 = vst.msk [vmem:[#allocation0] ss:$8 sm:$0x3] %vm11_vm1, %v10_v16   ;;  %v24_v17 = vpop.permute.xlu1 %23  }
  0x78   :  { %v17_v18 = vpop.permute.xlu0 %16  }
  0x79   :  { %19 = vst.msk [vmem:[#allocation0] ss:$8 sm:$0x3] %vm18_vm2, %v17_v18   ;;  %v31_v19 = vpop.permute.xlu1 %30  }
  0x7a   :  { %26 = vst.msk [vmem:[#allocation0] ss:$8 sm:$0x3] %vm25_vm3, %v24_v17  }
  0x7b   :  { %33 = vst.msk [vmem:[#allocation0] ss:$8 sm:$0x3] %vm32_vm4, %v31_v19  }
  0x7c   :  { %v38_v20 = vpop.permute.xlu0 %37  }
  0x7d   :  { %40 = vst.msk [vmem:[#allocation0] ss:$8 sm:$0x3] %vm39_vm5, %v38_v20   ;;  %v45_v21 = vpop.permute.xlu1 %44  }
  0x7e   :  { %47 = vst.msk [vmem:[#allocation0] ss:$8 sm:$0x3] %vm46_vm6, %v45_v21  }
  0x80   :  { %v52_v22 = vpop.permute.xlu0 %51  }
  0x81   :  { %54 = vst.msk [vmem:[#allocation0] ss:$8 sm:$0x3] %vm53_vm7, %v52_v22   ;;  %v59_v23 = vpop.permute.xlu1 %58  }
  0x82   :  { %61 = vst.msk [vmem:[#allocation0] ss:$8 sm:$0x3] %vm60_vm8, %v59_v23  }
  0x84   :  { %v66_v24 = vpop.permute.xlu0 %65  }
  0x85   :  { %68 = vst.msk [vmem:[#allocation0] ss:$8 sm:$0x3] %vm67_vm9, %v66_v24   ;;  %v73_v25 = vpop.permute.xlu1 %72  }
  0x86   :  { %75 = vst.msk [vmem:[#allocation0] ss:$8 sm:$0x3] %vm74_vm10, %v73_v25  }
  0x88   :  { %v80_v26 = vpop.permute.xlu0 %79  }
  0x89   :  { %82 = vst.msk [vmem:[#allocation0] ss:$8 sm:$0x3] %vm81_vm11, %v80_v26   ;;  %v87_v27 = vpop.permute.xlu1 %86  }
  0x8a   :  { %89 = vst.msk [vmem:[#allocation0] ss:$8 sm:$0x3] %vm88_vm12, %v87_v27  }
  0x8c   :  { %v94_v28 = vpop.permute.xlu0 %93  }
  0x8d   :  { %96 = vst.msk [vmem:[#allocation0] ss:$8 sm:$0x3] %vm95_vm13, %v94_v28   ;;  %v101_v29 = vpop.permute.xlu1 %100  }
  0x8e   :  { %103 = vst.msk [vmem:[#allocation0] ss:$8 sm:$0x3] %vm102_vm14, %v101_v29  }
  0x90   :  { %v108_v30 = vpop.permute.xlu0 %107  }
  0x91   :  { %110 = vst.msk [vmem:[#allocation0] ss:$8 sm:$0x3] %vm109_vm15, %v108_v30  }
  0x98   :  { %v114_v31 = vld [vmem:[#allocation0] sm:$0x1]  ;;  %v118_v32 = vld [vmem:[#allocation0 + $0x8] sm:$0x1] }
  0x99   :  { %116 = vst [vmem:[%s233_s1] sm:$0x1] %v114_v31  ;;  %137 = vst [vmem:[%s233_s1 + $0x1] sm:$0x1] %v118_v32 }

// kernel: tile.35
= control target key start
LH: loop header
LB: loop body
LE: loop exit
PB: predicated region body
PF: predicated region fallthrough
CT: control target
= control target key end

     0   :  { %s28_s0 = inlined_call_operand.vmem [shape: f32[16], index: 0, kind: input, shape index: {}]   ;;  %s29_s1 = inlined_call_operand.vmem [shape: f32[16,16], index: 1, kind: output, shape index: {}]  }
   0x1   :  { %v4_v0 = vld [vmem:[%s28_s0] ss:$0 sm:$0xff] }
   0x2   :  { %5 = vst [vmem:[%s29_s1] sm:$0xff] %v4_v0  ;;  %8 = vst [vmem:[%s29_s1 + $0x8] sm:$0xff] %v4_v0 }

// kernel: tile.36
= control target key start
LH: loop header
LB: loop body
LE: loop exit
PB: predicated region body
PF: predicated region fallthrough
CT: control target
= control target key end

     0   :  { %s7_s6 = smov 3  ;;  %s21_s9 = smov 3  ;;  %vm4_vm0 = vcmask 130048   ;;  %vm11_vm1 = vcmask 1048448   ;;  %vm18_vm2 = vcmask 917248   ;;  %vm25_vm3 = vcmask 786048   ;;  %s128_s0 = inlined_call_operand.vmem [shape: f32[16,16], index: 0, kind: input, shape index: {}]   ;;  %s129_s1 = inlined_call_operand.vmem [shape: f32[1,256], index: 1, kind: output, shape index: {}]  }
   0x1   :  { %v66_v0 = vld [vmem:[%s128_s0 + $0x7] ss:$8 sm:%s7_s6]   ;;  %s81_s10 = smov 112   ;;  %v68_v1 = vld [vmem:[%s128_s0 + $0x5] ss:$8 sm:%s21_s9]   ;;  %s14_s13 = smov 3 }
   0x2   :  { %9 = vrot.lane.b32.xlu0 %v66_v0, %s81_s10  ;;  %s82_s14 = smov 80   ;;  %v67_v2 = vld [vmem:[%s128_s0 + $0x6] ss:$8 sm:%s14_s13]   ;;  %s28_s17 = smov 3  ;;  %vm32_vm4 = vcmask 654848   ;;  %vm39_vm5 = vcmask 523648  }
   0x3   :  { %23 = vrot.lane.b32.xlu1 %v68_v1, %s82_s14  ;;  %v69_v3 = vld [vmem:[%s128_s0 + $0x4] ss:$8 sm:%s28_s17]   ;;  %s35_s20 = smov 3  ;;  %s42_s21 = smov 3  ;;  %vm46_vm6 = vcmask 392448   ;;  %vm53_vm7 = vcmask 261248  }
   0x4   :  { %s83_s22 = smov 96   ;;  %s84_s23 = smov 64   ;;  %v70_v4 = vld [vmem:[%s128_s0 + $0x3] ss:$8 sm:%s35_s20]   ;;  %v71_v5 = vld [vmem:[%s128_s0 + $0x2] ss:$8 sm:%s42_s21]  }
   0x5   :  { %s2_s26 = smov 3  ;;  %s49_s29 = smov 3 }
   0x6   :  { %16 = vrot.lane.b32.xlu0 %v67_v2, %s83_s22  ;;  %v3_v6 = vld [vmem:[%s128_s0] ss:$8 sm:%s2_s26]   ;;  %s85_s3 = smov 48   ;;  %s86_s4 = smov 32  }
   0x7   :  { %30 = vrot.lane.b32.xlu1 %v69_v3, %s84_s23  ;;  %5 = vst.msk [vmem:[#allocation0] ss:$8 sm:$0x3] %vm4_vm0, %v3_v6   ;;  %v72_v7 = vld [vmem:[%s128_s0 + $0x1] ss:$8 sm:%s49_s29]   ;;  %s87_s0 = smov 16  }
   0xa   :  { %37 = vrot.lane.b32.xlu0 %v70_v4, %s85_s3 }
   0xb   :  { %44 = vrot.lane.b32.xlu1 %v71_v5, %s86_s4 }
   0xe   :  { %51 = vrot.lane.b32.xlu0 %v72_v7, %s87_s0 }
  0x74   :  { %v10_v8 = vpop.permute.xlu0 %9  }
  0x75   :  { %12 = vst.msk [vmem:[#allocation0] ss:$8 sm:$0x3] %vm11_vm1, %v10_v8   ;;  %v24_v9 = vpop.permute.xlu1 %23  }
  0x78   :  { %v17_v10 = vpop.permute.xlu0 %16  }
  0x79   :  { %19 = vst.msk [vmem:[#allocation0] ss:$8 sm:$0x3] %vm18_vm2, %v17_v10   ;;  %v31_v11 = vpop.permute.xlu1 %30  }
  0x7a   :  { %26 = vst.msk [vmem:[#allocation0] ss:$8 sm:$0x3] %vm25_vm3, %v24_v9  }
  0x7b   :  { %33 = vst.msk [vmem:[#allocation0] ss:$8 sm:$0x3] %vm32_vm4, %v31_v11  }
  0x7c   :  { %v38_v12 = vpop.permute.xlu0 %37  }
  0x7d   :  { %40 = vst.msk [vmem:[#allocation0] ss:$8 sm:$0x3] %vm39_vm5, %v38_v12   ;;  %v45_v13 = vpop.permute.xlu1 %44  }
  0x7e   :  { %47 = vst.msk [vmem:[#allocation0] ss:$8 sm:$0x3] %vm46_vm6, %v45_v13  }
  0x80   :  { %v52_v14 = vpop.permute.xlu0 %51  }
  0x81   :  { %54 = vst.msk [vmem:[#allocation0] ss:$8 sm:$0x3] %vm53_vm7, %v52_v14  }
  0x88   :  { %v58_v15 = vld [vmem:[#allocation0] sm:$0x1]  ;;  %v62_v16 = vld [vmem:[#allocation0 + $0x8] sm:$0x1] }
  0x89   :  { %60 = vst [vmem:[%s129_s1] sm:$0x1] %v58_v15  ;;  %73 = vst [vmem:[%s129_s1 + $0x1] sm:$0x1] %v62_v16 }

// kernel: tile.40
= control target key start
LH: loop header
LB: loop body
LE: loop exit
PB: predicated region body
PF: predicated region fallthrough
CT: control target
= control target key end

     0   :  { %s22_s0 = inlined_call_operand.vmem [shape: f32[32], index: 0, kind: input, shape index: {}]   ;;  %s23_s1 = inlined_call_operand.vmem [shape: f32[8,32], index: 1, kind: output, shape index: {}]  }
   0x1   :  { %v4_v0 = vld [vmem:[%s22_s0] ss:$0 sm:$0xff] }
   0x2   :  { %5 = vst [vmem:[%s23_s1] sm:$0xff] %v4_v0 }

// kernel: tile.41
= control target key start
LH: loop header
LB: loop body
LE: loop exit
PB: predicated region body
PF: predicated region fallthrough
CT: control target
= control target key end

     0   :  { %s7_s6 = smov 3  ;;  %s14_s9 = smov 3  ;;  %vm4_vm0 = vcmask 261120   ;;  %vm11_vm1 = vcmask 1048320   ;;  %vm18_vm2 = vcmask 785920   ;;  %vm25_vm3 = vcmask 523520   ;;  %s76_s0 = inlined_call_operand.vmem [shape: f32[8,32], index: 0, kind: input, shape index: {}]   ;;  %s77_s1 = inlined_call_operand.vmem [shape: f32[1,256], index: 1, kind: output, shape index: {}]  }
   0x1   :  { %v38_v0 = vld [vmem:[%s76_s0 + $0x3] ss:$4 sm:%s7_s6]   ;;  %s45_s10 = smov 96   ;;  %s21_s11 = smov 3  ;;  %v39_v1 = vld [vmem:[%s76_s0 + $0x2] ss:$4 sm:%s14_s9]  }
   0x2   :  { %9 = vrot.lane.b32.xlu0 %v38_v0, %s45_s10  ;;  %v40_v2 = vld [vmem:[%s76_s0 + $0x1] ss:$4 sm:%s21_s11]   ;;  %s2_s16 = smov 3  ;;  %s46_s17 = smov 32  }
   0x3   :  { %23 = vrot.lane.b32.xlu1 %v40_v2, %s46_s17  ;;  %v3_v3 = vld [vmem:[%s76_s0] ss:$4 sm:%s2_s16]   ;;  %s47_s0 = smov 64  }
   0x4   :  { %5 = vst.msk [vmem:[#allocation0] ss:$8 sm:$0x3] %vm4_vm0, %v3_v3  }
   0x6   :  { %16 = vrot.lane.b32.xlu0 %v39_v1, %s47_s0 }
  0x74   :  { %v10_v4 = vpop.permute.xlu0 %9  }
  0x75   :  { %12 = vst.msk [vmem:[#allocation0] ss:$8 sm:$0x3] %vm11_vm1, %v10_v4   ;;  %v24_v5 = vpop.permute.xlu1 %23  }
  0x78   :  { %v17_v6 = vpop.permute.xlu0 %16  }
  0x79   :  { %19 = vst.msk [vmem:[#allocation0] ss:$8 sm:$0x3] %vm18_vm2, %v17_v6  }
  0x7a   :  { %26 = vst.msk [vmem:[#allocation0] ss:$8 sm:$0x3] %vm25_vm3, %v24_v5  }
  0x81   :  { %v30_v7 = vld [vmem:[#allocation0] sm:$0x1]  ;;  %v34_v8 = vld [vmem:[#allocation0 + $0x8] sm:$0x1] }
  0x82   :  { %32 = vst [vmem:[%s77_s1] sm:$0x1] %v30_v7  ;;  %41 = vst [vmem:[%s77_s1 + $0x1] sm:$0x1] %v34_v8 }

// kernel: tile.45
= control target key start
LH: loop header
LB: loop body
LE: loop exit
PB: predicated region body
PF: predicated region fallthrough
CT: control target
= control target key end

     0   :  { %s22_s0 = inlined_call_operand.vmem [shape: f32[64], index: 0, kind: input, shape index: {}]   ;;  %s23_s1 = inlined_call_operand.vmem [shape: f32[4,64], index: 1, kind: output, shape index: {}]  }
   0x1   :  { %v4_v0 = vld [vmem:[%s22_s0] ss:$0 sm:$0xff] }
   0x2   :  { %5 = vst [vmem:[%s23_s1] sm:$0xf] %v4_v0 }

// kernel: tile.46
= control target key start
LH: loop header
LB: loop body
LE: loop exit
PB: predicated region body
PF: predicated region fallthrough
CT: control target
= control target key end

     0   :  { %s6_s8 = smov 3  ;;  %vm8_vm0 = vcmask 523264   ;;  %s30_s9 = smov 64   ;;  %vm15_vm1 = vcmask 1048064   ;;  %s50_s0 = inlined_call_operand.vmem [shape: f32[4,64], index: 0, kind: input, shape index: {}]   ;;  %s51_s1 = inlined_call_operand.vmem [shape: f32[1,256], index: 1, kind: output, shape index: {}]  }
   0x1   :  { %v4_v0 = vld [vmem:[%s50_s0] sm:$0xf]  ;;  %s11_s0 = smov 3 }
   0x2   :  { %5 = vst [vmem:[#allocation1] sm:$0xf] %v4_v0 }
   0x9   :  { %v12_v1 = vld [vmem:[#allocation1 + $0x1] ss:$2 sm:%s11_s0]   ;;  %v7_v2 = vld [vmem:[#allocation1] ss:$2 sm:%s6_s8]  }
   0xa   :  { %13 = vrot.lane.b32.xlu0 %v12_v1, %s30_s9  ;;  %9 = vst.msk [vmem:[#allocation0] ss:$8 sm:$0x3] %vm8_vm0, %v7_v2  }
  0x7c   :  { %v14_v3 = vpop.permute.xlu0 %13  }
  0x7d   :  { %16 = vst.msk [vmem:[#allocation0] ss:$8 sm:$0x3] %vm15_vm1, %v14_v3  }
  0x84   :  { %v20_v4 = vld [vmem:[#allocation0] sm:$0x1]  ;;  %v24_v5 = vld [vmem:[#allocation0 + $0x8] sm:$0x1] }
  0x85   :  { %22 = vst [vmem:[%s51_s1] sm:$0x1] %v20_v4  ;;  %28 = vst [vmem:[%s51_s1 + $0x1] sm:$0x1] %v24_v5 }

// kernel: tile.50
= control target key start
LH: loop header
LB: loop body
LE: loop exit
PB: predicated region body
PF: predicated region fallthrough
CT: control target
= control target key end

     0   :  { %s22_s0 = inlined_call_operand.vmem [shape: f32[64], index: 0, kind: input, shape index: {}]   ;;  %s23_s1 = inlined_call_operand.vmem [shape: f32[2,64], index: 1, kind: output, shape index: {}]  }
   0x1   :  { %v4_v0 = vld [vmem:[%s22_s0] ss:$0 sm:$0xff] }
   0x2   :  { %5 = vst [vmem:[%s23_s1] sm:$0x3] %v4_v0 }

// kernel: tile.51
= control target key start
LH: loop header
LB: loop body
LE: loop exit
PB: predicated region body
PF: predicated region fallthrough
CT: control target
= control target key end

     0   :  { %vm7_vm0 = vcmask 523264   ;;  %vm13_vm1 = vcmask 1048064   ;;  %s39_s0 = inlined_call_operand.vmem [shape: f32[2,64], index: 0, kind: input, shape index: {}]   ;;  %s40_s1 = inlined_call_operand.vmem [shape: f32[1,128], index: 1, kind: output, shape index: {}]  }
   0x1   :  { %v4_v0 = vld [vmem:[%s39_s0] sm:$0x3]  ;;  %s22_s0 = smov 64  }
   0x2   :  { %5 = vst [vmem:[#allocation1] sm:$0x3] %v4_v0 }
   0x9   :  { %v10_v1 = vld [vmem:[#allocation1 + $0x1] sm:$0x1]   ;;  %v6_v2 = vld [vmem:[#allocation1] sm:$0x1]  }
   0xa   :  { %11 = vrot.lane.b32.xlu0 %v10_v1, %s22_s0  ;;  %8 = vst.msk [vmem:[#allocation0] sm:$0x1] %vm7_vm0, %v6_v2  }
  0x7c   :  { %v12_v3 = vpop.permute.xlu0 %11  }
  0x7d   :  { %14 = vst.msk [vmem:[#allocation0] sm:$0x1] %vm13_vm1, %v12_v3  }
  0x84   :  { %v18_v4 = vld [vmem:[#allocation0] sm:$0x1] }
  0x85   :  { %20 = vst [vmem:[%s40_s1] sm:$0x1] %v18_v4 }

// kernel: discriminator_forward.1
= control target key start
LH: loop header
LB: loop body
LE: loop exit
PB: predicated region body
PF: predicated region fallthrough
CT: control target
= control target key end

     0   :  { %s8206_s20 = smov 0   ;;  %s10105_s0 = inlined_call_operand.vmem [shape: f32[2,64,64], index: 0, kind: input, shape index: {}]   ;;  %s10106_s1 = inlined_call_operand.vmem [shape: bf16[4,64,256], index: 1, kind: input, shape index: {}]   ;;  %s10107_s2 = inlined_call_operand.vmem [shape: bf16[4,256,256], index: 2, kind: input, shape index: {}]   ;;  %s10108_s3 = inlined_call_operand.vmem [shape: bf16[4,256,256], index: 3, kind: input, shape index: {}]   ;;  %s10109_s4 = inlined_call_operand.vmem [shape: bf16[4,256,256], index: 4, kind: input, shape index: {}]   ;;  %s10110_s5 = inlined_call_operand.vmem [shape: bf16[4,256,128], index: 5, kind: input, shape index: {}]   ;;  %s10111_s6 = inlined_call_operand.vmem [shape: bf16[4,128,64], index: 6, kind: input, shape index: {}]   ;;  %s10112_s7 = inlined_call_operand.vmem [shape: bf16[3,64,1], index: 7, kind: input, shape index: {}]   ;;  %s10113_s8 = inlined_call_operand.vmem [shape: f32[1,256], index: 8, kind: input, shape index: {}]   ;;  %s10114_s9 = inlined_call_operand.vmem [shape: f32[1,256], index: 9, kind: input, shape index: {}]   ;;  %s10115_s10 = inlined_call_operand.vmem [shape: f32[1,256], index: 10, kind: input, shape index: {}]   ;;  %s10116_s11 = inlined_call_operand.vmem [shape: f32[1,256], index: 11, kind: input, shape index: {}]   ;;  %s10117_s12 = inlined_call_operand.vmem [shape: f32[1,128], index: 12, kind: input, shape index: {}]   ;;  %s10118_s13 = inlined_call_operand.vmem [shape: f32[1,64], index: 13, kind: input, shape index: {}]   ;;  %s10119_s14 = inlined_call_operand.<no memory space> [shape: f32[1,1], index: 14, kind: input, shape index: {}]   ;;  %s10120_s15 = inlined_call_operand.vmem [shape: f32[2,1,1], index: 15, kind: output, shape index: {}]  }
   0x1   :  { %v20_v0 = vstv %s10119_s14 }
   0x2   :  { %21 = vst [vmem:[#allocation2] sm:$0x1] %v20_v0 }
   0x3 LB: > { %s6088_s21 = sadd.s32 4294967295, %s8118_s20   ;;  %p6092_p0 = scmp.ge.s32.totalorder %s8118_s20, 1  ;;  %s8118_s20 = sphi %s8206_s20, %s27_s20  }
   0x4   : > { %p439_p1 = scmp.lt.s32.totalorder %s8118_s20, 3 }
   0x6   : > { %p440_p2 = pnand %p6092_p0, %p439_p1 }
   0x7   : > { %p485_p3 = scmp.lt.s32.totalorder (!%p440_p2), %s6088_s21, 1  ;;  %v506_v1 = vlaneseq (!%p440_p2)  ;;  %v8120_v14 = vmov (!%p440_p2), 0.0   ;;  %vm535_vm1 = vcmask (!%p440_p2), 523264   ;;  %v7406_v37 = vld [vmem:[%s10106_s1 + $0x44] ss:$8 sps:$4 sm:$0xff] (!%p440_p2)  }
   0x8   : > { %443 = sbr.rel (%p440_p2) target bundleno = 4154 (0x103a), region = 80  ;;  %v7404_v45 = vld [vmem:[%s10106_s1 + $0x40] ss:$8 sps:$4 sm:$0xff] (!%p440_p2)   ;;  %v7409_v47 = vld [vmem:[%s10106_s1 + $0x54] ss:$8 sps:$4 sm:$0xff] (!%p440_p2)  }
   0x9   : > { %v8216_v2 = vshrl.u32 (!%p440_p2), %v506_v1, 7  ;;  %v8218_v3 = vand.u32 (!%p440_p2), 127, %v506_v1  ;;  %v7407_v48 = vld [vmem:[%s10106_s1 + $0x50] ss:$8 sps:$4 sm:$0xff] (!%p440_p2)   ;;  %v7412_v49 = vld [vmem:[%s10106_s1 + $0x64] ss:$8 sps:$4 sm:$0xff] (!%p440_p2)  }
   0xa   : > { %v7410_v54 = vld [vmem:[%s10106_s1 + $0x60] ss:$8 sps:$4 sm:$0xff] (!%p440_p2)  }
   0xb   : > { %v508_v4 = vadd.s32 (!%p440_p2), 8, %v8216_v2  ;;  %v8223_v5 = vmul.u32 (!%p440_p2), 2, %v8216_v2  ;;  %v509_v6 = vadd.s32 (!%p440_p2), 16, %v8216_v2  ;;  %v510_v7 = vadd.s32 (!%p440_p2), 24, %v8216_v2 }
   0xd   : > { %v8230_v11 = vmul.u32 (!%p440_p2), 2, %v508_v4  ;;  %vm601_vm0 = vcmp.eq.s32.totalorder (!%p440_p2), %v8218_v3, %v8223_v5  ;;  %v517_v16 = vadd.s32 (!%p440_p2), 4294967295, %v8223_v5  ;;  %v8247_v23 = vmul.u32 (!%p440_p2), 2, %v509_v6  ;;  %v7415_v4 = vld [vmem:[%s10106_s1 + $0x74] ss:$8 sps:$4 sm:$0xff] (!%p440_p2)  }
   0xe   : > { %v8237_v15 = vsel (!%p440_p2), %vm601_vm0, 1.0, %v8120_v14  ;;  %v8249_v24 = vmul.u32 (!%p440_p2), 2, %v510_v7  ;;  %v879_v31 = vadd.s32 (!%p440_p2), 1, %v8223_v5  ;;  %v1070_v52 = vadd.s32 (!%p440_p2), 2, %v8223_v5  ;;  %v7418_v5 = vld [vmem:[%s10106_s1 + $0x4] ss:$8 sps:$4 sm:$0xff] (!%p440_p2)  }
   0xf   : > { %s10122_s21 = smov (!%p485_p3, %s6088_s21), 1  ;;  %vm602_vm2 = vcmp.eq.s32.totalorder %v8218_v3, %v8230_v11  ;;  %v518_v26 = vadd.s32 4294967295, %v8230_v11  ;;  %vm521_vm3 = vcmp.eq.s32.totalorder %v8218_v3, %v517_v16  ;;  %v519_v28 = vadd.s32 4294967295, %v8247_v23 }
  0x10   : > { %s7105_s14 = sshll.u32 %s10122_s21, 6  ;;  %v6102_v22 = vsel %vm602_vm2, 1.0, %v8120_v14  ;;  %v520_v29 = vadd.s32 4294967295, %v8249_v24  ;;  %v8268_v30 = vsel %vm521_vm3, 1.0, %v8120_v14  ;;  %v880_v32 = vadd.s32 1, %v8230_v11  ;;  %s492_s16 = scalar_lea.vmem %s10120_s15, %s10122_s21 }
  0x11   : > { %s489_s24 = scalar_lea.vmem %s10105_s0, %s7105_s14  ;;  %v8254_v25 = vpack.c.bf16 %v6102_v22, %v8237_v15  ;;  %vm522_vm4 = vcmp.eq.s32.totalorder %v8218_v3, %v518_v26  ;;  %vm603_vm5 = vcmp.eq.s32.totalorder %v8218_v3, %v8247_v23  ;;  %vm604_vm6 = vcmp.eq.s32.totalorder %v8218_v3, %v8249_v24  ;;  %v7422_v26 = vld [vmem:[%s10106_s1 + $0x20] ss:$8 sps:$4 sm:$0xff]  }
  0x12   : > { %v494_v8 = vld [vmem:[%s489_s24] sm:$0xff]  ;;  %v495_v9 = vld [vmem:[%s489_s24 + $0x8] sm:$0xff]  ;;  %v496_v10 = vld [vmem:[%s489_s24 + $0x10] sm:$0xff]  ;;  %v6096_v33 = vsel %vm522_vm4, 1.0, %v8120_v14  ;;  %vm523_vm7 = vcmp.eq.s32.totalorder %v8218_v3, %v519_v28  ;;  %vm524_vm8 = vcmp.eq.s32.totalorder %v8218_v3, %v520_v29  ;;  %vm883_vm9 = vcmp.eq.s32.totalorder %v8218_v3, %v879_v31 }
  0x13   : > { %v8234_v12 = vpack.c.bf16 %v495_v9, %v494_v8  ;;  %v497_v13 = vld [vmem:[%s489_s24 + $0x18] sm:$0xff]  ;;  %v498_v18 = vld [vmem:[%s489_s24 + $0x20] sm:$0xff]  ;;  %v499_v19 = vld [vmem:[%s489_s24 + $0x28] sm:$0xff]  ;;  %7265 = vmatprep.mubr.msk.bf16.mxu1 %vm535_vm1, %v8254_v25  ;;  %v8280_v35 = vpack.c.bf16 %v6096_v33, %v8268_v30  ;;  %vm884_vm10 = vcmp.eq.s32.totalorder %v8218_v3, %v880_v32  ;;  %v6103_v36 = vsel %vm603_vm5, 1.0, %v8120_v14 }
  0x14   : > { %v8240_v17 = vpack.c.bf16 %v497_v13, %v496_v10  ;;  %v500_v20 = vld [vmem:[%s489_s24 + $0x30] sm:$0xff]  ;;  %v501_v21 = vld [vmem:[%s489_s24 + $0x38] sm:$0xff]  ;;  %v8258_v27 = vpack.c.bf16 %v499_v19, %v498_v18  ;;  %v6104_v38 = vsel %vm604_vm6, 1.0, %v8120_v14  ;;  %v6097_v39 = vsel %vm523_vm7, 1.0, %v8120_v14  ;;  %v7430_v29 = vld [vmem:[%s10106_s1 + $0x84] ss:$8 sps:$4 sm:$0xff]  }
  0x15   : > { %7257 = vmatprep.subr.bf16.mxu1 %v8234_v12  ;;  %7245 = vmatprep.subr.bf16.mxu0 %v8234_v12  ;;  %v8274_v34 = vpack.c.bf16 %v501_v21, %v500_v20  ;;  %v6098_v40 = vsel %vm524_vm8, 1.0, %v8120_v14  ;;  %v8304_v41 = vsel %vm883_vm9, 1.0, %v8120_v14  ;;  %v6136_v42 = vsel %vm884_vm10, 1.0, %v8120_v14  ;;  %v7421_v21 = vld [vmem:[%s10106_s1 + $0x14] ss:$8 sps:$4 sm:$0xff]  }
  0x16   : > { %7258 = vmatpush3.bf16.msra.mxu1 %v8234_v12  ;;  %7246 = vmatpush3.bf16.msra.mxu0 %v8234_v12  ;;  %v614_v43 = vpack.c.bf16 %v6104_v38, %v6103_v36  ;;  %v534_v44 = vpack.c.bf16 %v6098_v40, %v6097_v39  ;;  %v8313_v46 = vpack.c.bf16 %v6136_v42, %v8304_v41  ;;  %v881_v50 = vadd.s32 1, %v8247_v23  ;;  %v7425_v28 = vld [vmem:[%s10106_s1 + $0x30] ss:$8 sps:$4 sm:$0xff]   ;;  %v7433_v38 = vld [vmem:[%s10106_s1 + $0x94] ss:$8 sps:$4 sm:$0xff]  }
  0x17   : > { %7259 = vmatprep.subr.bf16.mxu1 %v8240_v17  ;;  %7247 = vmatprep.subr.bf16.mxu0 %v8240_v17  ;;  %v882_v51 = vadd.s32 1, %v8249_v24  ;;  %v1071_v53 = vadd.s32 2, %v8230_v11  ;;  %vm1074_vm13 = vcmp.eq.s32.totalorder %v8218_v3, %v1070_v52  ;;  %v1072_v61 = vadd.s32 2, %v8247_v23  ;;  %v7419_v23 = vld [vmem:[%s10106_s1 + $0x10] ss:$8 sps:$4 sm:$0xff]  }
  0x18   : > { %7253 = vmatprep.mubr.msk.bf16.mxu0 %vm535_vm1, %v8280_v35  ;;  %vm885_vm11 = vcmp.eq.s32.totalorder %v8218_v3, %v881_v50  ;;  %v8349_v57 = vsel %vm1074_vm13, 1.0, %v8120_v14  ;;  %v1073_v62 = vadd.s32 2, %v8249_v24  ;;  %v8121_v6 = vmov 0   ;;  %v7424_v24 = vld [vmem:[%s10106_s1 + $0x24] ss:$8 sps:$4 sm:$0xff]  }
  0x19   : > { %vm886_vm12 = vcmp.eq.s32.totalorder %v8218_v3, %v882_v51  ;;  %vm1075_vm14 = vcmp.eq.s32.totalorder %v8218_v3, %v1071_v53  ;;  %v6137_v55 = vsel %vm885_vm11, 1.0, %v8120_v14  ;;  %vm1076_vm15 = vcmp.eq.s32.totalorder %v8218_v3, %v1072_v61  ;;  %v7431_v40 = vld [vmem:[%s10106_s1 + $0x90] ss:$8 sps:$4 sm:$0xff]   ;;  %v7436_v42 = vld [vmem:[%s10106_s1 + $0xa4] ss:$8 sps:$4 sm:$0xff]  }
  0x1a   : > { %7260 = vmatpush3.bf16.msra.mxu1 %v8240_v17  ;;  %7248 = vmatpush3.bf16.msra.mxu0 %v8240_v17  ;;  %v6138_v56 = vsel %vm886_vm12, 1.0, %v8120_v14  ;;  %v6160_v58 = vsel %vm1075_vm14, 1.0, %v8120_v14  ;;  %vm1077_vm0 = vcmp.eq.s32.totalorder %v8218_v3, %v1073_v62  ;;  %v6161_v63 = vsel %vm1076_vm15, 1.0, %v8120_v14  ;;  %v7413_v3 = vld [vmem:[%s10106_s1 + $0x70] ss:$8 sps:$4 sm:$0xff]  }
  0x1b   : > { %7261 = vmatprep.subr.bf16.mxu1 %v8258_v27  ;;  %7249 = vmatprep.subr.bf16.mxu0 %v8258_v27  ;;  %v896_v59 = vpack.c.bf16 %v6138_v56, %v6137_v55  ;;  %v8354_v60 = vpack.c.bf16 %v6160_v58, %v8349_v57  ;;  %v6162_v0 = vsel %vm1077_vm0, 1.0, %v8120_v14  ;;  %v7440_v51 = vld [vmem:[%s10106_s1 + $0xc0] ss:$8 sps:$4 sm:$0xff]   ;;  %v7443_v56 = vld [vmem:[%s10106_s1 + $0xd0] ss:$8 sps:$4 sm:$0xff]   ;;  %vm1309_vm10 = vcmask 261120  }
  0x1c   : > { %v1087_v1 = vpack.c.bf16 %v6162_v0, %v6161_v63  ;;  %v7448_v58 = vld [vmem:[%s10106_s1 + $0xe4] ss:$8 sps:$4 sm:$0xff]   ;;  %v7451_v61 = vld [vmem:[%s10106_s1 + $0xf4] ss:$8 sps:$4 sm:$0xff]   ;;  %v7449_v62 = vld [vmem:[%s10106_s1 + $0xf0] ss:$8 sps:$4 sm:$0xff]  }
  0x1d   : > { %v8471_v63 = vsub.s32 0, %v8216_v2  ;;  %v1261_v0 = vld [vmem:[%s10113_s8] sm:$0x3]  ;;  %vm2480_vm15 = vcmask 130048  }
  0x1e   : > { %7262 = vmatpush3.bf16.msra.mxu1 %v8258_v27  ;;  %7250 = vmatpush3.bf16.msra.mxu0 %v8258_v27 }
  0x1f   : > { %7263 = vmatprep.subr.bf16.mxu1 %v8274_v34  ;;  %7251 = vmatprep.subr.bf16.mxu0 %v8274_v34 }
  0x22   : > { %7264 = vmatpush3.bf16.msra.mxu1 %v8274_v34  ;;  %7252 = vmatpush3.bf16.msra.mxu0 %v8274_v34 }
  0x23   : > { %7269 = vmatprep.subr.bf16.mxu1 %v8234_v12  ;;  %727 = vmatprep.subr.bf16.mxu0 %v7406_v37 }
  0x25   : > { %7266 = vmatmul.mubr.msk.bf16.vlgmr.msra.gmra.mrb[0].mxu1 %vm535_vm1, %v614_v43  ;;  %7254 = vmatmul.mubr.msk.bf16.vlgmr.msra.gmra.mrb[0].mxu0 %vm535_vm1, %v534_v44  ;;  %v7434_v43 = vld [vmem:[%s10106_s1 + $0xa0] ss:$8 sps:$4 sm:$0xff]   ;;  %v7439_v44 = vld [vmem:[%s10106_s1 + $0xb4] ss:$8 sps:$4 sm:$0xff]  }
  0x26   : > { %7270 = vmatpush3.bf16.msra.mxu1 %v8234_v12  ;;  %7277 = vmatprep.mubr.msk.bf16.mxu1 %vm535_vm1, %v8313_v46 }
  0x27   : > { %7271 = vmatprep.subr.bf16.mxu1 %v8240_v17  ;;  %728 = vmatpush1.bf16.msra.mxu0 %v7404_v45  ;;  %v7437_v45 = vld [vmem:[%s10106_s1 + $0xb0] ss:$8 sps:$4 sm:$0xff]  }
  0x28   : > { %729 = vmatprep.subr.bf16.mxu0 %v7409_v47  ;;  %759 = vmatprep.mubr.bf16.mxu0 %v8121_v6  ;;  %v7442_v47 = vld [vmem:[%s10106_s1 + $0xc4] ss:$8 sps:$4 sm:$0xff]  }
  0x2a   : > { %7272 = vmatpush3.bf16.msra.mxu1 %v8240_v17 }
  0x2b   : > { %7273 = vmatprep.subr.bf16.mxu1 %v8258_v27  ;;  %730 = vmatpush1.bf16.msra.mxu0 %v7407_v48 }
  0x2c   : > { %731 = vmatprep.subr.bf16.mxu0 %v7412_v49 }
  0x2e   : > { %7274 = vmatpush3.bf16.msra.mxu1 %v8258_v27 }
  0x2f   : > { %7275 = vmatprep.subr.bf16.mxu1 %v8274_v34  ;;  %732 = vmatpush1.bf16.msra.mxu0 %v7410_v54  ;;  %v7445_v54 = vld [vmem:[%s10106_s1 + $0xd4] ss:$8 sps:$4 sm:$0xff]  }
  0x30   : > { %733 = vmatprep.subr.bf16.mxu0 %v7415_v4  ;;  %v1266_v4 = vrot.slane %v1261_v0, %v8471_v63 }
  0x32   : > { %7276 = vmatpush3.bf16.msra.mxu1 %v8274_v34 }
  0x33   : > { %7281 = vmatprep.subr.bf16.mxu1 %v8234_v12  ;;  %734 = vmatpush1.bf16.msra.mxu0 %v7413_v3 }
  0x34   : > { %826 = vmatprep.subr.bf16.mxu0 %v7418_v5 }
  0x35   : > { %7278 = vmatmul.mubr.msk.bf16.vlgmr.msra.gmra.mrb[4].mxu1 %vm535_vm1, %v896_v59  ;;  %v7446_v59 = vld [vmem:[%s10106_s1 + $0xe0] ss:$8 sps:$4 sm:$0xff]  }
  0x36   : > { %7282 = vmatpush3.bf16.msra.mxu1 %v8234_v12  ;;  %7289 = vmatprep.mubr.msk.bf16.mxu1 %vm535_vm1, %v8354_v60 }
  0x37   : > { %7283 = vmatprep.subr.bf16.mxu1 %v8240_v17 }
  0x3a   : > { %7284 = vmatpush3.bf16.msra.mxu1 %v8240_v17  ;;  %v7416_v17 = vld [vmem:[%s10106_s1] ss:$8 sps:$4 sm:$0xff]  }
  0x3b   : > { %7285 = vmatprep.subr.bf16.mxu1 %v8258_v27 }
  0x3e   : > { %7286 = vmatpush3.bf16.msra.mxu1 %v8258_v27  ;;  %v7427_v27 = vld [vmem:[%s10106_s1 + $0x34] ss:$8 sps:$4 sm:$0xff]  }
  0x3f   : > { %7287 = vmatprep.subr.bf16.mxu1 %v8274_v34 }
  0x42   : > { %7288 = vmatpush3.bf16.msra.mxu1 %v8274_v34  ;;  %v7428_v34 = vld [vmem:[%s10106_s1 + $0x80] ss:$8 sps:$4 sm:$0xff]  }
  0x45   : > { %7290 = vmatmul.mubr.msk.bf16.vlgmr.msra.gmra.mrb[8].mxu1 %vm535_vm1, %v1087_v1  ;;  %v8477_v1 = vsub.s32 1, %v8216_v2 }
  0x46   : > { %1344 = vmatprep.mubr.bf16.mxu1 %v8121_v6 }
  0x47   : > { %v1270_v3 = vrot.slane %v1261_v0, %v8477_v1  ;;  %v7476_v0 = vld [vmem:[%s10107_s2 + $0x180] ss:$8 sps:$4 sm:$0xff]  }
  0xf8   : > { %v7267_v7 = vpop.f32.mrb[0].mxu1  ;;  %v7255_v8 = vpop.f32.mrb[0].mxu0 }
  0xf9   : > { %v655_v9 = vpop.f32.mrb[1].mxu1  ;;  %v576_v10 = vpop.f32.mrb[1].mxu0 }
  0xfa   : > { %v7268_v11 = vpop.f32.mrb[2].mxu1  ;;  %v7256_v12 = vpop.f32.mrb[2].mxu0 }
  0xfb   : > { %v671_v13 = vpack.c.bf16 %v7268_v11, %v7267_v7  ;;  %v658_v16 = vpop.f32.mrb[3].mxu1  ;;  %v592_v18 = vpack.c.bf16 %v7256_v12, %v7255_v8  ;;  %v579_v19 = vpop.f32.mrb[3].mxu0 }
  0xfc   : > { %v670_v20 = vpack.c.bf16 %v658_v16, %v655_v9  ;;  %v591_v22 = vpack.c.bf16 %v579_v19, %v576_v10 }
  0xfe   : > { %6123 = vmatmul.mubr.msk.bf16.vlgmr.msra.gmra.mrb[4].mxu0 %vm535_vm1, %v670_v20 }
  0xff   : > { %827 = vmatpush1.bf16.msra.mxu0 %v7416_v17  ;;  %769 = vmatprep.mubr.bf16.mxu0 %v8121_v6 }
 0x100   : > { %828 = vmatprep.subr.bf16.mxu0 %v7421_v21 }
 0x103   : > { %829 = vmatpush1.bf16.msra.mxu0 %v7419_v23 }
 0x104   : > { %830 = vmatprep.subr.bf16.mxu0 %v7424_v24 }
 0x106   : > { %6124 = vmatmul.mubr.msk.bf16.gmra.mrb[8].mxu0 %vm535_vm1, %v671_v13 }
 0x107   : > { %831 = vmatpush1.bf16.msra.mxu0 %v7422_v26  ;;  %858 = vmatprep.mubr.bf16.mxu0 %v8121_v6 }
 0x108   : > { %832 = vmatprep.subr.bf16.mxu0 %v7427_v27  ;;  %v7279_v31 = vpop.f32.mrb[4].mxu1 }
 0x109   : > { %v937_v32 = vpop.f32.mrb[5].mxu1 }
 0x10a   : > { %v7280_v33 = vpop.f32.mrb[6].mxu1 }
 0x10b   : > { %833 = vmatpush1.bf16.msra.mxu0 %v7425_v28  ;;  %v953_v36 = vpack.c.bf16 %v7280_v33, %v7279_v31  ;;  %v940_v37 = vpop.f32.mrb[7].mxu1 }
 0x10c   : > { %1009 = vmatprep.subr.bf16.mxu0 %v7430_v29  ;;  %v952_v39 = vpack.c.bf16 %v940_v37, %v937_v32 }
 0x10e   : > { %6133 = vmatmul.mubr.msk.bf16.vlgmr.msra.gmra.mrb[4].mxu0 %vm535_vm1, %v591_v22 }
 0x10f   : > { %1010 = vmatpush1.bf16.msra.mxu0 %v7428_v34  ;;  %868 = vmatprep.mubr.bf16.mxu0 %v8121_v6 }
 0x110   : > { %1011 = vmatprep.subr.bf16.mxu0 %v7433_v38 }
 0x113   : > { %1012 = vmatpush1.bf16.msra.mxu0 %v7431_v40 }
 0x114   : > { %1013 = vmatprep.subr.bf16.mxu0 %v7436_v42 }
 0x116   : > { %6134 = vmatmul.mubr.msk.bf16.gmra.mrb[8].mxu0 %vm535_vm1, %v592_v18 }
 0x117   : > { %1014 = vmatpush1.bf16.msra.mxu0 %v7434_v43  ;;  %1041 = vmatprep.mubr.bf16.mxu0 %v8121_v6 }
 0x118   : > { %1015 = vmatprep.subr.bf16.mxu0 %v7439_v44  ;;  %v7291_v48 = vpop.f32.mrb[8].mxu1 }
 0x119   : > { %v1128_v49 = vpop.f32.mrb[9].mxu1 }
 0x11a   : > { %v7292_v50 = vpop.f32.mrb[10].mxu1 }
 0x11b   : > { %1016 = vmatpush1.bf16.msra.mxu0 %v7437_v45  ;;  %v1144_v52 = vpack.c.bf16 %v7292_v50, %v7291_v48  ;;  %v1131_v53 = vpop.f32.mrb[11].mxu1  ;;  %v7454_v48 = vld [vmem:[%s10107_s2 + $0x104] ss:$8 sps:$4 sm:$0xff]  }
 0x11c   : > { %1200 = vmatprep.subr.bf16.mxu0 %v7442_v47  ;;  %v1143_v55 = vpack.c.bf16 %v1131_v53, %v1128_v49  ;;  %v7455_v49 = vld [vmem:[%s10107_s2 + $0x110] ss:$8 sps:$4 sm:$0xff]   ;;  %v7460_v50 = vld [vmem:[%s10107_s2 + $0x124] ss:$8 sps:$4 sm:$0xff]   ;;  %v7464_v53 = vld [vmem:[%s10107_s2 + $0x140] ss:$8 sps:$4 sm:$0xff]  }
 0x11e   : > { %6157 = vmatmul.mubr.msk.bf16.vlgmr.msra.gmra.mrb[4].mxu0 %vm535_vm1, %v952_v39 }
 0x11f   : > { %1201 = vmatpush1.bf16.msra.mxu0 %v7440_v51  ;;  %1051 = vmatprep.mubr.bf16.mxu0 %v8121_v6  ;;  %v7461_v51 = vld [vmem:[%s10107_s2 + $0x130] ss:$8 sps:$4 sm:$0xff]  }
 0x120   : > { %1202 = vmatprep.subr.bf16.mxu0 %v7445_v54  ;;  %v7469_v54 = vld [vmem:[%s10107_s2 + $0x154] ss:$8 sps:$4 sm:$0xff]  }
 0x123   : > { %1203 = vmatpush1.bf16.msra.mxu0 %v7443_v56  ;;  %v7472_v56 = vld [vmem:[%s10107_s2 + $0x164] ss:$8 sps:$4 sm:$0xff]  }
 0x124   : > { %1204 = vmatprep.subr.bf16.mxu0 %v7448_v58  ;;  %v7470_v58 = vld [vmem:[%s10107_s2 + $0x160] ss:$8 sps:$4 sm:$0xff]  }
 0x126   : > { %6158 = vmatmul.mubr.msk.bf16.gmra.mrb[8].mxu0 %vm535_vm1, %v953_v36 }
 0x127   : > { %1205 = vmatpush1.bf16.msra.mxu0 %v7446_v59  ;;  %1232 = vmatprep.mubr.bf16.mxu0 %v8121_v6  ;;  %v7475_v59 = vld [vmem:[%s10107_s2 + $0x174] ss:$8 sps:$4 sm:$0xff]  }
 0x128   : > { %1206 = vmatprep.subr.bf16.mxu0 %v7451_v61  ;;  %v7473_v61 = vld [vmem:[%s10107_s2 + $0x170] ss:$8 sps:$4 sm:$0xff]  }
 0x12b   : > { %1207 = vmatpush1.bf16.msra.mxu0 %v7449_v62  ;;  %v7478_v62 = vld [vmem:[%s10107_s2 + $0x184] ss:$8 sps:$4 sm:$0xff]  }
 0x12e   : > { %6181 = vmatmul.mubr.msk.bf16.vlgmr.msra.gmra.mrb[4].mxu0 %vm535_vm1, %v1143_v55  ;;  %v7467_v55 = vld [vmem:[%s10107_s2 + $0x150] ss:$8 sps:$4 sm:$0xff]  }
 0x12f   : > { %1242 = vmatprep.mubr.bf16.mxu0 %v8121_v6 }
 0x136   : > { %6182 = vmatmul.mubr.msk.bf16.gmra.mrb[8].mxu0 %vm535_vm1, %v1144_v52  ;;  %v7466_v52 = vld [vmem:[%s10107_s2 + $0x144] ss:$8 sps:$4 sm:$0xff]  }
 0x137   : > { %1909 = vmatprep.mubr.bf16.mxu0 %v8121_v6 }
 0x201   : > { %v1234_v5 = vpop.f32.mrb[4].mxu0 }
 0x202   : > { %v1273_v7 = vadd.f32 %v1266_v4, %v1234_v5  ;;  %v1236_v8 = vpop.f32.mrb[5].mxu0  ;;  %v7484_v5 = vld [vmem:[%s10107_s2 + $0x1a4] ss:$8 sps:$4 sm:$0xff]  }
 0x203   : > { %v1274_v9 = vadd.f32 %v1270_v3, %v1236_v8  ;;  %v1238_v10 = vpop.f32.mrb[6].mxu0  ;;  %v7487_v8 = vld [vmem:[%s10107_s2 + $0x1b4] ss:$8 sps:$4 sm:$0xff]  }
 0x204   : > { %v1289_v11 = vmul.f32 0.2, %v1273_v7  ;;  %v1275_v12 = vadd.f32 %v1266_v4, %v1238_v10  ;;  %v1240_v13 = vpop.f32.mrb[7].mxu0  ;;  %vm1281_vm2 = vcmp.ge.f32.partialorder %v1273_v7, 0.0  ;;  %v7490_v10 = vld [vmem:[%s10107_s2 + $0x1c4] ss:$8 sps:$4 sm:$0xff]  }
 0x205   : > { %v1290_v16 = vmul.f32 0.2, %v1274_v9  ;;  %v1276_v17 = vadd.f32 %v1270_v3, %v1240_v13  ;;  %vm1282_vm3 = vcmp.ge.f32.partialorder %v1274_v9, 0.0  ;;  %v7491_v13 = vld [vmem:[%s10107_s2 + $0x1d0] ss:$8 sps:$4 sm:$0xff]  }
 0x206   : > { %vm1283_vm4 = vcmp.ge.f32.partialorder %v1275_v12, 0.0  ;;  %v1291_v18 = vmul.f32 0.2, %v1275_v12  ;;  %v1297_v19 = vsel %vm1281_vm2, %v1273_v7, %v1289_v11  ;;  %v7482_v7 = vld [vmem:[%s10107_s2 + $0x1a0] ss:$8 sps:$4 sm:$0xff]  }
 0x207   : > { %vm1284_vm5 = vcmp.ge.f32.partialorder %v1276_v17, 0.0  ;;  %v1292_v2 = vmul.f32 0.2, %v1276_v17  ;;  %v1298_v21 = vsel %vm1282_vm3, %v1274_v9, %v1290_v16  ;;  %v7485_v9 = vld [vmem:[%s10107_s2 + $0x1b0] ss:$8 sps:$4 sm:$0xff]   ;;  %vm3632_vm3 = vcmask 1043456  }
 0x208   : > { %v1299_v20 = vsel %vm1283_vm4, %v1275_v12, %v1291_v18  ;;  %v7488_v11 = vld [vmem:[%s10107_s2 + $0x1c0] ss:$8 sps:$4 sm:$0xff]   ;;  %v7493_v12 = vld [vmem:[%s10107_s2 + $0x1d4] ss:$8 sps:$4 sm:$0xff]   ;;  %vm3629_vm4 = vcmask 64512  }
 0x209   : > { %v1305_v22 = vpack.c.bf16 %v1299_v20, %v1297_v19  ;;  %v1300_v23 = vsel %vm1284_vm5, %v1276_v17, %v1292_v2  ;;  %v1244_v24 = vpop.f32.mrb[8].mxu0  ;;  %v7494_v16 = vld [vmem:[%s10107_s2 + $0x1e0] ss:$8 sps:$4 sm:$0xff]   ;;  %v7496_v17 = vld [vmem:[%s10107_s2 + $0x1e4] ss:$8 sps:$4 sm:$0xff]  }
 0x20a   : > { %v1306_v26 = vpack.c.bf16 %v1300_v23, %v1298_v21  ;;  %v1277_v27 = vadd.f32 %v1266_v4, %v1244_v24  ;;  %v1246_v28 = vpop.f32.mrb[9].mxu0  ;;  %v7499_v18 = vld [vmem:[%s10107_s2 + $0x1f4] ss:$8 sps:$4 sm:$0xff]   ;;  %v7497_v2 = vld [vmem:[%s10107_s2 + $0x1f0] ss:$8 sps:$4 sm:$0xff]  }
 0x20b   : > { %v1278_v29 = vadd.f32 %v1270_v3, %v1246_v28  ;;  %v1248_v31 = vpop.f32.mrb[10].mxu0  ;;  %v7502_v19 = vld [vmem:[%s10107_s2 + $0x4] ss:$8 sps:$4 sm:$0xff]  }
 0x20c   : > { %v1293_v32 = vmul.f32 0.2, %v1277_v27  ;;  %v1279_v33 = vadd.f32 %v1266_v4, %v1248_v31  ;;  %v1250_v34 = vpop.f32.mrb[11].mxu0  ;;  %1312 = vmatprep.subr.bf16.mxu1 %v1306_v26  ;;  %1877 = vmatprep.subr.bf16.mxu0 %v1306_v26  ;;  %vm1285_vm6 = vcmp.ge.f32.partialorder %v1277_v27, 0.0  ;;  %v7481_v4 = vld [vmem:[%s10107_s2 + $0x194] ss:$8 sps:$4 sm:$0xff]  }
 0x20d   : > { %v1294_v36 = vmul.f32 0.2, %v1278_v29  ;;  %v1280_v37 = vadd.f32 %v1270_v3, %v1250_v34  ;;  %1313 = vmatpush1.bf16.msra.mxu1 %v1305_v22  ;;  %1878 = vmatpush1.bf16.msra.mxu0 %v1305_v22  ;;  %vm1286_vm7 = vcmp.ge.f32.partialorder %v1278_v29, 0.0  ;;  %v7479_v3 = vld [vmem:[%s10107_s2 + $0x190] ss:$8 sps:$4 sm:$0xff]  }
 0x20e   : > { %vm1287_vm8 = vcmp.ge.f32.partialorder %v1279_v33, 0.0  ;;  %v1295_v38 = vmul.f32 0.2, %v1279_v33  ;;  %v1301_v40 = vsel %vm1285_vm6, %v1277_v27, %v1293_v32 }
 0x20f   : > { %vm1288_vm9 = vcmp.ge.f32.partialorder %v1280_v37, 0.0  ;;  %v1296_v39 = vmul.f32 0.2, %v1280_v37  ;;  %v1302_v43 = vsel %vm1286_vm7, %v1278_v29, %v1294_v36  ;;  %vm4781_vm7 = vcmask 1041408  }
 0x210   : > { %v1303_v42 = vsel %vm1287_vm8, %v1279_v33, %v1295_v38  ;;  %vm4778_vm8 = vcmask 31744  }
 0x211   : > { %v1307_v44 = vpack.c.bf16 %v1303_v42, %v1301_v40  ;;  %v1304_v45 = vsel %vm1288_vm9, %v1280_v37, %v1296_v39  ;;  %v7500_v42 = vld [vmem:[%s10107_s2] ss:$8 sps:$4 sm:$0xff]   ;;  %vm8122_vm9 = vmmov 0  }
 0x212   : > { %v1308_v47 = vpack.c.bf16 %v1304_v45, %v1302_v43  ;;  %v7505_v43 = vld [vmem:[%s10107_s2 + $0x14] ss:$8 sps:$4 sm:$0xff]   ;;  %v7508_v45 = vld [vmem:[%s10107_s2 + $0x24] ss:$8 sps:$4 sm:$0xff]  }
 0x214   : > { %1314 = vmatprep.subr.bf16.mxu1 %v1308_v47  ;;  %1879 = vmatprep.subr.bf16.mxu0 %v1308_v47 }
 0x215   : > { %1315 = vmatpush1.bf16.msra.mxu1 %v1307_v44  ;;  %1880 = vmatpush1.bf16.msra.mxu0 %v1307_v44 }
 0x216   : > { %1391 = vmatprep.subr.bf16.mxu1 %v1306_v26  ;;  %2164 = vmatprep.subr.bf16.mxu0 %v1306_v26 }
 0x218   : > { %6183 = vmatmul.mubr.msk.bf16.vlgmr.msra.gmra.mrb[12].mxu1 %vm1309_vm10, %v8280_v35  ;;  %6281 = vmatmul.mubr.msk.bf16.vlgmr.msra.gmra.mrb[12].mxu0 %vm1309_vm10, %v8313_v46  ;;  %v7452_v35 = vld [vmem:[%s10107_s2 + $0x100] ss:$8 sps:$4 sm:$0xff]   ;;  %v7457_v46 = vld [vmem:[%s10107_s2 + $0x114] ss:$8 sps:$4 sm:$0xff]  }
 0x219   : > { %1392 = vmatpush1.bf16.msra.mxu1 %v1305_v22  ;;  %2165 = vmatpush1.bf16.msra.mxu0 %v1305_v22 }
 0x21a   : > { %1393 = vmatprep.subr.bf16.mxu1 %v1308_v47  ;;  %2166 = vmatprep.subr.bf16.mxu0 %v1308_v47  ;;  %v7506_v47 = vld [vmem:[%s10107_s2 + $0x20] ss:$8 sps:$4 sm:$0xff]  }
 0x21b   : > { %1423 = vmatprep.mubr.bf16.mxu1 %v8121_v6  ;;  %2196 = vmatprep.mubr.bf16.mxu0 %v8121_v6 }
 0x21d   : > { %1394 = vmatpush1.bf16.msra.mxu1 %v1307_v44  ;;  %2167 = vmatpush1.bf16.msra.mxu0 %v1307_v44  ;;  %v7503_v44 = vld [vmem:[%s10107_s2 + $0x10] ss:$8 sps:$4 sm:$0xff]  }
 0x21e   : > { %1629 = vmatprep.subr.bf16.mxu1 %v7454_v48  ;;  %v7511_v48 = vld [vmem:[%s10107_s2 + $0x34] ss:$8 sps:$4 sm:$0xff]  }
 0x220   : > { %6184 = vmatmul.mubr.msk.bf16.vlgmr.msra.gmra.mrb[16].mxu1 %vm1309_vm10, %v8254_v25  ;;  %6346 = vmatmul.mubr.msk.bf16.vlgmr.msra.gmra.mrb[16].mxu0 %vm1309_vm10, %v8354_v60  ;;  %v7458_v25 = vld [vmem:[%s10107_s2 + $0x120] ss:$8 sps:$4 sm:$0xff]   ;;  %v7463_v60 = vld [vmem:[%s10107_s2 + $0x134] ss:$8 sps:$4 sm:$0xff]  }
 0x221   : > { %1630 = vmatpush1.bf16.msra.mxu1 %v7452_v35  ;;  %2516 = vmatprep.mubr.bf16.mxu0 %v8121_v6  ;;  %v7509_v35 = vld [vmem:[%s10107_s2 + $0x30] ss:$8 sps:$4 sm:$0xff]  }
 0x222   : > { %1631 = vmatprep.subr.bf16.mxu1 %v7457_v46  ;;  %v7514_v46 = vld [vmem:[%s10107_s2 + $0x44] ss:$8 sps:$4 sm:$0xff]  }
 0x225   : > { %1632 = vmatpush1.bf16.msra.mxu1 %v7455_v49  ;;  %v7512_v49 = vld [vmem:[%s10107_s2 + $0x40] ss:$8 sps:$4 sm:$0xff]  }
 0x226   : > { %1633 = vmatprep.subr.bf16.mxu1 %v7460_v50  ;;  %v7517_v50 = vld [vmem:[%s10107_s2 + $0x54] ss:$8 sps:$4 sm:$0xff]  }
 0x229   : > { %1634 = vmatpush1.bf16.msra.mxu1 %v7458_v25  ;;  %v7515_v25 = vld [vmem:[%s10107_s2 + $0x50] ss:$8 sps:$4 sm:$0xff]  }
 0x22a   : > { %1635 = vmatprep.subr.bf16.mxu1 %v7463_v60  ;;  %v7520_v60 = vld [vmem:[%s10107_s2 + $0x64] ss:$8 sps:$4 sm:$0xff]  }
 0x22d   : > { %1636 = vmatpush1.bf16.msra.mxu1 %v7461_v51  ;;  %v7518_v51 = vld [vmem:[%s10107_s2 + $0x60] ss:$8 sps:$4 sm:$0xff]  }
 0x22e   : > { %1637 = vmatprep.subr.bf16.mxu1 %v7466_v52  ;;  %v7523_v52 = vld [vmem:[%s10107_s2 + $0x74] ss:$8 sps:$4 sm:$0xff]  }
 0x231   : > { %1638 = vmatpush1.bf16.msra.mxu1 %v7464_v53  ;;  %v7521_v53 = vld [vmem:[%s10107_s2 + $0x70] ss:$8 sps:$4 sm:$0xff]  }
 0x232   : > { %1639 = vmatprep.subr.bf16.mxu1 %v7469_v54  ;;  %v7526_v54 = vld [vmem:[%s10107_s2 + $0x84] ss:$8 sps:$4 sm:$0xff]  }
 0x235   : > { %1640 = vmatpush1.bf16.msra.mxu1 %v7467_v55  ;;  %v7524_v55 = vld [vmem:[%s10107_s2 + $0x80] ss:$8 sps:$4 sm:$0xff]  }
 0x236   : > { %1641 = vmatprep.subr.bf16.mxu1 %v7472_v56  ;;  %v7529_v56 = vld [vmem:[%s10107_s2 + $0x94] ss:$8 sps:$4 sm:$0xff]  }
 0x239   : > { %1642 = vmatpush1.bf16.msra.mxu1 %v7470_v58  ;;  %v7527_v58 = vld [vmem:[%s10107_s2 + $0x90] ss:$8 sps:$4 sm:$0xff]  }
 0x23a   : > { %1643 = vmatprep.subr.bf16.mxu1 %v7475_v59  ;;  %v7532_v59 = vld [vmem:[%s10107_s2 + $0xa4] ss:$8 sps:$4 sm:$0xff]  }
 0x23d   : > { %1644 = vmatpush1.bf16.msra.mxu1 %v7473_v61  ;;  %v7530_v61 = vld [vmem:[%s10107_s2 + $0xa0] ss:$8 sps:$4 sm:$0xff]  }
 0x23e   : > { %1645 = vmatprep.subr.bf16.mxu1 %v7478_v62  ;;  %v7535_v62 = vld [vmem:[%s10107_s2 + $0xb4] ss:$8 sps:$4 sm:$0xff]  }
 0x241   : > { %1646 = vmatpush1.bf16.msra.mxu1 %v7476_v0  ;;  %v7533_v0 = vld [vmem:[%s10107_s2 + $0xb0] ss:$8 sps:$4 sm:$0xff]  }
 0x242   : > { %1647 = vmatprep.subr.bf16.mxu1 %v7481_v4  ;;  %v7538_v4 = vld [vmem:[%s10107_s2 + $0xc4] ss:$8 sps:$4 sm:$0xff]  }
 0x245   : > { %1648 = vmatpush1.bf16.msra.mxu1 %v7479_v3  ;;  %v7536_v3 = vld [vmem:[%s10107_s2 + $0xc0] ss:$8 sps:$4 sm:$0xff]  }
 0x246   : > { %1649 = vmatprep.subr.bf16.mxu1 %v7484_v5  ;;  %v7541_v5 = vld [vmem:[%s10107_s2 + $0xd4] ss:$8 sps:$4 sm:$0xff]  }
 0x249   : > { %1650 = vmatpush1.bf16.msra.mxu1 %v7482_v7  ;;  %v7539_v7 = vld [vmem:[%s10107_s2 + $0xd0] ss:$8 sps:$4 sm:$0xff]  }
 0x24a   : > { %1651 = vmatprep.subr.bf16.mxu1 %v7487_v8  ;;  %v7544_v8 = vld [vmem:[%s10107_s2 + $0xe4] ss:$8 sps:$4 sm:$0xff]  }
 0x24d   : > { %1652 = vmatpush1.bf16.msra.mxu1 %v7485_v9  ;;  %v7542_v9 = vld [vmem:[%s10107_s2 + $0xe0] ss:$8 sps:$4 sm:$0xff]  }
 0x24e   : > { %1653 = vmatprep.subr.bf16.mxu1 %v7490_v10 }
 0x251   : > { %1654 = vmatpush1.bf16.msra.mxu1 %v7488_v11  ;;  %v7547_v11 = vld [vmem:[%s10107_s2 + $0xf4] ss:$8 sps:$4 sm:$0xff]  }
 0x252   : > { %1655 = vmatprep.subr.bf16.mxu1 %v7493_v12 }
 0x255   : > { %1656 = vmatpush1.bf16.msra.mxu1 %v7491_v13 }
 0x256   : > { %1657 = vmatprep.subr.bf16.mxu1 %v7496_v17 }
 0x259   : > { %1658 = vmatpush1.bf16.msra.mxu1 %v7494_v16 }
 0x25a   : > { %1659 = vmatprep.subr.bf16.mxu1 %v7499_v18  ;;  %v7545_v18 = vld [vmem:[%s10107_s2 + $0xf0] ss:$8 sps:$4 sm:$0xff]  }
 0x25d   : > { %1660 = vmatpush1.bf16.msra.mxu1 %v7497_v2 }
 0x25e   : > { %1832 = vmatprep.subr.bf16.mxu1 %v7502_v19  ;;  %v7550_v19 = vld [vmem:[%s10107_s2 + $0x204] ss:$8 sps:$4 sm:$0xff]  }
 0x2eb   : > { %v8591_v20 = vpop.f32.mrb[12].mxu1  ;;  %v8597_v27 = vpop.f32.mrb[12].mxu0 }
 0x2ec   : > { %v1348_v21 = vpop.f32.mrb[13].mxu1  ;;  %v8599_v28 = vpop.f32.mrb[13].mxu0 }
 0x2ed   : > { %v8593_v22 = vpop.f32.mrb[14].mxu1  ;;  %v8601_v29 = vpop.f32.mrb[14].mxu0 }
 0x2ee   : > { %v1355_v23 = vpack.c.bf16 %v8593_v22, %v8591_v20  ;;  %v1352_v24 = vpop.f32.mrb[15].mxu1  ;;  %v1920_v31 = vpack.c.bf16 %v8601_v29, %v8597_v27  ;;  %v8605_v33 = vpop.f32.mrb[15].mxu0  ;;  %v7554_v20 = vld [vmem:[%s10107_s2 + $0x220] ss:$8 sps:$4 sm:$0xff]   ;;  %v7559_v22 = vld [vmem:[%s10107_s2 + $0x234] ss:$8 sps:$4 sm:$0xff]  }
 0x2ef   : > { %v1356_v26 = vpack.c.bf16 %v1352_v24, %v1348_v21  ;;  %v1921_v36 = vpack.c.bf16 %v8605_v33, %v8599_v28  ;;  %v7548_v21 = vld [vmem:[%s10107_s2 + $0x200] ss:$8 sps:$4 sm:$0xff]   ;;  %v7553_v24 = vld [vmem:[%s10107_s2 + $0x214] ss:$8 sps:$4 sm:$0xff]   ;;  %v7562_v28 = vld [vmem:[%s10107_s2 + $0x244] ss:$8 sps:$4 sm:$0xff]  }
 0x2f0   : > { %v7560_v33 = vld [vmem:[%s10107_s2 + $0x240] ss:$8 sps:$4 sm:$0xff]   ;;  %v7607_v29 = vld [vmem:[%s10107_s2 + $0x334] ss:$8 sps:$4 sm:$0xff]  }
 0x2f1   : > { %v7602_v27 = vld [vmem:[%s10107_s2 + $0x320] ss:$8 sps:$4 sm:$0xff]  }
 0x2f3   : > { %v1425_v32 = vpop.f32.mrb[16].mxu1  ;;  %v8696_v10 = vpop.f32.mrb[16].mxu0 }
 0x2f4   : > { %v1427_v34 = vpop.f32.mrb[17].mxu1  ;;  %v8701_v12 = vpop.f32.mrb[17].mxu0 }
 0x2f5   : > { %v1429_v37 = vpop.f32.mrb[18].mxu1  ;;  %v8703_v13 = vpop.f32.mrb[18].mxu0 }
 0x2f6   : > { %v1434_v38 = vpack.c.bf16 %v1429_v37, %v1425_v32  ;;  %v1431_v39 = vpop.f32.mrb[19].mxu1  ;;  %v2207_v16 = vpack.c.bf16 %v8703_v13, %v8696_v10  ;;  %v8707_v17 = vpop.f32.mrb[19].mxu0  ;;  %v7556_v32 = vld [vmem:[%s10107_s2 + $0x224] ss:$8 sps:$4 sm:$0xff]  }
 0x2f7   : > { %v1435_v40 = vpack.c.bf16 %v1431_v39, %v1427_v34  ;;  %v2208_v2 = vpack.c.bf16 %v8707_v17, %v8701_v12  ;;  %v7565_v34 = vld [vmem:[%s10107_s2 + $0x254] ss:$8 sps:$4 sm:$0xff]   ;;  %v7568_v37 = vld [vmem:[%s10107_s2 + $0x264] ss:$8 sps:$4 sm:$0xff]   ;;  %v7620_v12 = vld [vmem:[%s10107_s2 + $0x380] ss:$8 sps:$4 sm:$0xff]  }
 0x2f8   : > { %v7571_v39 = vld [vmem:[%s10107_s2 + $0x274] ss:$8 sps:$4 sm:$0xff]  }
 0x2f9   : > { %1661 = vmatprep.mubr.bf16.mxu1 %v1435_v40  ;;  %v7569_v40 = vld [vmem:[%s10107_s2 + $0x270] ss:$8 sps:$4 sm:$0xff]   ;;  %v7625_v17 = vld [vmem:[%s10107_s2 + $0x394] ss:$8 sps:$4 sm:$0xff]  }
 0x2fa   : > { %1662 = vmatmul.mubr.bf16.vlgmr.msra.gmra.mrb[20].mxu1 %v1434_v38  ;;  %v7566_v38 = vld [vmem:[%s10107_s2 + $0x260] ss:$8 sps:$4 sm:$0xff]  }
 0x2fb   : > { %1833 = vmatpush1.bf16.msra.mxu1 %v7500_v42  ;;  %1864 = vmatprep.mubr.bf16.mxu1 %v1356_v26  ;;  %v7551_v26 = vld [vmem:[%s10107_s2 + $0x210] ss:$8 sps:$4 sm:$0xff]   ;;  %v7574_v42 = vld [vmem:[%s10107_s2 + $0x284] ss:$8 sps:$4 sm:$0xff]  }
 0x2fc   : > { %1834 = vmatprep.subr.bf16.mxu1 %v7505_v43  ;;  %v7572_v43 = vld [vmem:[%s10107_s2 + $0x280] ss:$8 sps:$4 sm:$0xff]  }
 0x2ff   : > { %1835 = vmatpush1.bf16.msra.mxu1 %v7503_v44  ;;  %v7577_v44 = vld [vmem:[%s10107_s2 + $0x294] ss:$8 sps:$4 sm:$0xff]  }
 0x300   : > { %1836 = vmatprep.subr.bf16.mxu1 %v7508_v45  ;;  %v7575_v45 = vld [vmem:[%s10107_s2 + $0x290] ss:$8 sps:$4 sm:$0xff]  }
 0x303   : > { %1837 = vmatpush1.bf16.msra.mxu1 %v7506_v47  ;;  %v7580_v47 = vld [vmem:[%s10107_s2 + $0x2a4] ss:$8 sps:$4 sm:$0xff]  }
 0x304   : > { %1838 = vmatprep.subr.bf16.mxu1 %v7511_v48  ;;  %v7578_v48 = vld [vmem:[%s10107_s2 + $0x2a0] ss:$8 sps:$4 sm:$0xff]  }
 0x307   : > { %1839 = vmatpush1.bf16.msra.mxu1 %v7509_v35  ;;  %v7583_v35 = vld [vmem:[%s10107_s2 + $0x2b4] ss:$8 sps:$4 sm:$0xff]  }
 0x308   : > { %1840 = vmatprep.subr.bf16.mxu1 %v7514_v46  ;;  %v7581_v46 = vld [vmem:[%s10107_s2 + $0x2b0] ss:$8 sps:$4 sm:$0xff]  }
 0x30b   : > { %1841 = vmatpush1.bf16.msra.mxu1 %v7512_v49  ;;  %v7586_v49 = vld [vmem:[%s10107_s2 + $0x2c4] ss:$8 sps:$4 sm:$0xff]  }
 0x30c   : > { %1842 = vmatprep.subr.bf16.mxu1 %v7517_v50  ;;  %v7584_v50 = vld [vmem:[%s10107_s2 + $0x2c0] ss:$8 sps:$4 sm:$0xff]  }
 0x30f   : > { %1843 = vmatpush1.bf16.msra.mxu1 %v7515_v25  ;;  %v7589_v25 = vld [vmem:[%s10107_s2 + $0x2d4] ss:$8 sps:$4 sm:$0xff]  }
 0x310   : > { %1844 = vmatprep.subr.bf16.mxu1 %v7520_v60  ;;  %v7587_v60 = vld [vmem:[%s10107_s2 + $0x2d0] ss:$8 sps:$4 sm:$0xff]  }
 0x313   : > { %1845 = vmatpush1.bf16.msra.mxu1 %v7518_v51  ;;  %v7592_v51 = vld [vmem:[%s10107_s2 + $0x2e4] ss:$8 sps:$4 sm:$0xff]  }
 0x314   : > { %1846 = vmatprep.subr.bf16.mxu1 %v7523_v52  ;;  %v7590_v52 = vld [vmem:[%s10107_s2 + $0x2e0] ss:$8 sps:$4 sm:$0xff]  }
 0x317   : > { %1847 = vmatpush1.bf16.msra.mxu1 %v7521_v53  ;;  %v7595_v53 = vld [vmem:[%s10107_s2 + $0x2f4] ss:$8 sps:$4 sm:$0xff]  }
 0x318   : > { %1848 = vmatprep.subr.bf16.mxu1 %v7526_v54  ;;  %v7593_v54 = vld [vmem:[%s10107_s2 + $0x2f0] ss:$8 sps:$4 sm:$0xff]  }
 0x31b   : > { %1849 = vmatpush1.bf16.msra.mxu1 %v7524_v55  ;;  %v7598_v55 = vld [vmem:[%s10107_s2 + $0x304] ss:$8 sps:$4 sm:$0xff]  }
 0x31c   : > { %1850 = vmatprep.subr.bf16.mxu1 %v7529_v56  ;;  %v7596_v56 = vld [vmem:[%s10107_s2 + $0x300] ss:$8 sps:$4 sm:$0xff]  }
 0x31f   : > { %1851 = vmatpush1.bf16.msra.mxu1 %v7527_v58  ;;  %v7601_v58 = vld [vmem:[%s10107_s2 + $0x314] ss:$8 sps:$4 sm:$0xff]  }
 0x320   : > { %1852 = vmatprep.subr.bf16.mxu1 %v7532_v59  ;;  %v7599_v59 = vld [vmem:[%s10107_s2 + $0x310] ss:$8 sps:$4 sm:$0xff]  }
 0x323   : > { %1853 = vmatpush1.bf16.msra.mxu1 %v7530_v61  ;;  %v7604_v61 = vld [vmem:[%s10107_s2 + $0x324] ss:$8 sps:$4 sm:$0xff]  }
 0x324   : > { %1854 = vmatprep.subr.bf16.mxu1 %v7535_v62  ;;  %v7610_v62 = vld [vmem:[%s10107_s2 + $0x344] ss:$8 sps:$4 sm:$0xff]  }
 0x327   : > { %1855 = vmatpush1.bf16.msra.mxu1 %v7533_v0  ;;  %v7608_v0 = vld [vmem:[%s10107_s2 + $0x340] ss:$8 sps:$4 sm:$0xff]  }
 0x328   : > { %1856 = vmatprep.subr.bf16.mxu1 %v7538_v4  ;;  %v7613_v4 = vld [vmem:[%s10107_s2 + $0x354] ss:$8 sps:$4 sm:$0xff]  }
 0x32b   : > { %1857 = vmatpush1.bf16.msra.mxu1 %v7536_v3  ;;  %v7611_v3 = vld [vmem:[%s10107_s2 + $0x350] ss:$8 sps:$4 sm:$0xff]  }
 0x32c   : > { %1858 = vmatprep.subr.bf16.mxu1 %v7541_v5  ;;  %v7616_v5 = vld [vmem:[%s10107_s2 + $0x364] ss:$8 sps:$4 sm:$0xff]  }
 0x32f   : > { %1859 = vmatpush1.bf16.msra.mxu1 %v7539_v7  ;;  %v7614_v7 = vld [vmem:[%s10107_s2 + $0x360] ss:$8 sps:$4 sm:$0xff]  }
 0x330   : > { %1860 = vmatprep.subr.bf16.mxu1 %v7544_v8  ;;  %v7619_v8 = vld [vmem:[%s10107_s2 + $0x374] ss:$8 sps:$4 sm:$0xff]  }
 0x333   : > { %1861 = vmatpush1.bf16.msra.mxu1 %v7542_v9  ;;  %v7617_v9 = vld [vmem:[%s10107_s2 + $0x370] ss:$8 sps:$4 sm:$0xff]  }
 0x334   : > { %1862 = vmatprep.subr.bf16.mxu1 %v7547_v11  ;;  %v7622_v11 = vld [vmem:[%s10107_s2 + $0x384] ss:$8 sps:$4 sm:$0xff]  }
 0x337   : > { %1863 = vmatpush1.bf16.msra.mxu1 %v7545_v18  ;;  %v7623_v18 = vld [vmem:[%s10107_s2 + $0x390] ss:$8 sps:$4 sm:$0xff]  }
 0x338   : > { %2115 = vmatprep.subr.bf16.mxu1 %v7550_v19  ;;  %v7626_v19 = vld [vmem:[%s10107_s2 + $0x3a0] ss:$8 sps:$4 sm:$0xff]  }
 0x33a   : > { %1865 = vmatmul.mubr.bf16.vlgmr.msra.gmra.mrb[20].mxu1 %v1355_v23  ;;  %v7557_v23 = vld [vmem:[%s10107_s2 + $0x230] ss:$8 sps:$4 sm:$0xff]  }
 0x33b   : > { %2116 = vmatpush1.bf16.msra.mxu1 %v7548_v21  ;;  %2147 = vmatprep.mubr.bf16.mxu1 %v1921_v36  ;;  %v7563_v36 = vld [vmem:[%s10107_s2 + $0x250] ss:$8 sps:$4 sm:$0xff]   ;;  %v7631_v21 = vld [vmem:[%s10107_s2 + $0x3b4] ss:$8 sps:$4 sm:$0xff]  }
 0x33c   : > { %2117 = vmatprep.subr.bf16.mxu1 %v7553_v24  ;;  %v7629_v24 = vld [vmem:[%s10107_s2 + $0x3b0] ss:$8 sps:$4 sm:$0xff]  }
 0x33f   : > { %2118 = vmatpush1.bf16.msra.mxu1 %v7551_v26  ;;  %v7634_v26 = vld [vmem:[%s10107_s2 + $0x3c4] ss:$8 sps:$4 sm:$0xff]  }
 0x340   : > { %2119 = vmatprep.subr.bf16.mxu1 %v7556_v32  ;;  %v7632_v32 = vld [vmem:[%s10107_s2 + $0x3c0] ss:$8 sps:$4 sm:$0xff]  }
 0x343   : > { %2120 = vmatpush1.bf16.msra.mxu1 %v7554_v20  ;;  %v7637_v20 = vld [vmem:[%s10107_s2 + $0x3d4] ss:$8 sps:$4 sm:$0xff]  }
 0x344   : > { %2121 = vmatprep.subr.bf16.mxu1 %v7559_v22  ;;  %v7635_v22 = vld [vmem:[%s10107_s2 + $0x3d0] ss:$8 sps:$4 sm:$0xff]  }
 0x347   : > { %2122 = vmatpush1.bf16.msra.mxu1 %v7557_v23  ;;  %v7640_v23 = vld [vmem:[%s10107_s2 + $0x3e4] ss:$8 sps:$4 sm:$0xff]  }
 0x348   : > { %2123 = vmatprep.subr.bf16.mxu1 %v7562_v28  ;;  %v7638_v28 = vld [vmem:[%s10107_s2 + $0x3e0] ss:$8 sps:$4 sm:$0xff]  }
 0x34b   : > { %2124 = vmatpush1.bf16.msra.mxu1 %v7560_v33  ;;  %v7643_v33 = vld [vmem:[%s10107_s2 + $0x3f4] ss:$8 sps:$4 sm:$0xff]  }
 0x34c   : > { %2125 = vmatprep.subr.bf16.mxu1 %v7565_v34  ;;  %v7641_v34 = vld [vmem:[%s10107_s2 + $0x3f0] ss:$8 sps:$4 sm:$0xff]  }
 0x34f   : > { %2126 = vmatpush1.bf16.msra.mxu1 %v7563_v36  ;;  %v2449_v36 = vld [vmem:[%s10114_s9] sm:$0x3] }
 0x350   : > { %2127 = vmatprep.subr.bf16.mxu1 %v7568_v37  ;;  %v2454_v37 = vrot.slane %v2449_v36, %v8471_v63 }
 0x353   : > { %2128 = vmatpush1.bf16.msra.mxu1 %v7566_v38  ;;  %v2458_v38 = vrot.slane %v2449_v36, %v8477_v1 }
 0x354   : > { %2129 = vmatprep.subr.bf16.mxu1 %v7571_v39 }
 0x357   : > { %2130 = vmatpush1.bf16.msra.mxu1 %v7569_v40 }
 0x358   : > { %2131 = vmatprep.subr.bf16.mxu1 %v7574_v42 }
 0x35b   : > { %2132 = vmatpush1.bf16.msra.mxu1 %v7572_v43 }
 0x35c   : > { %2133 = vmatprep.subr.bf16.mxu1 %v7577_v44 }
 0x35f   : > { %2134 = vmatpush1.bf16.msra.mxu1 %v7575_v45 }
 0x360   : > { %2135 = vmatprep.subr.bf16.mxu1 %v7580_v47 }
 0x363   : > { %2136 = vmatpush1.bf16.msra.mxu1 %v7578_v48 }
 0x364   : > { %2137 = vmatprep.subr.bf16.mxu1 %v7583_v35 }
 0x367   : > { %2138 = vmatpush1.bf16.msra.mxu1 %v7581_v46 }
 0x368   : > { %2139 = vmatprep.subr.bf16.mxu1 %v7586_v49 }
 0x36b   : > { %2140 = vmatpush1.bf16.msra.mxu1 %v7584_v50 }
 0x36c   : > { %2141 = vmatprep.subr.bf16.mxu1 %v7589_v25 }
 0x36f   : > { %2142 = vmatpush1.bf16.msra.mxu1 %v7587_v60 }
 0x370   : > { %2143 = vmatprep.subr.bf16.mxu1 %v7592_v51 }
 0x373   : > { %2144 = vmatpush1.bf16.msra.mxu1 %v7590_v52  ;;  %v8932_v52 = vpack.c.bf16 %v8268_v30, %v8268_v30  ;;  %v8946_v30 = vpack.c.bf16 %v8237_v15, %v8237_v15  ;;  %v7652_v15 = vld [vmem:[%s10108_s3 + $0x124] ss:$8 sps:$4 sm:$0xff]  }
 0x374   : > { %2145 = vmatprep.subr.bf16.mxu1 %v7595_v53  ;;  %v7646_v53 = vld [vmem:[%s10108_s3 + $0x104] ss:$8 sps:$4 sm:$0xff]  }
 0x377   : > { %2146 = vmatpush1.bf16.msra.mxu1 %v7593_v54  ;;  %v7644_v54 = vld [vmem:[%s10108_s3 + $0x100] ss:$8 sps:$4 sm:$0xff]  }
 0x378   : > { %2402 = vmatprep.subr.bf16.mxu1 %v7598_v55  ;;  %v7649_v55 = vld [vmem:[%s10108_s3 + $0x114] ss:$8 sps:$4 sm:$0xff]  }
 0x37a   : > { %2148 = vmatmul.mubr.bf16.vlgmr.msra.gmra.mrb[20].mxu1 %v1920_v31  ;;  %v7605_v31 = vld [vmem:[%s10107_s2 + $0x330] ss:$8 sps:$4 sm:$0xff]  }
 0x37b   : > { %2403 = vmatpush1.bf16.msra.mxu1 %v7596_v56  ;;  %2434 = vmatprep.mubr.bf16.mxu1 %v2208_v2  ;;  %v7628_v2 = vld [vmem:[%s10107_s2 + $0x3a4] ss:$8 sps:$4 sm:$0xff]   ;;  %v7647_v56 = vld [vmem:[%s10108_s3 + $0x110] ss:$8 sps:$4 sm:$0xff]  }
 0x37c   : > { %2404 = vmatprep.subr.bf16.mxu1 %v7601_v58  ;;  %v7650_v58 = vld [vmem:[%s10108_s3 + $0x120] ss:$8 sps:$4 sm:$0xff]  }
 0x37f   : > { %2405 = vmatpush1.bf16.msra.mxu1 %v7599_v59  ;;  %v7655_v59 = vld [vmem:[%s10108_s3 + $0x134] ss:$8 sps:$4 sm:$0xff]  }
 0x380   : > { %2406 = vmatprep.subr.bf16.mxu1 %v7604_v61  ;;  %v7653_v61 = vld [vmem:[%s10108_s3 + $0x130] ss:$8 sps:$4 sm:$0xff]  }
 0x383   : > { %2407 = vmatpush1.bf16.msra.mxu1 %v7602_v27  ;;  %v7658_v27 = vld [vmem:[%s10108_s3 + $0x144] ss:$8 sps:$4 sm:$0xff]  }
 0x384   : > { %2408 = vmatprep.subr.bf16.mxu1 %v7607_v29  ;;  %v7656_v29 = vld [vmem:[%s10108_s3 + $0x140] ss:$8 sps:$4 sm:$0xff]  }
 0x387   : > { %2409 = vmatpush1.bf16.msra.mxu1 %v7605_v31  ;;  %v7661_v31 = vld [vmem:[%s10108_s3 + $0x154] ss:$8 sps:$4 sm:$0xff]  }
 0x388   : > { %2410 = vmatprep.subr.bf16.mxu1 %v7610_v62  ;;  %v7659_v62 = vld [vmem:[%s10108_s3 + $0x150] ss:$8 sps:$4 sm:$0xff]  }
 0x38b   : > { %2411 = vmatpush1.bf16.msra.mxu1 %v7608_v0  ;;  %v7664_v0 = vld [vmem:[%s10108_s3 + $0x164] ss:$8 sps:$4 sm:$0xff]  }
 0x38c   : > { %2412 = vmatprep.subr.bf16.mxu1 %v7613_v4  ;;  %v7662_v4 = vld [vmem:[%s10108_s3 + $0x160] ss:$8 sps:$4 sm:$0xff]  }
 0x38f   : > { %2413 = vmatpush1.bf16.msra.mxu1 %v7611_v3  ;;  %v7667_v3 = vld [vmem:[%s10108_s3 + $0x174] ss:$8 sps:$4 sm:$0xff]  }
 0x390   : > { %2414 = vmatprep.subr.bf16.mxu1 %v7616_v5  ;;  %v7665_v5 = vld [vmem:[%s10108_s3 + $0x170] ss:$8 sps:$4 sm:$0xff]  }
 0x393   : > { %2415 = vmatpush1.bf16.msra.mxu1 %v7614_v7  ;;  %v7670_v7 = vld [vmem:[%s10108_s3 + $0x184] ss:$8 sps:$4 sm:$0xff]  }
 0x394   : > { %2416 = vmatprep.subr.bf16.mxu1 %v7619_v8  ;;  %v7668_v8 = vld [vmem:[%s10108_s3 + $0x180] ss:$8 sps:$4 sm:$0xff]  }
 0x397   : > { %2417 = vmatpush1.bf16.msra.mxu1 %v7617_v9  ;;  %v7673_v9 = vld [vmem:[%s10108_s3 + $0x194] ss:$8 sps:$4 sm:$0xff]  }
 0x398   : > { %2418 = vmatprep.subr.bf16.mxu1 %v7622_v11  ;;  %v7671_v11 = vld [vmem:[%s10108_s3 + $0x190] ss:$8 sps:$4 sm:$0xff]  }
 0x39b   : > { %2419 = vmatpush1.bf16.msra.mxu1 %v7620_v12  ;;  %v7676_v12 = vld [vmem:[%s10108_s3 + $0x1a4] ss:$8 sps:$4 sm:$0xff]  }
 0x39c   : > { %2420 = vmatprep.subr.bf16.mxu1 %v7625_v17  ;;  %v7674_v17 = vld [vmem:[%s10108_s3 + $0x1a0] ss:$8 sps:$4 sm:$0xff]  }
 0x39f   : > { %2421 = vmatpush1.bf16.msra.mxu1 %v7623_v18  ;;  %v7679_v18 = vld [vmem:[%s10108_s3 + $0x1b4] ss:$8 sps:$4 sm:$0xff]  }
 0x3a0   : > { %2422 = vmatprep.subr.bf16.mxu1 %v7628_v2  ;;  %v7677_v2 = vld [vmem:[%s10108_s3 + $0x1b0] ss:$8 sps:$4 sm:$0xff]  }
 0x3a3   : > { %2423 = vmatpush1.bf16.msra.mxu1 %v7626_v19  ;;  %v7682_v19 = vld [vmem:[%s10108_s3 + $0x1c4] ss:$8 sps:$4 sm:$0xff]  }
 0x3a4   : > { %2424 = vmatprep.subr.bf16.mxu1 %v7631_v21  ;;  %v7680_v21 = vld [vmem:[%s10108_s3 + $0x1c0] ss:$8 sps:$4 sm:$0xff]  }
 0x3a7   : > { %2425 = vmatpush1.bf16.msra.mxu1 %v7629_v24  ;;  %v7685_v24 = vld [vmem:[%s10108_s3 + $0x1d4] ss:$8 sps:$4 sm:$0xff]  }
 0x3a8   : > { %2426 = vmatprep.subr.bf16.mxu1 %v7634_v26  ;;  %v7683_v26 = vld [vmem:[%s10108_s3 + $0x1d0] ss:$8 sps:$4 sm:$0xff]  }
 0x3ab   : > { %2427 = vmatpush1.bf16.msra.mxu1 %v7632_v32  ;;  %v7688_v32 = vld [vmem:[%s10108_s3 + $0x1e4] ss:$8 sps:$4 sm:$0xff]  }
 0x3ac   : > { %2428 = vmatprep.subr.bf16.mxu1 %v7637_v20  ;;  %v7686_v20 = vld [vmem:[%s10108_s3 + $0x1e0] ss:$8 sps:$4 sm:$0xff]  }
 0x3af   : > { %2429 = vmatpush1.bf16.msra.mxu1 %v7635_v22  ;;  %v7691_v22 = vld [vmem:[%s10108_s3 + $0x1f4] ss:$8 sps:$4 sm:$0xff]  }
 0x3b0   : > { %2430 = vmatprep.subr.bf16.mxu1 %v7640_v23  ;;  %v7689_v23 = vld [vmem:[%s10108_s3 + $0x1f0] ss:$8 sps:$4 sm:$0xff]  }
 0x3b3   : > { %2431 = vmatpush1.bf16.msra.mxu1 %v7638_v28  ;;  %v7694_v28 = vld [vmem:[%s10108_s3 + $0x4] ss:$8 sps:$4 sm:$0xff]  }
 0x3b4   : > { %2432 = vmatprep.subr.bf16.mxu1 %v7643_v33 }
 0x3b7   : > { %2433 = vmatpush1.bf16.msra.mxu1 %v7641_v34 }
 0x3ba   : > { %2435 = vmatmul.mubr.bf16.vlgmr.msra.gmra.mrb[20].mxu1 %v2207_v16 }
 0x48d   : > { %v2436_v39 = vpop.f32.mrb[20].mxu1 }
 0x48e   : > { %v2461_v40 = vadd.f32 %v2454_v37, %v2436_v39  ;;  %v2438_v42 = vpop.f32.mrb[21].mxu1 }
 0x48f   : > { %v2462_v43 = vadd.f32 %v2458_v38, %v2438_v42  ;;  %v2440_v44 = vpop.f32.mrb[22].mxu1 }
 0x490   : > { %v2469_v45 = vmul.f32 0.2, %v2461_v40  ;;  %v2463_v47 = vadd.f32 %v2454_v37, %v2440_v44  ;;  %v2442_v48 = vpop.f32.mrb[23].mxu1  ;;  %vm2465_vm11 = vcmp.ge.f32.partialorder %v2461_v40, 0.0 }
 0x491   : > { %v2470_v35 = vmul.f32 0.2, %v2462_v43  ;;  %v2464_v10 = vadd.f32 %v2458_v38, %v2442_v48  ;;  %vm2466_vm12 = vcmp.ge.f32.partialorder %v2462_v43, 0.0 }
 0x492   : > { %vm2467_vm13 = vcmp.ge.f32.partialorder %v2463_v47, 0.0  ;;  %v2471_v13 = vmul.f32 0.2, %v2463_v47  ;;  %v2473_v46 = vsel %vm2465_vm11, %v2461_v40, %v2469_v45  ;;  %vm5658_vm11 = vcmask 1040384  }
 0x493   : > { %vm2468_vm14 = vcmp.ge.f32.partialorder %v2464_v10, 0.0  ;;  %v2472_v16 = vmul.f32 0.2, %v2464_v10  ;;  %v2474_v50 = vsel %vm2466_vm12, %v2462_v43, %v2470_v35  ;;  %v7692_v43 = vld [vmem:[%s10108_s3] ss:$8 sps:$4 sm:$0xff]   ;;  %vm5655_vm12 = vcmask 15360  }
 0x494   : > { %v2475_v49 = vsel %vm2467_vm13, %v2463_v47, %v2471_v13  ;;  %v7697_v47 = vld [vmem:[%s10108_s3 + $0x14] ss:$8 sps:$4 sm:$0xff]   ;;  %v7695_v35 = vld [vmem:[%s10108_s3 + $0x10] ss:$8 sps:$4 sm:$0xff]   ;;  %v7698_v13 = vld [vmem:[%s10108_s3 + $0x20] ss:$8 sps:$4 sm:$0xff]  }
 0x495   : > { %v8926_v25 = vpack.c.bf16 %v2475_v49, %v2473_v46  ;;  %v2476_v60 = vsel %vm2468_vm14, %v2464_v10, %v2472_v16  ;;  %v7700_v10 = vld [vmem:[%s10108_s3 + $0x24] ss:$8 sps:$4 sm:$0xff]   ;;  %v7703_v16 = vld [vmem:[%s10108_s3 + $0x34] ss:$8 sps:$4 sm:$0xff]   ;;  %v7701_v46 = vld [vmem:[%s10108_s3 + $0x30] ss:$8 sps:$4 sm:$0xff]  }
 0x496   : > { %v8928_v51 = vpack.c.bf16 %v2476_v60, %v2474_v50  ;;  %v7706_v49 = vld [vmem:[%s10108_s3 + $0x44] ss:$8 sps:$4 sm:$0xff]   ;;  %v7704_v50 = vld [vmem:[%s10108_s3 + $0x40] ss:$8 sps:$4 sm:$0xff]   ;;  %v7709_v60 = vld [vmem:[%s10108_s3 + $0x54] ss:$8 sps:$4 sm:$0xff]  }
 0x497   : > { %vm6039_vm14 = vcmask 0  }
 0x498   : > { %2484 = vmatprep.subr.bf16.mxu0 %v8928_v51 }
 0x499   : > { %2485 = vmatpush1.bf16.msra.mxu0 %v8926_v25 }
 0x49a   : > { %2563 = vmatprep.subr.bf16.mxu0 %v8928_v51 }
 0x49c   : > { %6411 = vmatmul.mubr.msk.bf16.vlgmr.msra.gmra.mrb[20].mxu0 %vm2480_vm15, %v8932_v52 }
 0x49d   : > { %2564 = vmatpush1.bf16.msra.mxu0 %v8926_v25  ;;  %2595 = vmatprep.mubr.bf16.mxu0 %v8121_v6 }
 0x49e   : > { %2799 = vmatprep.subr.bf16.mxu0 %v7646_v53  ;;  %v7707_v53 = vld [vmem:[%s10108_s3 + $0x50] ss:$8 sps:$4 sm:$0xff]  }
 0x4a4   : > { %6412 = vmatmul.mubr.msk.bf16.vlgmr.msra.gmra.mrb[24].mxu0 %vm2480_vm15, %v8946_v30 }
 0x4a5   : > { %2800 = vmatpush1.bf16.msra.mxu0 %v7644_v54  ;;  %v7712_v54 = vld [vmem:[%s10108_s3 + $0x64] ss:$8 sps:$4 sm:$0xff]  }
 0x4a6   : > { %2801 = vmatprep.subr.bf16.mxu0 %v7649_v55  ;;  %v7710_v55 = vld [vmem:[%s10108_s3 + $0x60] ss:$8 sps:$4 sm:$0xff]  }
 0x4a9   : > { %2802 = vmatpush1.bf16.msra.mxu0 %v7647_v56  ;;  %v7715_v56 = vld [vmem:[%s10108_s3 + $0x74] ss:$8 sps:$4 sm:$0xff]  }
 0x4aa   : > { %2803 = vmatprep.subr.bf16.mxu0 %v7652_v15  ;;  %v7713_v15 = vld [vmem:[%s10108_s3 + $0x70] ss:$8 sps:$4 sm:$0xff]  }
 0x4ad   : > { %2804 = vmatpush1.bf16.msra.mxu0 %v7650_v58  ;;  %v7718_v58 = vld [vmem:[%s10108_s3 + $0x84] ss:$8 sps:$4 sm:$0xff]  }
 0x4ae   : > { %2805 = vmatprep.subr.bf16.mxu0 %v7655_v59  ;;  %v7716_v59 = vld [vmem:[%s10108_s3 + $0x80] ss:$8 sps:$4 sm:$0xff]  }
 0x4b1   : > { %2806 = vmatpush1.bf16.msra.mxu0 %v7653_v61  ;;  %v7721_v61 = vld [vmem:[%s10108_s3 + $0x94] ss:$8 sps:$4 sm:$0xff]  }
 0x4b2   : > { %2807 = vmatprep.subr.bf16.mxu0 %v7658_v27  ;;  %v7719_v27 = vld [vmem:[%s10108_s3 + $0x90] ss:$8 sps:$4 sm:$0xff]  }
 0x4b5   : > { %2808 = vmatpush1.bf16.msra.mxu0 %v7656_v29  ;;  %v7724_v29 = vld [vmem:[%s10108_s3 + $0xa4] ss:$8 sps:$4 sm:$0xff]  }
 0x4b6   : > { %2809 = vmatprep.subr.bf16.mxu0 %v7661_v31  ;;  %v7722_v31 = vld [vmem:[%s10108_s3 + $0xa0] ss:$8 sps:$4 sm:$0xff]  }
 0x4b9   : > { %2810 = vmatpush1.bf16.msra.mxu0 %v7659_v62  ;;  %v7727_v62 = vld [vmem:[%s10108_s3 + $0xb4] ss:$8 sps:$4 sm:$0xff]  }
 0x4ba   : > { %2811 = vmatprep.subr.bf16.mxu0 %v7664_v0  ;;  %v7725_v0 = vld [vmem:[%s10108_s3 + $0xb0] ss:$8 sps:$4 sm:$0xff]  }
 0x4bd   : > { %2812 = vmatpush1.bf16.msra.mxu0 %v7662_v4  ;;  %v7730_v4 = vld [vmem:[%s10108_s3 + $0xc4] ss:$8 sps:$4 sm:$0xff]  }
 0x4be   : > { %2813 = vmatprep.subr.bf16.mxu0 %v7667_v3  ;;  %v7728_v3 = vld [vmem:[%s10108_s3 + $0xc0] ss:$8 sps:$4 sm:$0xff]  }
 0x4c1   : > { %2814 = vmatpush1.bf16.msra.mxu0 %v7665_v5  ;;  %v7733_v5 = vld [vmem:[%s10108_s3 + $0xd4] ss:$8 sps:$4 sm:$0xff]  }
 0x4c2   : > { %2815 = vmatprep.subr.bf16.mxu0 %v7670_v7  ;;  %v7731_v7 = vld [vmem:[%s10108_s3 + $0xd0] ss:$8 sps:$4 sm:$0xff]  }
 0x4c5   : > { %2816 = vmatpush1.bf16.msra.mxu0 %v7668_v8  ;;  %v7736_v8 = vld [vmem:[%s10108_s3 + $0xe4] ss:$8 sps:$4 sm:$0xff]  }
 0x4c6   : > { %2817 = vmatprep.subr.bf16.mxu0 %v7673_v9  ;;  %v7734_v9 = vld [vmem:[%s10108_s3 + $0xe0] ss:$8 sps:$4 sm:$0xff]  }
 0x4c9   : > { %2818 = vmatpush1.bf16.msra.mxu0 %v7671_v11  ;;  %v7739_v11 = vld [vmem:[%s10108_s3 + $0xf4] ss:$8 sps:$4 sm:$0xff]  }
 0x4ca   : > { %2819 = vmatprep.subr.bf16.mxu0 %v7676_v12  ;;  %v7737_v12 = vld [vmem:[%s10108_s3 + $0xf0] ss:$8 sps:$4 sm:$0xff]  }
 0x4cd   : > { %2820 = vmatpush1.bf16.msra.mxu0 %v7674_v17 }
 0x4ce   : > { %2821 = vmatprep.subr.bf16.mxu0 %v7679_v18  ;;  %v7742_v18 = vld [vmem:[%s10108_s3 + $0x204] ss:$8 sps:$4 sm:$0xff]  }
 0x4d1   : > { %2822 = vmatpush1.bf16.msra.mxu0 %v7677_v2  ;;  %v9151_v2 = vpack.c.bf16 %v8304_v41, %v8304_v41  ;;  %v7748_v41 = vld [vmem:[%s10108_s3 + $0x224] ss:$8 sps:$4 sm:$0xff]  }
 0x4d2   : > { %2823 = vmatprep.subr.bf16.mxu0 %v7682_v19  ;;  %v7740_v19 = vld [vmem:[%s10108_s3 + $0x200] ss:$8 sps:$4 sm:$0xff]  }
 0x4d5   : > { %2824 = vmatpush1.bf16.msra.mxu0 %v7680_v21  ;;  %v7745_v21 = vld [vmem:[%s10108_s3 + $0x214] ss:$8 sps:$4 sm:$0xff]  }
 0x4d6   : > { %2825 = vmatprep.subr.bf16.mxu0 %v7685_v24  ;;  %v7743_v24 = vld [vmem:[%s10108_s3 + $0x210] ss:$8 sps:$4 sm:$0xff]  }
 0x4d9   : > { %2826 = vmatpush1.bf16.msra.mxu0 %v7683_v26  ;;  %v7746_v26 = vld [vmem:[%s10108_s3 + $0x220] ss:$8 sps:$4 sm:$0xff]  }
 0x4da   : > { %2827 = vmatprep.subr.bf16.mxu0 %v7688_v32  ;;  %v7751_v32 = vld [vmem:[%s10108_s3 + $0x234] ss:$8 sps:$4 sm:$0xff]  }
 0x4dd   : > { %2828 = vmatpush1.bf16.msra.mxu0 %v7686_v20  ;;  %v7749_v20 = vld [vmem:[%s10108_s3 + $0x230] ss:$8 sps:$4 sm:$0xff]  }
 0x4de   : > { %2829 = vmatprep.subr.bf16.mxu0 %v7691_v22  ;;  %v7754_v22 = vld [vmem:[%s10108_s3 + $0x244] ss:$8 sps:$4 sm:$0xff]  }
 0x4e1   : > { %2830 = vmatpush1.bf16.msra.mxu0 %v7689_v23  ;;  %v7752_v23 = vld [vmem:[%s10108_s3 + $0x240] ss:$8 sps:$4 sm:$0xff]  }
 0x4e2   : > { %3000 = vmatprep.subr.bf16.mxu0 %v7694_v28  ;;  %v7757_v28 = vld [vmem:[%s10108_s3 + $0x254] ss:$8 sps:$4 sm:$0xff]  }
 0x56f   : > { %v9046_v33 = vpop.f32.mrb[20].mxu0 }
 0x570   : > { %v2520_v34 = vpop.f32.mrb[21].mxu0  ;;  %v2525_v17 = vpack.c.bf16 %v9046_v33, %v9046_v33  ;;  %v7755_v33 = vld [vmem:[%s10108_s3 + $0x250] ss:$8 sps:$4 sm:$0xff]  }
 0x571   : > { %v2522_v36 = vpop.f32.mrb[22].mxu0  ;;  %v2526_v48 = vpack.c.bf16 %v2520_v34, %v2520_v34  ;;  %v7760_v34 = vld [vmem:[%s10108_s3 + $0x264] ss:$8 sps:$4 sm:$0xff]  }
 0x572   : > { %v2523_v37 = vpop.f32.mrb[23].mxu0  ;;  %v7758_v36 = vld [vmem:[%s10108_s3 + $0x260] ss:$8 sps:$4 sm:$0xff]  }
 0x573   : > { %v7763_v37 = vld [vmem:[%s10108_s3 + $0x274] ss:$8 sps:$4 sm:$0xff]  }
 0x577   : > { %v2597_v38 = vpop.f32.mrb[24].mxu0 }
 0x578   : > { %v2599_v39 = vpop.f32.mrb[25].mxu0  ;;  %v2604_v44 = vpack.c.bf16 %v2597_v38, %v2597_v38  ;;  %v7761_v38 = vld [vmem:[%s10108_s3 + $0x270] ss:$8 sps:$4 sm:$0xff]  }
 0x579   : > { %v2605_v40 = vpack.c.bf16 %v2599_v39, %v2599_v39  ;;  %v2601_v42 = vpop.f32.mrb[26].mxu0  ;;  %v7766_v39 = vld [vmem:[%s10108_s3 + $0x284] ss:$8 sps:$4 sm:$0xff]  }
 0x57a   : > { %v2602_v45 = vpop.f32.mrb[27].mxu0  ;;  %v7769_v42 = vld [vmem:[%s10108_s3 + $0x294] ss:$8 sps:$4 sm:$0xff]  }
 0x57b   : > { %2831 = vmatprep.mubr.bf16.mxu0 %v2605_v40  ;;  %v7764_v40 = vld [vmem:[%s10108_s3 + $0x280] ss:$8 sps:$4 sm:$0xff]  }
 0x57c   : > { %2832 = vmatmul.mubr.bf16.vlgmr.msra.gmra.mrb[28].mxu0 %v2604_v44  ;;  %v7772_v44 = vld [vmem:[%s10108_s3 + $0x2a4] ss:$8 sps:$4 sm:$0xff]   ;;  %v7770_v45 = vld [vmem:[%s10108_s3 + $0x2a0] ss:$8 sps:$4 sm:$0xff]  }
 0x57d   : > { %3001 = vmatpush1.bf16.msra.mxu0 %v7692_v43  ;;  %3032 = vmatprep.mubr.bf16.mxu0 %v2526_v48  ;;  %v7767_v43 = vld [vmem:[%s10108_s3 + $0x290] ss:$8 sps:$4 sm:$0xff]  }
 0x57e   : > { %3002 = vmatprep.subr.bf16.mxu0 %v7697_v47  ;;  %v7775_v47 = vld [vmem:[%s10108_s3 + $0x2b4] ss:$8 sps:$4 sm:$0xff]   ;;  %v7773_v48 = vld [vmem:[%s10108_s3 + $0x2b0] ss:$8 sps:$4 sm:$0xff]  }
 0x581   : > { %3003 = vmatpush1.bf16.msra.mxu0 %v7695_v35  ;;  %v7778_v35 = vld [vmem:[%s10108_s3 + $0x2c4] ss:$8 sps:$4 sm:$0xff]  }
 0x582   : > { %3004 = vmatprep.subr.bf16.mxu0 %v7700_v10  ;;  %v7776_v10 = vld [vmem:[%s10108_s3 + $0x2c0] ss:$8 sps:$4 sm:$0xff]  }
 0x585   : > { %3005 = vmatpush1.bf16.msra.mxu0 %v7698_v13  ;;  %v7781_v13 = vld [vmem:[%s10108_s3 + $0x2d4] ss:$8 sps:$4 sm:$0xff]  }
 0x586   : > { %3006 = vmatprep.subr.bf16.mxu0 %v7703_v16  ;;  %v7779_v16 = vld [vmem:[%s10108_s3 + $0x2d0] ss:$8 sps:$4 sm:$0xff]  }
 0x589   : > { %3007 = vmatpush1.bf16.msra.mxu0 %v7701_v46  ;;  %v7784_v46 = vld [vmem:[%s10108_s3 + $0x2e4] ss:$8 sps:$4 sm:$0xff]  }
 0x58a   : > { %3008 = vmatprep.subr.bf16.mxu0 %v7706_v49  ;;  %v7782_v49 = vld [vmem:[%s10108_s3 + $0x2e0] ss:$8 sps:$4 sm:$0xff]  }
 0x58d   : > { %3009 = vmatpush1.bf16.msra.mxu0 %v7704_v50  ;;  %v7787_v50 = vld [vmem:[%s10108_s3 + $0x2f4] ss:$8 sps:$4 sm:$0xff]  }
 0x58e   : > { %3010 = vmatprep.subr.bf16.mxu0 %v7709_v60  ;;  %v7785_v60 = vld [vmem:[%s10108_s3 + $0x2f0] ss:$8 sps:$4 sm:$0xff]  }
 0x591   : > { %3011 = vmatpush1.bf16.msra.mxu0 %v7707_v53  ;;  %v7788_v53 = vld [vmem:[%s10108_s3 + $0x300] ss:$8 sps:$4 sm:$0xff]  }
 0x592   : > { %3012 = vmatprep.subr.bf16.mxu0 %v7712_v54  ;;  %v7790_v54 = vld [vmem:[%s10108_s3 + $0x304] ss:$8 sps:$4 sm:$0xff]  }
 0x593   : > { %3564 = vmatprep.subr.bf16.mxu1 %v7790_v54 }
 0x594   : > { %3565 = vmatpush1.bf16.msra.mxu1 %v7788_v53 }
 0x595   : > { %3013 = vmatpush1.bf16.msra.mxu0 %v7710_v55  ;;  %v7793_v55 = vld [vmem:[%s10108_s3 + $0x314] ss:$8 sps:$4 sm:$0xff]  }
 0x596   : > { %3014 = vmatprep.subr.bf16.mxu0 %v7715_v56  ;;  %v7791_v56 = vld [vmem:[%s10108_s3 + $0x310] ss:$8 sps:$4 sm:$0xff]   ;;  %3566 = vmatprep.subr.bf16.mxu1 %v7793_v55 }
 0x598   : > { %3567 = vmatpush1.bf16.msra.mxu1 %v7791_v56  ;;  %v7836_v56 = vld [vmem:[%s10109_s4] ss:$8 sps:$4 sm:$0xff]  }
 0x599   : > { %3015 = vmatpush1.bf16.msra.mxu0 %v7713_v15  ;;  %v7794_v15 = vld [vmem:[%s10108_s3 + $0x320] ss:$8 sps:$4 sm:$0xff]  }
 0x59a   : > { %3016 = vmatprep.subr.bf16.mxu0 %v7718_v58  ;;  %v7799_v58 = vld [vmem:[%s10108_s3 + $0x334] ss:$8 sps:$4 sm:$0xff]  }
 0x59d   : > { %3017 = vmatpush1.bf16.msra.mxu0 %v7716_v59  ;;  %v7797_v59 = vld [vmem:[%s10108_s3 + $0x330] ss:$8 sps:$4 sm:$0xff]  }
 0x59e   : > { %3018 = vmatprep.subr.bf16.mxu0 %v7721_v61  ;;  %v7802_v61 = vld [vmem:[%s10108_s3 + $0x344] ss:$8 sps:$4 sm:$0xff]  }
 0x5a1   : > { %3019 = vmatpush1.bf16.msra.mxu0 %v7719_v27  ;;  %v7800_v27 = vld [vmem:[%s10108_s3 + $0x340] ss:$8 sps:$4 sm:$0xff]  }
 0x5a2   : > { %3020 = vmatprep.subr.bf16.mxu0 %v7724_v29  ;;  %v7805_v29 = vld [vmem:[%s10108_s3 + $0x354] ss:$8 sps:$4 sm:$0xff]  }
 0x5a5   : > { %3021 = vmatpush1.bf16.msra.mxu0 %v7722_v31  ;;  %v7803_v31 = vld [vmem:[%s10108_s3 + $0x350] ss:$8 sps:$4 sm:$0xff]  }
 0x5a6   : > { %3022 = vmatprep.subr.bf16.mxu0 %v7727_v62  ;;  %v7808_v62 = vld [vmem:[%s10108_s3 + $0x364] ss:$8 sps:$4 sm:$0xff]  }
 0x5a9   : > { %3023 = vmatpush1.bf16.msra.mxu0 %v7725_v0  ;;  %v7806_v0 = vld [vmem:[%s10108_s3 + $0x360] ss:$8 sps:$4 sm:$0xff]  }
 0x5aa   : > { %3024 = vmatprep.subr.bf16.mxu0 %v7730_v4  ;;  %v7811_v4 = vld [vmem:[%s10108_s3 + $0x374] ss:$8 sps:$4 sm:$0xff]  }
 0x5ad   : > { %3025 = vmatpush1.bf16.msra.mxu0 %v7728_v3  ;;  %v7809_v3 = vld [vmem:[%s10108_s3 + $0x370] ss:$8 sps:$4 sm:$0xff]  }
 0x5ae   : > { %3026 = vmatprep.subr.bf16.mxu0 %v7733_v5  ;;  %v7814_v5 = vld [vmem:[%s10108_s3 + $0x384] ss:$8 sps:$4 sm:$0xff]  }
 0x5b1   : > { %3027 = vmatpush1.bf16.msra.mxu0 %v7731_v7  ;;  %v7812_v7 = vld [vmem:[%s10108_s3 + $0x380] ss:$8 sps:$4 sm:$0xff]  }
 0x5b2   : > { %3028 = vmatprep.subr.bf16.mxu0 %v7736_v8  ;;  %v7817_v8 = vld [vmem:[%s10108_s3 + $0x394] ss:$8 sps:$4 sm:$0xff]  }
 0x5b5   : > { %3029 = vmatpush1.bf16.msra.mxu0 %v7734_v9  ;;  %v7815_v9 = vld [vmem:[%s10108_s3 + $0x390] ss:$8 sps:$4 sm:$0xff]  }
 0x5b6   : > { %3030 = vmatprep.subr.bf16.mxu0 %v7739_v11  ;;  %v7820_v11 = vld [vmem:[%s10108_s3 + $0x3a4] ss:$8 sps:$4 sm:$0xff]  }
 0x5b9   : > { %3031 = vmatpush1.bf16.msra.mxu0 %v7737_v12  ;;  %v7818_v12 = vld [vmem:[%s10108_s3 + $0x3a0] ss:$8 sps:$4 sm:$0xff]  }
 0x5ba   : > { %3045 = vmatprep.subr.bf16.mxu0 %v8928_v51 }
 0x5bc   : > { %3033 = vmatmul.mubr.bf16.vlgmr.msra.gmra.mrb[32].mxu0 %v2525_v17  ;;  %v7823_v17 = vld [vmem:[%s10108_s3 + $0x3b4] ss:$8 sps:$4 sm:$0xff]  }
 0x5bd   : > { %3046 = vmatpush1.bf16.msra.mxu0 %v8926_v25  ;;  %3077 = vmatprep.mubr.bf16.mxu0 %v8121_v6 }
 0x5be   : > { %3281 = vmatprep.subr.bf16.mxu0 %v7742_v18 }
 0x5c4   : > { %6509 = vmatmul.mubr.msk.bf16.vlgmr.msra.gmra.mrb[36].mxu0 %vm2480_vm15, %v9151_v2 }
 0x5c5   : > { %3282 = vmatpush1.bf16.msra.mxu0 %v7740_v19  ;;  %v7821_v19 = vld [vmem:[%s10108_s3 + $0x3b0] ss:$8 sps:$4 sm:$0xff]  }
 0x5c6   : > { %3283 = vmatprep.subr.bf16.mxu0 %v7745_v21 }
 0x5c9   : > { %3284 = vmatpush1.bf16.msra.mxu0 %v7743_v24  ;;  %v7826_v24 = vld [vmem:[%s10108_s3 + $0x3c4] ss:$8 sps:$4 sm:$0xff]  }
 0x5ca   : > { %3285 = vmatprep.subr.bf16.mxu0 %v7748_v41 }
 0x5cd   : > { %3286 = vmatpush1.bf16.msra.mxu0 %v7746_v26 }
 0x5ce   : > { %3287 = vmatprep.subr.bf16.mxu0 %v7751_v32  ;;  %v7824_v32 = vld [vmem:[%s10108_s3 + $0x3c0] ss:$8 sps:$4 sm:$0xff]  }
 0x5d1   : > { %3288 = vmatpush1.bf16.msra.mxu0 %v7749_v20 }
 0x5d2   : > { %3289 = vmatprep.subr.bf16.mxu0 %v7754_v22 }
 0x5d5   : > { %3290 = vmatpush1.bf16.msra.mxu0 %v7752_v23 }
 0x5d6   : > { %3291 = vmatprep.subr.bf16.mxu0 %v7757_v28 }
 0x5d9   : > { %3292 = vmatpush1.bf16.msra.mxu0 %v7755_v33 }
 0x5da   : > { %3293 = vmatprep.subr.bf16.mxu0 %v7760_v34 }
 0x5dd   : > { %3294 = vmatpush1.bf16.msra.mxu0 %v7758_v36 }
 0x5de   : > { %3295 = vmatprep.subr.bf16.mxu0 %v7763_v37 }
 0x5e1   : > { %3296 = vmatpush1.bf16.msra.mxu0 %v7761_v38 }
 0x5e2   : > { %3297 = vmatprep.subr.bf16.mxu0 %v7766_v39 }
 0x5e5   : > { %3298 = vmatpush1.bf16.msra.mxu0 %v7764_v40 }
 0x5e6   : > { %3299 = vmatprep.subr.bf16.mxu0 %v7769_v42 }
 0x5e9   : > { %3300 = vmatpush1.bf16.msra.mxu0 %v7767_v43  ;;  %v9331_v43 = vpack.c.bf16 %v8349_v57, %v8349_v57  ;;  %v7830_v57 = vld [vmem:[%s10108_s3 + $0x3e0] ss:$8 sps:$4 sm:$0xff]  }
 0x5ea   : > { %3301 = vmatprep.subr.bf16.mxu0 %v7772_v44  ;;  %v7829_v44 = vld [vmem:[%s10108_s3 + $0x3d4] ss:$8 sps:$4 sm:$0xff]  }
 0x5ed   : > { %3302 = vmatpush1.bf16.msra.mxu0 %v7770_v45  ;;  %v7827_v45 = vld [vmem:[%s10108_s3 + $0x3d0] ss:$8 sps:$4 sm:$0xff]  }
 0x5ee   : > { %3303 = vmatprep.subr.bf16.mxu0 %v7775_v47  ;;  %v7835_v47 = vld [vmem:[%s10108_s3 + $0x3f4] ss:$8 sps:$4 sm:$0xff]  }
 0x5f1   : > { %3304 = vmatpush1.bf16.msra.mxu0 %v7773_v48  ;;  %v7833_v48 = vld [vmem:[%s10108_s3 + $0x3f0] ss:$8 sps:$4 sm:$0xff]  }
 0x5f2   : > { %3305 = vmatprep.subr.bf16.mxu0 %v7778_v35  ;;  %v7838_v35 = vld [vmem:[%s10109_s4 + $0x4] ss:$8 sps:$4 sm:$0xff]  }
 0x5f5   : > { %3306 = vmatpush1.bf16.msra.mxu0 %v7776_v10 }
 0x5f6   : > { %3307 = vmatprep.subr.bf16.mxu0 %v7781_v13 }
 0x5f9   : > { %3308 = vmatpush1.bf16.msra.mxu0 %v7779_v16 }
 0x5fa   : > { %3309 = vmatprep.subr.bf16.mxu0 %v7784_v46 }
 0x5fd   : > { %3310 = vmatpush1.bf16.msra.mxu0 %v7782_v49 }
 0x5fe   : > { %3311 = vmatprep.subr.bf16.mxu0 %v7787_v50 }
 0x601   : > { %3312 = vmatpush1.bf16.msra.mxu0 %v7785_v60 }
 0x602   : > { %3328 = vmatprep.subr.bf16.mxu0 %v8928_v51  ;;  %v7796_v51 = vld [vmem:[%s10108_s3 + $0x324] ss:$8 sps:$4 sm:$0xff]  }
 0x603   : > { %3568 = vmatprep.subr.bf16.mxu1 %v7796_v51 }
 0x604   : > { %3569 = vmatpush1.bf16.msra.mxu1 %v7794_v15 }
 0x605   : > { %3570 = vmatprep.subr.bf16.mxu1 %v7799_v58  ;;  %v7841_v58 = vld [vmem:[%s10109_s4 + $0x14] ss:$8 sps:$4 sm:$0xff]  }
 0x608   : > { %3571 = vmatpush1.bf16.msra.mxu1 %v7797_v59  ;;  %v7839_v59 = vld [vmem:[%s10109_s4 + $0x10] ss:$8 sps:$4 sm:$0xff]  }
 0x609   : > { %3572 = vmatprep.subr.bf16.mxu1 %v7802_v61  ;;  %v7844_v61 = vld [vmem:[%s10109_s4 + $0x24] ss:$8 sps:$4 sm:$0xff]  }
 0x60c   : > { %3573 = vmatpush1.bf16.msra.mxu1 %v7800_v27  ;;  %v7842_v27 = vld [vmem:[%s10109_s4 + $0x20] ss:$8 sps:$4 sm:$0xff]  }
 0x60d   : > { %3574 = vmatprep.subr.bf16.mxu1 %v7805_v29  ;;  %v7847_v29 = vld [vmem:[%s10109_s4 + $0x34] ss:$8 sps:$4 sm:$0xff]  }
 0x610   : > { %3575 = vmatpush1.bf16.msra.mxu1 %v7803_v31  ;;  %v7845_v31 = vld [vmem:[%s10109_s4 + $0x30] ss:$8 sps:$4 sm:$0xff]  }
 0x611   : > { %3576 = vmatprep.subr.bf16.mxu1 %v7808_v62  ;;  %v7850_v62 = vld [vmem:[%s10109_s4 + $0x44] ss:$8 sps:$4 sm:$0xff]  }
 0x614   : > { %3577 = vmatpush1.bf16.msra.mxu1 %v7806_v0  ;;  %v7848_v0 = vld [vmem:[%s10109_s4 + $0x40] ss:$8 sps:$4 sm:$0xff]  }
 0x615   : > { %3578 = vmatprep.subr.bf16.mxu1 %v7811_v4  ;;  %v7853_v4 = vld [vmem:[%s10109_s4 + $0x54] ss:$8 sps:$4 sm:$0xff]  }
 0x618   : > { %3579 = vmatpush1.bf16.msra.mxu1 %v7809_v3  ;;  %v7851_v3 = vld [vmem:[%s10109_s4 + $0x50] ss:$8 sps:$4 sm:$0xff]  }
 0x619   : > { %3580 = vmatprep.subr.bf16.mxu1 %v7814_v5  ;;  %v7856_v5 = vld [vmem:[%s10109_s4 + $0x64] ss:$8 sps:$4 sm:$0xff]  }
 0x61c   : > { %3581 = vmatpush1.bf16.msra.mxu1 %v7812_v7  ;;  %v7854_v7 = vld [vmem:[%s10109_s4 + $0x60] ss:$8 sps:$4 sm:$0xff]  }
 0x61d   : > { %3582 = vmatprep.subr.bf16.mxu1 %v7817_v8  ;;  %v7859_v8 = vld [vmem:[%s10109_s4 + $0x74] ss:$8 sps:$4 sm:$0xff]  }
 0x620   : > { %3583 = vmatpush1.bf16.msra.mxu1 %v7815_v9  ;;  %v7857_v9 = vld [vmem:[%s10109_s4 + $0x70] ss:$8 sps:$4 sm:$0xff]  }
 0x621   : > { %3584 = vmatprep.subr.bf16.mxu1 %v7820_v11  ;;  %v7862_v11 = vld [vmem:[%s10109_s4 + $0x84] ss:$8 sps:$4 sm:$0xff]  }
 0x624   : > { %3585 = vmatpush1.bf16.msra.mxu1 %v7818_v12  ;;  %v7860_v12 = vld [vmem:[%s10109_s4 + $0x80] ss:$8 sps:$4 sm:$0xff]  }
 0x625   : > { %3586 = vmatprep.subr.bf16.mxu1 %v7823_v17  ;;  %v7865_v17 = vld [vmem:[%s10109_s4 + $0x94] ss:$8 sps:$4 sm:$0xff]  }
 0x628   : > { %3587 = vmatpush1.bf16.msra.mxu1 %v7821_v19  ;;  %v7868_v19 = vld [vmem:[%s10109_s4 + $0xa4] ss:$8 sps:$4 sm:$0xff]  }
 0x629   : > { %3588 = vmatprep.subr.bf16.mxu1 %v7826_v24  ;;  %v7871_v24 = vld [vmem:[%s10109_s4 + $0xb4] ss:$8 sps:$4 sm:$0xff]  }
 0x62c   : > { %3589 = vmatpush1.bf16.msra.mxu1 %v7824_v32  ;;  %v7872_v32 = vld [vmem:[%s10109_s4 + $0xc0] ss:$8 sps:$4 sm:$0xff]  }
 0x62d   : > { %3590 = vmatprep.subr.bf16.mxu1 %v7829_v44 }
 0x630   : > { %3591 = vmatpush1.bf16.msra.mxu1 %v7827_v45 }
 0x64f   : > { %v2833_v18 = vpop.f32.mrb[28].mxu0 }
 0x650   : > { %v2835_v21 = vpop.f32.mrb[29].mxu0 }
 0x651   : > { %v2837_v41 = vpop.f32.mrb[30].mxu0 }
 0x652   : > { %v2838_v26 = vpop.f32.mrb[31].mxu0  ;;  %v7869_v41 = vld [vmem:[%s10109_s4 + $0xb0] ss:$8 sps:$4 sm:$0xff]  }
 0x653   : > { %v7874_v26 = vld [vmem:[%s10109_s4 + $0xc4] ss:$8 sps:$4 sm:$0xff]  }
 0x68f   : > { %v3034_v20 = vpop.f32.mrb[32].mxu0 }
 0x690   : > { %v3035_v22 = vadd.f32 %v3034_v20, %v2833_v18  ;;  %v3036_v23 = vpop.f32.mrb[33].mxu0  ;;  %v7863_v18 = vld [vmem:[%s10109_s4 + $0x90] ss:$8 sps:$4 sm:$0xff]   ;;  %v7877_v20 = vld [vmem:[%s10109_s4 + $0xd4] ss:$8 sps:$4 sm:$0xff]  }
 0x691   : > { %v3037_v28 = vadd.f32 %v3036_v23, %v2835_v21  ;;  %v3038_v33 = vpop.f32.mrb[34].mxu0  ;;  %v7866_v21 = vld [vmem:[%s10109_s4 + $0xa0] ss:$8 sps:$4 sm:$0xff]   ;;  %v7880_v23 = vld [vmem:[%s10109_s4 + $0xe4] ss:$8 sps:$4 sm:$0xff]  }
 0x692   : > { %v3039_v34 = vpop.f32.mrb[35].mxu0  ;;  %v7883_v33 = vld [vmem:[%s10109_s4 + $0xf4] ss:$8 sps:$4 sm:$0xff]  }
 0x693   : > { %v7881_v34 = vld [vmem:[%s10109_s4 + $0xf0] ss:$8 sps:$4 sm:$0xff]  }
 0x697   : > { %v3079_v36 = vpop.f32.mrb[36].mxu0 }
 0x698   : > { %v3081_v37 = vpop.f32.mrb[37].mxu0  ;;  %v3086_v40 = vpack.c.bf16 %v3079_v36, %v3079_v36  ;;  %v3607_v36 = vld [vmem:[%s10115_s10] sm:$0x3] }
 0x699   : > { %v3087_v38 = vpack.c.bf16 %v3081_v37, %v3081_v37  ;;  %v3083_v39 = vpop.f32.mrb[38].mxu0  ;;  %v3612_v37 = vrot.slane %v3607_v36, %v8471_v63 }
 0x69a   : > { %v3084_v42 = vpop.f32.mrb[39].mxu0  ;;  %v3616_v39 = vrot.slane %v3607_v36, %v8477_v1  ;;  %v7934_v36 = vld [vmem:[%s10109_s4 + $0x304] ss:$8 sps:$4 sm:$0xff]  }
 0x69b   : > { %3313 = vmatprep.mubr.bf16.mxu0 %v3087_v38 }
 0x69c   : > { %3314 = vmatmul.mubr.bf16.vlgmr.msra.gmra.mrb[40].mxu0 %v3086_v40 }
 0x69d   : > { %3329 = vmatpush1.bf16.msra.mxu0 %v8926_v25  ;;  %3360 = vmatprep.mubr.bf16.mxu0 %v8121_v6  ;;  %v7832_v25 = vld [vmem:[%s10108_s3 + $0x3e4] ss:$8 sps:$4 sm:$0xff]  }
 0x69e   : > { %3592 = vmatprep.subr.bf16.mxu1 %v7832_v25 }
 0x69f   : > { %3593 = vmatpush1.bf16.msra.mxu1 %v7830_v57 }
 0x6a0   : > { %3594 = vmatprep.subr.bf16.mxu1 %v7835_v47 }
 0x6a3   : > { %3595 = vmatpush1.bf16.msra.mxu1 %v7833_v48 }
 0x6a4   : > { %6574 = vmatmul.mubr.msk.bf16.vlgmr.msra.gmra.mrb[44].mxu0 %vm2480_vm15, %v9331_v43  ;;  %4153 = vmatprep.subr.bf16.mxu1 %v7838_v35 }
 0x6a5   : > { %3671 = vmatprep.mubr.bf16.mxu0 %v8121_v6 }
 0x76f   : > { %v3315_v10 = vpop.f32.mrb[40].mxu0 }
 0x770   : > { %v9357_v13 = vadd.f32 %v3315_v10, %v3035_v22  ;;  %v3317_v16 = vpop.f32.mrb[41].mxu0  ;;  %v7875_v22 = vld [vmem:[%s10109_s4 + $0xd0] ss:$8 sps:$4 sm:$0xff]  }
 0x771   : > { %v9359_v46 = vadd.f32 %v3317_v16, %v3037_v28  ;;  %v3319_v49 = vpop.f32.mrb[42].mxu0  ;;  %v7878_v28 = vld [vmem:[%s10109_s4 + $0xe0] ss:$8 sps:$4 sm:$0xff]  }
 0x772   : > { %v3320_v50 = vpop.f32.mrb[43].mxu0 }
 0x777   : > { %v3362_v60 = vpop.f32.mrb[44].mxu0 }
 0x778   : > { %v3364_v53 = vpop.f32.mrb[45].mxu0  ;;  %v3369_v51 = vpack.c.bf16 %v3362_v60, %v3362_v60 }
 0x779   : > { %v3370_v54 = vpack.c.bf16 %v3364_v53, %v3364_v53  ;;  %v3366_v55 = vpop.f32.mrb[46].mxu0  ;;  %v7889_v53 = vld [vmem:[%s10109_s4 + $0x114] ss:$8 sps:$4 sm:$0xff]  }
 0x77a   : > { %v3367_v15 = vpop.f32.mrb[47].mxu0  ;;  %v7892_v55 = vld [vmem:[%s10109_s4 + $0x124] ss:$8 sps:$4 sm:$0xff]  }
 0x77b   : > { %3596 = vmatprep.mubr.bf16.mxu1 %v3370_v54  ;;  %v7887_v54 = vld [vmem:[%s10109_s4 + $0x110] ss:$8 sps:$4 sm:$0xff]  }
 0x77c   : > { %3597 = vmatmul.mubr.bf16.vlgmr.msra.gmra.mrb[24].mxu1 %v3369_v51  ;;  %v7895_v51 = vld [vmem:[%s10109_s4 + $0x134] ss:$8 sps:$4 sm:$0xff]   ;;  %v7893_v15 = vld [vmem:[%s10109_s4 + $0x130] ss:$8 sps:$4 sm:$0xff]  }
 0x77d   : > { %4154 = vmatpush1.bf16.msra.mxu1 %v7836_v56  ;;  %v7890_v56 = vld [vmem:[%s10109_s4 + $0x120] ss:$8 sps:$4 sm:$0xff]  }
 0x77e   : > { %4155 = vmatprep.subr.bf16.mxu1 %v7841_v58  ;;  %v7898_v58 = vld [vmem:[%s10109_s4 + $0x144] ss:$8 sps:$4 sm:$0xff]  }
 0x781   : > { %4156 = vmatpush1.bf16.msra.mxu1 %v7839_v59  ;;  %v7896_v59 = vld [vmem:[%s10109_s4 + $0x140] ss:$8 sps:$4 sm:$0xff]  }
 0x782   : > { %4157 = vmatprep.subr.bf16.mxu1 %v7844_v61  ;;  %v7901_v61 = vld [vmem:[%s10109_s4 + $0x154] ss:$8 sps:$4 sm:$0xff]  }
 0x785   : > { %4158 = vmatpush1.bf16.msra.mxu1 %v7842_v27  ;;  %v7899_v27 = vld [vmem:[%s10109_s4 + $0x150] ss:$8 sps:$4 sm:$0xff]  }
 0x786   : > { %4159 = vmatprep.subr.bf16.mxu1 %v7847_v29  ;;  %v7904_v29 = vld [vmem:[%s10109_s4 + $0x164] ss:$8 sps:$4 sm:$0xff]  }
 0x789   : > { %4160 = vmatpush1.bf16.msra.mxu1 %v7845_v31  ;;  %v7902_v31 = vld [vmem:[%s10109_s4 + $0x160] ss:$8 sps:$4 sm:$0xff]  }
 0x78a   : > { %4161 = vmatprep.subr.bf16.mxu1 %v7850_v62  ;;  %v7907_v62 = vld [vmem:[%s10109_s4 + $0x174] ss:$8 sps:$4 sm:$0xff]  }
 0x78d   : > { %4162 = vmatpush1.bf16.msra.mxu1 %v7848_v0  ;;  %v7905_v0 = vld [vmem:[%s10109_s4 + $0x170] ss:$8 sps:$4 sm:$0xff]  }
 0x78e   : > { %4163 = vmatprep.subr.bf16.mxu1 %v7853_v4  ;;  %v7910_v4 = vld [vmem:[%s10109_s4 + $0x184] ss:$8 sps:$4 sm:$0xff]  }
 0x791   : > { %4164 = vmatpush1.bf16.msra.mxu1 %v7851_v3  ;;  %v7908_v3 = vld [vmem:[%s10109_s4 + $0x180] ss:$8 sps:$4 sm:$0xff]  }
 0x792   : > { %4165 = vmatprep.subr.bf16.mxu1 %v7856_v5  ;;  %v7913_v5 = vld [vmem:[%s10109_s4 + $0x194] ss:$8 sps:$4 sm:$0xff]  }
 0x795   : > { %4166 = vmatpush1.bf16.msra.mxu1 %v7854_v7  ;;  %v7911_v7 = vld [vmem:[%s10109_s4 + $0x190] ss:$8 sps:$4 sm:$0xff]  }
 0x796   : > { %4167 = vmatprep.subr.bf16.mxu1 %v7859_v8  ;;  %v7916_v8 = vld [vmem:[%s10109_s4 + $0x1a4] ss:$8 sps:$4 sm:$0xff]  }
 0x799   : > { %4168 = vmatpush1.bf16.msra.mxu1 %v7857_v9  ;;  %v7914_v9 = vld [vmem:[%s10109_s4 + $0x1a0] ss:$8 sps:$4 sm:$0xff]  }
 0x79a   : > { %4169 = vmatprep.subr.bf16.mxu1 %v7862_v11  ;;  %v7919_v11 = vld [vmem:[%s10109_s4 + $0x1b4] ss:$8 sps:$4 sm:$0xff]  }
 0x79d   : > { %4170 = vmatpush1.bf16.msra.mxu1 %v7860_v12  ;;  %v7917_v12 = vld [vmem:[%s10109_s4 + $0x1b0] ss:$8 sps:$4 sm:$0xff]  }
 0x79e   : > { %4171 = vmatprep.subr.bf16.mxu1 %v7865_v17  ;;  %v7922_v17 = vld [vmem:[%s10109_s4 + $0x1c4] ss:$8 sps:$4 sm:$0xff]  }
 0x7a1   : > { %4172 = vmatpush1.bf16.msra.mxu1 %v7863_v18  ;;  %v7920_v18 = vld [vmem:[%s10109_s4 + $0x1c0] ss:$8 sps:$4 sm:$0xff]  }
 0x7a2   : > { %4173 = vmatprep.subr.bf16.mxu1 %v7868_v19  ;;  %v7925_v19 = vld [vmem:[%s10109_s4 + $0x1d4] ss:$8 sps:$4 sm:$0xff]  }
 0x7a5   : > { %4174 = vmatpush1.bf16.msra.mxu1 %v7866_v21  ;;  %v7923_v21 = vld [vmem:[%s10109_s4 + $0x1d0] ss:$8 sps:$4 sm:$0xff]  }
 0x7a6   : > { %4175 = vmatprep.subr.bf16.mxu1 %v7871_v24  ;;  %v7928_v24 = vld [vmem:[%s10109_s4 + $0x1e4] ss:$8 sps:$4 sm:$0xff]  }
 0x7a9   : > { %4176 = vmatpush1.bf16.msra.mxu1 %v7869_v41  ;;  %v7926_v41 = vld [vmem:[%s10109_s4 + $0x1e0] ss:$8 sps:$4 sm:$0xff]  }
 0x7aa   : > { %4177 = vmatprep.subr.bf16.mxu1 %v7874_v26  ;;  %v7931_v26 = vld [vmem:[%s10109_s4 + $0x1f4] ss:$8 sps:$4 sm:$0xff]  }
 0x7ad   : > { %4178 = vmatpush1.bf16.msra.mxu1 %v7872_v32  ;;  %v7929_v32 = vld [vmem:[%s10109_s4 + $0x1f0] ss:$8 sps:$4 sm:$0xff]  }
 0x7ae   : > { %4179 = vmatprep.subr.bf16.mxu1 %v7877_v20 }
 0x7b1   : > { %4180 = vmatpush1.bf16.msra.mxu1 %v7875_v22 }
 0x7b2   : > { %4181 = vmatprep.subr.bf16.mxu1 %v7880_v23 }
 0x7b5   : > { %4182 = vmatpush1.bf16.msra.mxu1 %v7878_v28 }
 0x7b6   : > { %4183 = vmatprep.subr.bf16.mxu1 %v7883_v33 }
 0x7b9   : > { %4184 = vmatpush1.bf16.msra.mxu1 %v7881_v34 }
 0x84f   : > { %v3598_v38 = vpop.f32.mrb[24].mxu1 }
 0x850   : > { %v3605_v40 = vadd.f32 %v3598_v38, %v9357_v13  ;;  %v3600_v42 = vpop.f32.mrb[25].mxu1  ;;  %v7886_v13 = vld [vmem:[%s10109_s4 + $0x104] ss:$8 sps:$4 sm:$0xff]  }
 0x851   : > { %v3606_v44 = vadd.f32 %v3600_v42, %v9359_v46  ;;  %v3602_v45 = vpop.f32.mrb[26].mxu1  ;;  %v7884_v46 = vld [vmem:[%s10109_s4 + $0x100] ss:$8 sps:$4 sm:$0xff]  }
 0x852   : > { %v3619_v57 = vadd.f32 %v3612_v37, %v3605_v40  ;;  %v3603_v25 = vpop.f32.mrb[27].mxu1  ;;  %v7932_v45 = vld [vmem:[%s10109_s4 + $0x300] ss:$8 sps:$4 sm:$0xff]  }
 0x853   : > { %v3620_v47 = vadd.f32 %v3616_v39, %v3606_v44  ;;  %v7940_v25 = vld [vmem:[%s10109_s4 + $0x314] ss:$8 sps:$4 sm:$0xff]  }
 0x854   : > { %vm3621_vm0 = vcmp.ge.f32.partialorder %v3619_v57, 0.0  ;;  %v3623_v48 = vmul.f32 0.2, %v3619_v57 }
 0x855   : > { %vm3622_vm2 = vcmp.ge.f32.partialorder %v3620_v47, 0.0  ;;  %v3624_v35 = vmul.f32 0.2, %v3620_v47 }
 0x856   : > { %v3625_v10 = vsel %vm3621_vm0, %v3619_v57, %v3623_v48  ;;  %v7937_v57 = vld [vmem:[%s10109_s4 + $0x204] ss:$8 sps:$4 sm:$0xff]  }
 0x857   : > { %v3626_v16 = vsel %vm3622_vm2, %v3620_v47, %v3624_v35  ;;  %v3627_v49 = vpack.c.bf16 %v3625_v10, %v3625_v10  ;;  %v7938_v47 = vld [vmem:[%s10109_s4 + $0x310] ss:$8 sps:$4 sm:$0xff]   ;;  %v7946_v48 = vld [vmem:[%s10109_s4 + $0x324] ss:$8 sps:$4 sm:$0xff]   ;;  %v7935_v35 = vld [vmem:[%s10109_s4 + $0x200] ss:$8 sps:$4 sm:$0xff]  }
 0x858   : > { %v9461_v50 = vpack.c.bf16 %v3626_v16, %v3626_v16  ;;  %v7943_v10 = vld [vmem:[%s10109_s4 + $0x214] ss:$8 sps:$4 sm:$0xff]   ;;  %v7944_v16 = vld [vmem:[%s10109_s4 + $0x320] ss:$8 sps:$4 sm:$0xff]  }
 0x859   : > { %v9464_v60 = vsel %vm3632_vm3, %v3627_v49, 0  ;;  %v7952_v49 = vld [vmem:[%s10109_s4 + $0x334] ss:$8 sps:$4 sm:$0xff]  }
 0x85a   : > { %6639 = vmatprep.subr.msk.bf16.mxu0 %vm3632_vm3, %v9461_v50  ;;  %6805 = vmatprep.subr.msk.bf16.mxu1 %vm3632_vm3, %v9461_v50 }
 0x85b   : > { %3640 = vmatpush1.bf16.msra.mxu0 %v9464_v60 }
 0x85c   : > { %6641 = vmatprep.subr.msk.bf16.mxu0 %vm3632_vm3, %v9461_v50 }
 0x85e   : > { %6640 = vmatmul.mubr.msk.bf16.vlgmr.msra.gmra.mrb[48].mxu0 %vm3629_vm4, %v8932_v52 }
 0x85f   : > { %3717 = vmatpush1.bf16.msra.mxu0 %v9464_v60  ;;  %3748 = vmatprep.mubr.bf16.mxu0 %v8121_v6 }
 0x860   : > { %3952 = vmatprep.subr.bf16.mxu0 %v7886_v13  ;;  %v7950_v13 = vld [vmem:[%s10109_s4 + $0x330] ss:$8 sps:$4 sm:$0xff]  }
 0x866   : > { %6642 = vmatmul.mubr.msk.bf16.vlgmr.msra.gmra.mrb[52].mxu0 %vm3629_vm4, %v8946_v30 }
 0x867   : > { %3953 = vmatpush1.bf16.msra.mxu0 %v7884_v46  ;;  %v7958_v46 = vld [vmem:[%s10109_s4 + $0x344] ss:$8 sps:$4 sm:$0xff]  }
 0x868   : > { %3954 = vmatprep.subr.bf16.mxu0 %v7889_v53  ;;  %v7947_v53 = vld [vmem:[%s10109_s4 + $0x220] ss:$8 sps:$4 sm:$0xff]  }
 0x86b   : > { %3955 = vmatpush1.bf16.msra.mxu0 %v7887_v54  ;;  %v7955_v54 = vld [vmem:[%s10109_s4 + $0x234] ss:$8 sps:$4 sm:$0xff]  }
 0x86c   : > { %3956 = vmatprep.subr.bf16.mxu0 %v7892_v55  ;;  %v7956_v55 = vld [vmem:[%s10109_s4 + $0x340] ss:$8 sps:$4 sm:$0xff]  }
 0x86f   : > { %3957 = vmatpush1.bf16.msra.mxu0 %v7890_v56  ;;  %v7964_v56 = vld [vmem:[%s10109_s4 + $0x354] ss:$8 sps:$4 sm:$0xff]  }
 0x870   : > { %3958 = vmatprep.subr.bf16.mxu0 %v7895_v51  ;;  %v7953_v51 = vld [vmem:[%s10109_s4 + $0x230] ss:$8 sps:$4 sm:$0xff]  }
 0x873   : > { %3959 = vmatpush1.bf16.msra.mxu0 %v7893_v15  ;;  %v7961_v15 = vld [vmem:[%s10109_s4 + $0x244] ss:$8 sps:$4 sm:$0xff]  }
 0x874   : > { %3960 = vmatprep.subr.bf16.mxu0 %v7898_v58  ;;  %v7962_v58 = vld [vmem:[%s10109_s4 + $0x350] ss:$8 sps:$4 sm:$0xff]  }
 0x877   : > { %3961 = vmatpush1.bf16.msra.mxu0 %v7896_v59  ;;  %v7970_v59 = vld [vmem:[%s10109_s4 + $0x364] ss:$8 sps:$4 sm:$0xff]  }
 0x878   : > { %3962 = vmatprep.subr.bf16.mxu0 %v7901_v61  ;;  %v7959_v61 = vld [vmem:[%s10109_s4 + $0x240] ss:$8 sps:$4 sm:$0xff]  }
 0x87b   : > { %3963 = vmatpush1.bf16.msra.mxu0 %v7899_v27  ;;  %v7967_v27 = vld [vmem:[%s10109_s4 + $0x254] ss:$8 sps:$4 sm:$0xff]  }
 0x87c   : > { %3964 = vmatprep.subr.bf16.mxu0 %v7904_v29  ;;  %v7968_v29 = vld [vmem:[%s10109_s4 + $0x360] ss:$8 sps:$4 sm:$0xff]  }
 0x87f   : > { %3965 = vmatpush1.bf16.msra.mxu0 %v7902_v31  ;;  %v7976_v31 = vld [vmem:[%s10109_s4 + $0x374] ss:$8 sps:$4 sm:$0xff]  }
 0x880   : > { %3966 = vmatprep.subr.bf16.mxu0 %v7907_v62  ;;  %v7965_v62 = vld [vmem:[%s10109_s4 + $0x250] ss:$8 sps:$4 sm:$0xff]  }
 0x883   : > { %3967 = vmatpush1.bf16.msra.mxu0 %v7905_v0  ;;  %v7973_v0 = vld [vmem:[%s10109_s4 + $0x264] ss:$8 sps:$4 sm:$0xff]  }
 0x884   : > { %3968 = vmatprep.subr.bf16.mxu0 %v7910_v4  ;;  %v7974_v4 = vld [vmem:[%s10109_s4 + $0x370] ss:$8 sps:$4 sm:$0xff]  }
 0x887   : > { %3969 = vmatpush1.bf16.msra.mxu0 %v7908_v3  ;;  %v7982_v3 = vld [vmem:[%s10109_s4 + $0x384] ss:$8 sps:$4 sm:$0xff]  }
 0x888   : > { %3970 = vmatprep.subr.bf16.mxu0 %v7913_v5  ;;  %v7971_v5 = vld [vmem:[%s10109_s4 + $0x260] ss:$8 sps:$4 sm:$0xff]  }
 0x88b   : > { %3971 = vmatpush1.bf16.msra.mxu0 %v7911_v7  ;;  %v7979_v7 = vld [vmem:[%s10109_s4 + $0x274] ss:$8 sps:$4 sm:$0xff]  }
 0x88c   : > { %3972 = vmatprep.subr.bf16.mxu0 %v7916_v8  ;;  %v7980_v8 = vld [vmem:[%s10109_s4 + $0x380] ss:$8 sps:$4 sm:$0xff]  }
 0x88f   : > { %3973 = vmatpush1.bf16.msra.mxu0 %v7914_v9  ;;  %v7988_v9 = vld [vmem:[%s10109_s4 + $0x394] ss:$8 sps:$4 sm:$0xff]  }
 0x890   : > { %3974 = vmatprep.subr.bf16.mxu0 %v7919_v11  ;;  %v7977_v11 = vld [vmem:[%s10109_s4 + $0x270] ss:$8 sps:$4 sm:$0xff]  }
 0x893   : > { %3975 = vmatpush1.bf16.msra.mxu0 %v7917_v12  ;;  %v7985_v12 = vld [vmem:[%s10109_s4 + $0x284] ss:$8 sps:$4 sm:$0xff]  }
 0x894   : > { %3976 = vmatprep.subr.bf16.mxu0 %v7922_v17  ;;  %v7986_v17 = vld [vmem:[%s10109_s4 + $0x390] ss:$8 sps:$4 sm:$0xff]  }
 0x897   : > { %3977 = vmatpush1.bf16.msra.mxu0 %v7920_v18  ;;  %v7994_v18 = vld [vmem:[%s10109_s4 + $0x3a4] ss:$8 sps:$4 sm:$0xff]  }
 0x898   : > { %3978 = vmatprep.subr.bf16.mxu0 %v7925_v19  ;;  %v7983_v19 = vld [vmem:[%s10109_s4 + $0x280] ss:$8 sps:$4 sm:$0xff]  }
 0x89b   : > { %3979 = vmatpush1.bf16.msra.mxu0 %v7923_v21  ;;  %v7991_v21 = vld [vmem:[%s10109_s4 + $0x294] ss:$8 sps:$4 sm:$0xff]  }
 0x89c   : > { %3980 = vmatprep.subr.bf16.mxu0 %v7928_v24  ;;  %v7992_v24 = vld [vmem:[%s10109_s4 + $0x3a0] ss:$8 sps:$4 sm:$0xff]  }
 0x89f   : > { %3981 = vmatpush1.bf16.msra.mxu0 %v7926_v41  ;;  %v8000_v41 = vld [vmem:[%s10109_s4 + $0x3b4] ss:$8 sps:$4 sm:$0xff]  }
 0x8a0   : > { %3982 = vmatprep.subr.bf16.mxu0 %v7931_v26  ;;  %v7989_v26 = vld [vmem:[%s10109_s4 + $0x290] ss:$8 sps:$4 sm:$0xff]  }
 0x8a3   : > { %3983 = vmatpush1.bf16.msra.mxu0 %v7929_v32  ;;  %v7997_v32 = vld [vmem:[%s10109_s4 + $0x2a4] ss:$8 sps:$4 sm:$0xff]  }
 0x8a4   : > { %6739 = vmatprep.subr.msk.bf16.mxu0 %vm3632_vm3, %v9461_v50  ;;  %v7941_v50 = vld [vmem:[%s10109_s4 + $0x210] ss:$8 sps:$4 sm:$0xff]  }
 0x931   : > { %v3673_v20 = vpop.f32.mrb[48].mxu0 }
 0x932   : > { %v3675_v22 = vpop.f32.mrb[49].mxu0  ;;  %v3680_v33 = vpack.c.bf16 %v3673_v20, %v3673_v20  ;;  %v7998_v20 = vld [vmem:[%s10109_s4 + $0x3b0] ss:$8 sps:$4 sm:$0xff]  }
 0x933   : > { %v3681_v23 = vpack.c.bf16 %v3675_v22, %v3675_v22  ;;  %v3677_v28 = vpop.f32.mrb[50].mxu0  ;;  %v7995_v22 = vld [vmem:[%s10109_s4 + $0x2a0] ss:$8 sps:$4 sm:$0xff]  }
 0x934   : > { %v3678_v34 = vpop.f32.mrb[51].mxu0  ;;  %v8001_v28 = vld [vmem:[%s10109_s4 + $0x2b0] ss:$8 sps:$4 sm:$0xff]  }
 0x935   : > { %4185 = vmatprep.mubr.bf16.mxu1 %v3681_v23  ;;  %v8003_v23 = vld [vmem:[%s10109_s4 + $0x2b4] ss:$8 sps:$4 sm:$0xff]   ;;  %v8004_v34 = vld [vmem:[%s10109_s4 + $0x3c0] ss:$8 sps:$4 sm:$0xff]  }
 0x936   : > { %4186 = vmatmul.mubr.bf16.vlgmr.msra.gmra.mrb[28].mxu1 %v3680_v33  ;;  %v8006_v33 = vld [vmem:[%s10109_s4 + $0x3c4] ss:$8 sps:$4 sm:$0xff]  }
 0x937   : > { %4478 = vmatpush1.bf16.msra.mxu1 %v9464_v60  ;;  %4509 = vmatprep.mubr.bf16.mxu1 %v8121_v6 }
 0x938   : > { %4713 = vmatprep.subr.bf16.mxu1 %v7934_v36  ;;  %v8007_v36 = vld [vmem:[%s10109_s4 + $0x2c0] ss:$8 sps:$4 sm:$0xff]  }
 0x939   : > { %v3750_v37 = vpop.f32.mrb[52].mxu0 }
 0x93a   : > { %v3752_v38 = vpop.f32.mrb[53].mxu0  ;;  %v3757_v42 = vpack.c.bf16 %v3750_v37, %v3750_v37  ;;  %v8009_v37 = vld [vmem:[%s10109_s4 + $0x2c4] ss:$8 sps:$4 sm:$0xff]  }
 0x93b   : > { %v3758_v39 = vpack.c.bf16 %v3752_v38, %v3752_v38  ;;  %v3754_v40 = vpop.f32.mrb[54].mxu0  ;;  %v8010_v38 = vld [vmem:[%s10109_s4 + $0x3d0] ss:$8 sps:$4 sm:$0xff]  }
 0x93c   : > { %v3755_v44 = vpop.f32.mrb[55].mxu0  ;;  %v8015_v40 = vld [vmem:[%s10109_s4 + $0x2d4] ss:$8 sps:$4 sm:$0xff]  }
 0x93d   : > { %3984 = vmatprep.mubr.bf16.mxu0 %v3758_v39  ;;  %v8012_v39 = vld [vmem:[%s10109_s4 + $0x3d4] ss:$8 sps:$4 sm:$0xff]   ;;  %v8018_v44 = vld [vmem:[%s10109_s4 + $0x3e4] ss:$8 sps:$4 sm:$0xff]  }
 0x93e   : > { %3985 = vmatmul.mubr.bf16.vlgmr.msra.gmra.mrb[56].mxu0 %v3757_v42  ;;  %6806 = vmatmul.mubr.msk.bf16.vlgmr.msra.gmra.mrb[32].mxu1 %vm3629_vm4, %v9331_v43  ;;  %v8013_v42 = vld [vmem:[%s10109_s4 + $0x2d0] ss:$8 sps:$4 sm:$0xff]  }
 0x93f   : > { %4197 = vmatpush1.bf16.msra.mxu0 %v9464_v60  ;;  %4228 = vmatprep.mubr.bf16.mxu0 %v8121_v6  ;;  %v7949_v60 = vld [vmem:[%s10109_s4 + $0x224] ss:$8 sps:$4 sm:$0xff]  }
 0x940   : > { %4714 = vmatpush1.bf16.msra.mxu1 %v7932_v45  ;;  %4432 = vmatprep.subr.bf16.mxu0 %v7937_v57  ;;  %v8016_v45 = vld [vmem:[%s10109_s4 + $0x3e0] ss:$8 sps:$4 sm:$0xff]  }
 0x941   : > { %4715 = vmatprep.subr.bf16.mxu1 %v7940_v25  ;;  %v8019_v57 = vld [vmem:[%s10109_s4 + $0x2e0] ss:$8 sps:$4 sm:$0xff]   ;;  %v8021_v25 = vld [vmem:[%s10109_s4 + $0x2e4] ss:$8 sps:$4 sm:$0xff]  }
 0x944   : > { %4716 = vmatpush1.bf16.msra.mxu1 %v7938_v47  ;;  %v8022_v47 = vld [vmem:[%s10109_s4 + $0x3f0] ss:$8 sps:$4 sm:$0xff]  }
 0x945   : > { %4717 = vmatprep.subr.bf16.mxu1 %v7946_v48  ;;  %v8024_v48 = vld [vmem:[%s10109_s4 + $0x3f4] ss:$8 sps:$4 sm:$0xff]  }
 0x946   : > { %6740 = vmatmul.mubr.msk.bf16.vlgmr.msra.gmra.mrb[60].mxu0 %vm3629_vm4, %v9151_v2 }
 0x947   : > { %4433 = vmatpush1.bf16.msra.mxu0 %v7935_v35  ;;  %v8027_v35 = vld [vmem:[%s10109_s4 + $0x2f4] ss:$8 sps:$4 sm:$0xff]  }
 0x948   : > { %4434 = vmatprep.subr.bf16.mxu0 %v7943_v10  ;;  %4718 = vmatpush1.bf16.msra.mxu1 %v7944_v16  ;;  %v8025_v10 = vld [vmem:[%s10109_s4 + $0x2f0] ss:$8 sps:$4 sm:$0xff]   ;;  %v8028_v16 = vld [vmem:[%s10110_s5 + $0x40] sm:$0xff]  }
 0x949   : > { %4719 = vmatprep.subr.bf16.mxu1 %v7952_v49 }
 0x94b   : > { %4435 = vmatpush1.bf16.msra.mxu0 %v7941_v50 }
 0x94c   : > { %4436 = vmatprep.subr.bf16.mxu0 %v7949_v60  ;;  %4720 = vmatpush1.bf16.msra.mxu1 %v7950_v13 }
 0x94d   : > { %4721 = vmatprep.subr.bf16.mxu1 %v7958_v46 }
 0x94f   : > { %4437 = vmatpush1.bf16.msra.mxu0 %v7947_v53 }
 0x950   : > { %4438 = vmatprep.subr.bf16.mxu0 %v7955_v54  ;;  %4722 = vmatpush1.bf16.msra.mxu1 %v7956_v55 }
 0x951   : > { %4723 = vmatprep.subr.bf16.mxu1 %v7964_v56 }
 0x953   : > { %4439 = vmatpush1.bf16.msra.mxu0 %v7953_v51 }
 0x954   : > { %4440 = vmatprep.subr.bf16.mxu0 %v7961_v15  ;;  %4724 = vmatpush1.bf16.msra.mxu1 %v7962_v58 }
 0x955   : > { %4725 = vmatprep.subr.bf16.mxu1 %v7970_v59 }
 0x957   : > { %4441 = vmatpush1.bf16.msra.mxu0 %v7959_v61 }
 0x958   : > { %4442 = vmatprep.subr.bf16.mxu0 %v7967_v27  ;;  %4726 = vmatpush1.bf16.msra.mxu1 %v7968_v29  ;;  %v8029_v27 = vld [vmem:[%s10110_s5] sm:$0xff]  }
 0x959   : > { %4727 = vmatprep.subr.bf16.mxu1 %v7976_v31 }
 0x95b   : > { %4443 = vmatpush1.bf16.msra.mxu0 %v7965_v62  ;;  %v8030_v62 = vld [vmem:[%s10110_s5 + $0x48] sm:$0xff]  }
 0x95c   : > { %4444 = vmatprep.subr.bf16.mxu0 %v7973_v0  ;;  %4728 = vmatpush1.bf16.msra.mxu1 %v7974_v4  ;;  %v8031_v0 = vld [vmem:[%s10110_s5 + $0x8] sm:$0xff]   ;;  %v8032_v4 = vld [vmem:[%s10110_s5 + $0x50] sm:$0xff]  }
 0x95d   : > { %4729 = vmatprep.subr.bf16.mxu1 %v7982_v3 }
 0x95f   : > { %4445 = vmatpush1.bf16.msra.mxu0 %v7971_v5 }
 0x960   : > { %4446 = vmatprep.subr.bf16.mxu0 %v7979_v7  ;;  %4730 = vmatpush1.bf16.msra.mxu1 %v7980_v8 }
 0x961   : > { %4731 = vmatprep.subr.bf16.mxu1 %v7988_v9  ;;  %v8033_v9 = vld [vmem:[%s10110_s5 + $0x10] sm:$0xff]  }
 0x963   : > { %4447 = vmatpush1.bf16.msra.mxu0 %v7977_v11 }
 0x964   : > { %4448 = vmatprep.subr.bf16.mxu0 %v7985_v12  ;;  %4732 = vmatpush1.bf16.msra.mxu1 %v7986_v17  ;;  %v8034_v17 = vld [vmem:[%s10110_s5 + $0x58] sm:$0xff]  }
 0x965   : > { %4733 = vmatprep.subr.bf16.mxu1 %v7994_v18  ;;  %v8035_v18 = vld [vmem:[%s10110_s5 + $0x18] sm:$0xff]  }
 0x967   : > { %4449 = vmatpush1.bf16.msra.mxu0 %v7983_v19  ;;  %v8036_v19 = vld [vmem:[%s10110_s5 + $0x60] sm:$0xff]  }
 0x968   : > { %4450 = vmatprep.subr.bf16.mxu0 %v7991_v21  ;;  %4734 = vmatpush1.bf16.msra.mxu1 %v7992_v24  ;;  %v8037_v21 = vld [vmem:[%s10110_s5 + $0x20] sm:$0xff]   ;;  %v8038_v24 = vld [vmem:[%s10110_s5 + $0x68] sm:$0xff]  }
 0x969   : > { %4735 = vmatprep.subr.bf16.mxu1 %v8000_v41  ;;  %v8039_v41 = vld [vmem:[%s10110_s5 + $0x28] sm:$0xff]  }
 0x96b   : > { %4451 = vmatpush1.bf16.msra.mxu0 %v7989_v26  ;;  %v8040_v26 = vld [vmem:[%s10110_s5 + $0x70] sm:$0xff]  }
 0x96c   : > { %4452 = vmatprep.subr.bf16.mxu0 %v7997_v32  ;;  %4736 = vmatpush1.bf16.msra.mxu1 %v7998_v20  ;;  %v8041_v32 = vld [vmem:[%s10110_s5 + $0x30] sm:$0xff]   ;;  %v8042_v20 = vld [vmem:[%s10110_s5 + $0x78] sm:$0xff]  }
 0x96d   : > { %4737 = vmatprep.subr.bf16.mxu1 %v8006_v33 }
 0x96f   : > { %4453 = vmatpush1.bf16.msra.mxu0 %v7995_v22  ;;  %v8043_v22 = vld [vmem:[%s10110_s5 + $0x38] sm:$0xff]  }
 0x970   : > { %4454 = vmatprep.subr.bf16.mxu0 %v8003_v23  ;;  %4738 = vmatpush1.bf16.msra.mxu1 %v8004_v34 }
 0x971   : > { %4739 = vmatprep.subr.bf16.mxu1 %v8012_v39 }
 0x973   : > { %4455 = vmatpush1.bf16.msra.mxu0 %v8001_v28 }
 0x974   : > { %4456 = vmatprep.subr.bf16.mxu0 %v8009_v37  ;;  %4740 = vmatpush1.bf16.msra.mxu1 %v8010_v38 }
 0x975   : > { %4741 = vmatprep.subr.bf16.mxu1 %v8018_v44 }
 0x977   : > { %4457 = vmatpush1.bf16.msra.mxu0 %v8007_v36  ;;  %v4756_v36 = vld [vmem:[%s10116_s11] sm:$0x3] }
 0x978   : > { %4458 = vmatprep.subr.bf16.mxu0 %v8015_v40  ;;  %4742 = vmatpush1.bf16.msra.mxu1 %v8016_v45  ;;  %v4761_v39 = vrot.slane %v4756_v36, %v8471_v63  ;;  %v4765_v44 = vrot.slane %v4756_v36, %v8477_v1  ;;  %v8044_v1 = vld [vmem:[%s10110_s5 + $0xc0] sm:$0xff]   ;;  %v8071_v36 = vld [vmem:[%s10110_s5 + $0x110] sm:$0xff]  }
 0x979   : > { %4743 = vmatprep.subr.bf16.mxu1 %v8024_v48 }
 0x97b   : > { %4459 = vmatpush1.bf16.msra.mxu0 %v8013_v42 }
 0x97c   : > { %4460 = vmatprep.subr.bf16.mxu0 %v8021_v25  ;;  %4744 = vmatpush1.bf16.msra.mxu1 %v8022_v47 }
 0x97d   : > { %7152 = vmatprep.subr.bf16.mxu1 %v8028_v16 }
 0x97f   : > { %4461 = vmatpush1.bf16.msra.mxu0 %v8019_v57 }
 0x980   : > { %4462 = vmatprep.subr.bf16.mxu0 %v8027_v35 }
 0x983   : > { %4463 = vmatpush1.bf16.msra.mxu0 %v8025_v10 }
 0xa09   : > { %v4187_v49 = vpop.f32.mrb[28].mxu1 }
 0xa0a   : > { %v4189_v50 = vpop.f32.mrb[29].mxu1 }
 0xa0b   : > { %v4191_v60 = vpop.f32.mrb[30].mxu1 }
 0xa0c   : > { %v4192_v13 = vpop.f32.mrb[31].mxu1 }
 0xa11   : > { %v3986_v46 = vpop.f32.mrb[56].mxu0  ;;  %v4511_v53 = vpop.f32.mrb[32].mxu1 }
 0xa12   : > { %v4188_v54 = vadd.f32 %v4187_v49, %v3986_v46  ;;  %v3988_v55 = vpop.f32.mrb[57].mxu0  ;;  %v4518_v56 = vpack.c.bf16 %v4511_v53, %v4511_v53  ;;  %v4513_v51 = vpop.f32.mrb[33].mxu1  ;;  %v8045_v46 = vld [vmem:[%s10110_s5 + $0x80] sm:$0xff]   ;;  %v8046_v53 = vld [vmem:[%s10110_s5 + $0xc8] sm:$0xff]  }
 0xa13   : > { %v4190_v15 = vadd.f32 %v4189_v50, %v3988_v55  ;;  %v3990_v58 = vpop.f32.mrb[58].mxu0  ;;  %v4519_v59 = vpack.c.bf16 %v4513_v51, %v4513_v51  ;;  %v4515_v61 = vpop.f32.mrb[34].mxu1  ;;  %v8049_v55 = vld [vmem:[%s10110_s5 + $0x90] sm:$0xff]   ;;  %v8051_v51 = vld [vmem:[%s10110_s5 + $0x98] sm:$0xff]  }
 0xa14   : > { %v3991_v29 = vpop.f32.mrb[59].mxu0  ;;  %v4516_v31 = vpop.f32.mrb[35].mxu1  ;;  %v8053_v58 = vld [vmem:[%s10110_s5 + $0xa0] sm:$0xff]   ;;  %v8055_v61 = vld [vmem:[%s10110_s5 + $0xa8] sm:$0xff]  }
 0xa15   : > { %4745 = vmatprep.mubr.bf16.mxu1 %v4519_v59  ;;  %v8054_v59 = vld [vmem:[%s10110_s5 + $0xe8] sm:$0xff]   ;;  %v8057_v29 = vld [vmem:[%s10110_s5 + $0xb0] sm:$0xff]   ;;  %v8058_v31 = vld [vmem:[%s10110_s5 + $0xf8] sm:$0xff]  }
 0xa16   : > { %4746 = vmatmul.mubr.bf16.vlgmr.msra.gmra.mrb[36].mxu1 %v4518_v56  ;;  %v8050_v56 = vld [vmem:[%s10110_s5 + $0xd8] sm:$0xff]  }
 0xa17   : > { %7153 = vmatpush3.bf16.msra.mxu1 %v8029_v27  ;;  %v8056_v27 = vld [vmem:[%s10110_s5 + $0xf0] sm:$0xff]  }
 0xa18   : > { %7154 = vmatprep.subr.bf16.mxu1 %v8030_v62  ;;  %v8059_v62 = vld [vmem:[%s10110_s5 + $0xb8] sm:$0xff]  }
 0xa19   : > { %v4230_v3 = vpop.f32.mrb[60].mxu0 }
 0xa1a   : > { %v4232_v5 = vpop.f32.mrb[61].mxu0  ;;  %v4237_v11 = vpack.c.bf16 %v4230_v3, %v4230_v3 }
 0xa1b   : > { %v4238_v7 = vpack.c.bf16 %v4232_v5, %v4232_v5  ;;  %v4234_v8 = vpop.f32.mrb[62].mxu0  ;;  %7155 = vmatpush3.bf16.msra.mxu1 %v8031_v0 }
 0xa1c   : > { %v4235_v12 = vpop.f32.mrb[63].mxu0  ;;  %7156 = vmatprep.subr.bf16.mxu1 %v8032_v4 }
 0xa1d   : > { %4464 = vmatprep.mubr.bf16.mxu0 %v4238_v7 }
 0xa1e   : > { %4465 = vmatmul.mubr.bf16.vlgmr.msra.gmra.mrb[64].mxu0 %v4237_v11 }
 0xa1f   : > { %7157 = vmatpush3.bf16.msra.mxu1 %v8033_v9  ;;  %4820 = vmatprep.mubr.bf16.mxu0 %v8121_v6  ;;  %v8060_v9 = vld [vmem:[%s10110_s5 + $0x1c0] sm:$0xff]  }
 0xa20   : > { %7158 = vmatprep.subr.bf16.mxu1 %v8034_v17 }
 0xa23   : > { %7159 = vmatpush3.bf16.msra.mxu1 %v8035_v18 }
 0xa24   : > { %7160 = vmatprep.subr.bf16.mxu1 %v8036_v19 }
 0xa27   : > { %7161 = vmatpush3.bf16.msra.mxu1 %v8037_v21 }
 0xa28   : > { %7162 = vmatprep.subr.bf16.mxu1 %v8038_v24  ;;  %v8061_v24 = vld [vmem:[%s10110_s5 + $0x180] sm:$0xff]  }
 0xa2b   : > { %7163 = vmatpush3.bf16.msra.mxu1 %v8039_v41  ;;  %v8062_v41 = vld [vmem:[%s10110_s5 + $0x140] sm:$0xff]  }
 0xa2c   : > { %7164 = vmatprep.subr.bf16.mxu1 %v8040_v26  ;;  %v8064_v26 = vld [vmem:[%s10110_s5 + $0x1c8] sm:$0xff]  }
 0xa2f   : > { %7165 = vmatpush3.bf16.msra.mxu1 %v8041_v32  ;;  %v8065_v32 = vld [vmem:[%s10110_s5 + $0x188] sm:$0xff]  }
 0xa30   : > { %7166 = vmatprep.subr.bf16.mxu1 %v8042_v20  ;;  %v8068_v20 = vld [vmem:[%s10110_s5 + $0x1d0] sm:$0xff]  }
 0xa33   : > { %7167 = vmatpush3.bf16.msra.mxu1 %v8043_v22  ;;  %v8063_v22 = vld [vmem:[%s10110_s5 + $0x100] sm:$0xff]  }
 0xae9   : > { %v4747_v23 = vpop.f32.mrb[36].mxu1 }
 0xaea   : > { %v4749_v28 = vpop.f32.mrb[37].mxu1 }
 0xaeb   : > { %v4751_v33 = vpop.f32.mrb[38].mxu1 }
 0xaec   : > { %v4752_v34 = vpop.f32.mrb[39].mxu1  ;;  %v8070_v33 = vld [vmem:[%s10110_s5 + $0x150] sm:$0xff]  }
 0xaed   : > { %v8073_v34 = vld [vmem:[%s10110_s5 + $0x198] sm:$0xff]  }
 0xaf1   : > { %v4466_v37 = vpop.f32.mrb[64].mxu0 }
 0xaf2   : > { %v4473_v38 = vadd.f32 %v4466_v37, %v4188_v54  ;;  %v4468_v40 = vpop.f32.mrb[65].mxu0  ;;  %v8048_v54 = vld [vmem:[%s10110_s5 + $0xd0] sm:$0xff]   ;;  %v8074_v37 = vld [vmem:[%s10110_s5 + $0x158] sm:$0xff]  }
 0xaf3   : > { %v4474_v42 = vadd.f32 %v4468_v40, %v4190_v15  ;;  %v4470_v45 = vpop.f32.mrb[66].mxu0  ;;  %v8052_v15 = vld [vmem:[%s10110_s5 + $0xe0] sm:$0xff]  }
 0xaf4   : > { %v4754_v57 = vadd.f32 %v4747_v23, %v4473_v38  ;;  %v4471_v25 = vpop.f32.mrb[67].mxu0  ;;  %v8072_v23 = vld [vmem:[%s10110_s5 + $0x1d8] sm:$0xff]   ;;  %v8077_v40 = vld [vmem:[%s10110_s5 + $0x1a0] sm:$0xff]   ;;  %v8080_v45 = vld [vmem:[%s10110_s5 + $0x1e8] sm:$0xff]  }
 0xaf5   : > { %v4755_v47 = vadd.f32 %v4749_v28, %v4474_v42  ;;  %v8067_v28 = vld [vmem:[%s10110_s5 + $0x108] sm:$0xff]   ;;  %v8075_v38 = vld [vmem:[%s10110_s5 + $0x118] sm:$0xff]   ;;  %v8078_v42 = vld [vmem:[%s10110_s5 + $0x160] sm:$0xff]  }
 0xaf6   : > { %v4768_v48 = vadd.f32 %v4761_v39, %v4754_v57  ;;  %v8076_v39 = vld [vmem:[%s10110_s5 + $0x1e0] sm:$0xff]   ;;  %v8081_v57 = vld [vmem:[%s10110_s5 + $0x1a8] sm:$0xff]  }
 0xaf7   : > { %v4769_v35 = vadd.f32 %v4765_v44, %v4755_v47  ;;  %v8079_v44 = vld [vmem:[%s10110_s5 + $0x120] sm:$0xff]   ;;  %v8082_v25 = vld [vmem:[%s10110_s5 + $0x168] sm:$0xff]  }
 0xaf8   : > { %v4772_v10 = vmul.f32 0.2, %v4768_v48  ;;  %vm4770_vm5 = vcmp.ge.f32.partialorder %v4768_v48, 0.0  ;;  %v8083_v47 = vld [vmem:[%s10110_s5 + $0x128] sm:$0xff]  }
 0xaf9   : > { %vm4771_vm6 = vcmp.ge.f32.partialorder %v4769_v35, 0.0  ;;  %v4773_v16 = vmul.f32 0.2, %v4769_v35 }
 0xafa   : > { %v4774_v49 = vsel %vm4770_vm5, %v4768_v48, %v4772_v10  ;;  %v8084_v48 = vld [vmem:[%s10110_s5 + $0x1f0] sm:$0xff]  }
 0xafb   : > { %v4775_v50 = vsel %vm4771_vm6, %v4769_v35, %v4773_v16  ;;  %v4776_v60 = vpack.c.bf16 %v4774_v49, %v4774_v49  ;;  %v8085_v35 = vld [vmem:[%s10110_s5 + $0x1b0] sm:$0xff]   ;;  %v8088_v49 = vld [vmem:[%s10110_s5 + $0x1f8] sm:$0xff]  }
 0xafc   : > { %v4777_v13 = vpack.c.bf16 %v4775_v50, %v4775_v50  ;;  %v8086_v10 = vld [vmem:[%s10110_s5 + $0x170] sm:$0xff]   ;;  %v8089_v50 = vld [vmem:[%s10110_s5 + $0x1b8] sm:$0xff]  }
 0xafd   : > { %v9832_v63 = vsel %vm4781_vm7, %v4776_v60, 0  ;;  %v8087_v16 = vld [vmem:[%s10110_s5 + $0x130] sm:$0xff]   ;;  %v8090_v60 = vld [vmem:[%s10110_s5 + $0x178] sm:$0xff]  }
 0xafe   : > { %6871 = vmatprep.subr.msk.bf16.mxu0 %vm4781_vm7, %v4777_v13  ;;  %6989 = vmatprep.subr.msk.bf16.mxu1 %vm4781_vm7, %v4777_v13 }
 0xaff   : > { %4789 = vmatpush1.bf16.msra.mxu0 %v9832_v63 }
 0xb00   : > { %6873 = vmatprep.subr.msk.bf16.mxu0 %vm4781_vm7, %v4777_v13 }
 0xb02   : > { %6872 = vmatmul.mubr.msk.bf16.vlgmr.msra.gmra.mrb[68].mxu0 %vm4778_vm8, %v8932_v52  ;;  %v8047_v52 = vld [vmem:[%s10110_s5 + $0x88] sm:$0xff]  }
 0xb03   : > { %4866 = vmatpush1.bf16.msra.mxu0 %v9832_v63  ;;  %4897 = vmatprep.mubr.bf16.mxu0 %v8121_v6 }
 0xb04   : > { %7130 = vmatprep.subr.bf16.mxu0 %v8044_v1 }
 0xb0a   : > { %6874 = vmatmul.mubr.msk.bf16.vlgmr.msra.gmra.mrb[72].mxu0 %vm4778_vm8, %v8946_v30 }
 0xb0b   : > { %7131 = vmatpush3.bf16.msra.mxu0 %v8045_v46 }
 0xb0c   : > { %7132 = vmatprep.subr.bf16.mxu0 %v8046_v53 }
 0xb0f   : > { %7133 = vmatpush3.bf16.msra.mxu0 %v8047_v52 }
 0xb10   : > { %7134 = vmatprep.subr.bf16.mxu0 %v8048_v54 }
 0xb13   : > { %7135 = vmatpush3.bf16.msra.mxu0 %v8049_v55 }
 0xb14   : > { %7136 = vmatprep.subr.bf16.mxu0 %v8050_v56 }
 0xb17   : > { %7137 = vmatpush3.bf16.msra.mxu0 %v8051_v51 }
 0xb18   : > { %7138 = vmatprep.subr.bf16.mxu0 %v8052_v15 }
 0xb1b   : > { %7139 = vmatpush3.bf16.msra.mxu0 %v8053_v58 }
 0xb1c   : > { %7140 = vmatprep.subr.bf16.mxu0 %v8054_v59 }
 0xb1f   : > { %7141 = vmatpush3.bf16.msra.mxu0 %v8055_v61 }
 0xb20   : > { %7142 = vmatprep.subr.bf16.mxu0 %v8056_v27 }
 0xb23   : > { %7143 = vmatpush3.bf16.msra.mxu0 %v8057_v29 }
 0xb24   : > { %7144 = vmatprep.subr.bf16.mxu0 %v8058_v31 }
 0xb27   : > { %7145 = vmatpush3.bf16.msra.mxu0 %v8059_v62 }
 0xb28   : > { %6939 = vmatprep.subr.msk.bf16.mxu0 %vm4781_vm7, %v4777_v13  ;;  %v8091_v13 = vld [vmem:[%s10110_s5 + $0x138] sm:$0xff]  }
 0xbd5   : > { %v4822_v0 = vpop.f32.mrb[68].mxu0 }
 0xbd6   : > { %v4824_v4 = vpop.f32.mrb[69].mxu0  ;;  %v4829_v7 = vpack.c.bf16 %v4822_v0, %v4822_v0 }
 0xbd7   : > { %v4830_v3 = vpack.c.bf16 %v4824_v4, %v4824_v4  ;;  %v4826_v5 = vpop.f32.mrb[70].mxu0 }
 0xbd8   : > { %v4827_v8 = vpop.f32.mrb[71].mxu0 }
 0xbd9   : > { %5205 = vmatprep.mubr.bf16.mxu1 %v4830_v3 }
 0xbda   : > { %5206 = vmatmul.mubr.bf16.vlgmr.msra.gmra.mrb[40].mxu1 %v4829_v7 }
 0xbdb   : > { %5431 = vmatpush1.bf16.msra.mxu1 %v9832_v63  ;;  %5462 = vmatprep.mubr.bf16.mxu1 %v8121_v6 }
 0xbdc   : > { %7196 = vmatprep.subr.bf16.mxu1 %v8060_v9  ;;  %v8092_v9 = vld [vmem:[%s10111_s6 + $0x40] sm:$0xff]  }
 0xbdd   : > { %v4899_v11 = vpop.f32.mrb[72].mxu0 }
 0xbde   : > { %v4901_v12 = vpop.f32.mrb[73].mxu0  ;;  %v4906_v19 = vpack.c.bf16 %v4899_v11, %v4899_v11  ;;  %v8093_v11 = vld [vmem:[%s10111_s6 + $0x48] sm:$0xff]  }
 0xbdf   : > { %v4907_v17 = vpack.c.bf16 %v4901_v12, %v4901_v12  ;;  %v4903_v18 = vpop.f32.mrb[74].mxu0  ;;  %v8095_v12 = vld [vmem:[%s10111_s6 + $0x50] sm:$0xff]  }
 0xbe0   : > { %v4904_v21 = vpop.f32.mrb[75].mxu0  ;;  %v8099_v18 = vld [vmem:[%s10111_s6 + $0x60] sm:$0xff]  }
 0xbe1   : > { %5069 = vmatprep.mubr.bf16.mxu0 %v4907_v17  ;;  %v8097_v17 = vld [vmem:[%s10111_s6 + $0x58] sm:$0xff]   ;;  %v8103_v21 = vld [vmem:[%s10111_s6 + $0x70] sm:$0xff]  }
 0xbe2   : > { %5070 = vmatmul.mubr.bf16.vlgmr.msra.gmra.mrb[76].mxu0 %v4906_v19  ;;  %6990 = vmatmul.mubr.msk.bf16.vlgmr.msra.gmra.mrb[44].mxu1 %vm4778_vm8, %v9331_v43  ;;  %v8069_v43 = vld [vmem:[%s10110_s5 + $0x190] sm:$0xff]   ;;  %v8101_v19 = vld [vmem:[%s10111_s6 + $0x68] sm:$0xff]  }
 0xbe3   : > { %5216 = vmatpush1.bf16.msra.mxu0 %v9832_v63  ;;  %5247 = vmatprep.mubr.bf16.mxu0 %v8121_v6  ;;  %v8066_v6 = vld [vmem:[%s10110_s5 + $0x148] sm:$0xff]  }
 0xbe4   : > { %7197 = vmatpush3.bf16.msra.mxu1 %v8061_v24  ;;  %7174 = vmatprep.subr.bf16.mxu0 %v8062_v41 }
 0xbe5   : > { %7198 = vmatprep.subr.bf16.mxu1 %v8064_v26 }
 0xbe8   : > { %7199 = vmatpush3.bf16.msra.mxu1 %v8065_v32 }
 0xbe9   : > { %7200 = vmatprep.subr.bf16.mxu1 %v8068_v20 }
 0xbea   : > { %6940 = vmatmul.mubr.msk.bf16.vlgmr.msra.gmra.mrb[80].mxu0 %vm4778_vm8, %v9151_v2 }
 0xbeb   : > { %7175 = vmatpush3.bf16.msra.mxu0 %v8063_v22 }
 0xbec   : > { %7176 = vmatprep.subr.bf16.mxu0 %v8066_v6  ;;  %7201 = vmatpush3.bf16.msra.mxu1 %v8069_v43 }
 0xbed   : > { %7202 = vmatprep.subr.bf16.mxu1 %v8072_v23 }
 0xbef   : > { %7177 = vmatpush3.bf16.msra.mxu0 %v8067_v28 }
 0xbf0   : > { %7178 = vmatprep.subr.bf16.mxu0 %v8070_v33  ;;  %7203 = vmatpush3.bf16.msra.mxu1 %v8073_v34  ;;  %v7039_v34 = vld [vmem:[%s10117_s12] ss:$0 sm:$0xff] }
 0xbf1   : > { %7204 = vmatprep.subr.bf16.mxu1 %v8076_v39 }
 0xbf3   : > { %7179 = vmatpush3.bf16.msra.mxu0 %v8071_v36 }
 0xbf4   : > { %7180 = vmatprep.subr.bf16.mxu0 %v8074_v37  ;;  %7205 = vmatpush3.bf16.msra.mxu1 %v8077_v40 }
 0xbf5   : > { %7206 = vmatprep.subr.bf16.mxu1 %v8080_v45  ;;  %v8096_v45 = vld [vmem:[%s10111_s6 + $0x88] sm:$0xff]  }
 0xbf7   : > { %7181 = vmatpush3.bf16.msra.mxu0 %v8075_v38 }
 0xbf8   : > { %7182 = vmatprep.subr.bf16.mxu0 %v8078_v42  ;;  %7207 = vmatpush3.bf16.msra.mxu1 %v8081_v57  ;;  %v8102_v57 = vld [vmem:[%s10111_s6 + $0xa0] sm:$0xff]  }
 0xbf9   : > { %7208 = vmatprep.subr.bf16.mxu1 %v8084_v48  ;;  %v8106_v48 = vld [vmem:[%s10111_s6 + $0xb0] sm:$0xff]  }
 0xbfb   : > { %7183 = vmatpush3.bf16.msra.mxu0 %v8079_v44  ;;  %v8094_v44 = vld [vmem:[%s10111_s6 + $0x80] sm:$0xff]  }
 0xbfc   : > { %7184 = vmatprep.subr.bf16.mxu0 %v8082_v25  ;;  %7209 = vmatpush3.bf16.msra.mxu1 %v8085_v35  ;;  %v8104_v25 = vld [vmem:[%s10111_s6 + $0xa8] sm:$0xff]   ;;  %v8107_v35 = vld [vmem:[%s10111_s6 + $0xb8] sm:$0xff]  }
 0xbfd   : > { %7210 = vmatprep.subr.bf16.mxu1 %v8088_v49 }
 0xbff   : > { %7185 = vmatpush3.bf16.msra.mxu0 %v8083_v47  ;;  %v8105_v47 = vld [vmem:[%s10111_s6 + $0x78] sm:$0xff]  }
 0xc00   : > { %7186 = vmatprep.subr.bf16.mxu0 %v8086_v10  ;;  %7211 = vmatpush3.bf16.msra.mxu1 %v8089_v50 }
 0xc01   : > { %7325 = vmatprep.subr.bf16.mxu1 %v8120_v14 }
 0xc03   : > { %7187 = vmatpush3.bf16.msra.mxu0 %v8087_v16 }
 0xc04   : > { %7188 = vmatprep.subr.bf16.mxu0 %v8090_v60 }
 0xc07   : > { %7189 = vmatpush3.bf16.msra.mxu0 %v8091_v13 }
 0xc08   : > { %7293 = vmatprep.subr.bf16.mxu0 %v8120_v14 }
 0xcad   : > { %v7168_v63 = vpop.f32.mrb[40].mxu1 }
 0xcae   : > { %v7169_v1 = vpop.f32.mrb[41].mxu1 }
 0xcaf   : > { %v7170_v46 = vadd.f32 %v7169_v1, %v7168_v63  ;;  %v7171_v53 = vpop.f32.mrb[42].mxu1 }
 0xcb0   : > { %v7172_v52 = vpop.f32.mrb[43].mxu1 }
 0xcb1   : > { %v8108_v52 = vld [vmem:[%s10112_s7 + $0x20] sm:$0xff]  }
 0xcb5   : > { %v7146_v54 = vpop.f32.mrb[76].mxu0  ;;  %v5464_v55 = vpop.f32.mrb[44].mxu1 }
 0xcb6   : > { %v7147_v56 = vpop.f32.mrb[77].mxu0  ;;  %v5471_v51 = vpack.c.bf16 %v5464_v55, %v5464_v55  ;;  %v5466_v15 = vpop.f32.mrb[45].mxu1  ;;  %v8110_v55 = vld [vmem:[%s10112_s7 + $0x30] sm:$0xff]  }
 0xcb7   : > { %v7148_v58 = vadd.f32 %v7147_v56, %v7146_v54  ;;  %v7149_v59 = vpop.f32.mrb[78].mxu0  ;;  %v5472_v61 = vpack.c.bf16 %v5466_v15, %v5466_v15  ;;  %v5468_v27 = vpop.f32.mrb[46].mxu1  ;;  %v8109_v54 = vld [vmem:[%s10112_s7 + $0x28] sm:$0xff]   ;;  %v8111_v56 = vld [vmem:[%s10112_s7 + $0x38] sm:$0xff]  }
 0xcb8   : > { %v7150_v29 = vpop.f32.mrb[79].mxu0  ;;  %v5469_v31 = vpop.f32.mrb[47].mxu1  ;;  %v5956_v27 = vld [vmem:[%s10118_s13] sm:$0x1] }
 0xcb9   : > { %v5208_v62 = vadd.f32 %v7170_v46, %v7148_v58  ;;  %5634 = vmatprep.mubr.bf16.mxu1 %v5472_v61 }
 0xcba   : > { %5635 = vmatmul.mubr.bf16.vlgmr.msra.gmra.mrb[48].mxu1 %v5471_v51 }
 0xcbb   : > { %7341 = vmatprep.mubr.msk.bf16.mxu1 %vm8122_vm9, %v8120_v14  ;;  %7326 = vmatpush3.bf16.msra.mxu1 %v8092_v9 }
 0xcbc   : > { %7327 = vmatprep.subr.bf16.mxu1 %v8120_v14 }
 0xcbd   : > { %v5249_v0 = vpop.f32.mrb[80].mxu0 }
 0xcbe   : > { %v5251_v4 = vpop.f32.mrb[81].mxu0  ;;  %v5256_v7 = vpack.c.bf16 %v5249_v0, %v5249_v0 }
 0xcbf   : > { %v5257_v3 = vpack.c.bf16 %v5251_v4, %v5251_v4  ;;  %v5253_v5 = vpop.f32.mrb[82].mxu0  ;;  %7328 = vmatpush3.bf16.msra.mxu1 %v8093_v11 }
 0xcc0   : > { %v5254_v8 = vpop.f32.mrb[83].mxu0  ;;  %7329 = vmatprep.subr.bf16.mxu1 %v8120_v14 }
 0xcc1   : > { %5419 = vmatprep.mubr.bf16.mxu0 %v5257_v3 }
 0xcc2   : > { %5420 = vmatmul.mubr.bf16.vlgmr.msra.gmra.mrb[84].mxu0 %v5256_v7  ;;  %v5971_v7 = vld [vmem:[#allocation2] sm:$0x1] }
 0xcc3   : > { %7295 = vmatprep.mubr.msk.bf16.mxu0 %vm8122_vm9, %v8120_v14  ;;  %7330 = vmatpush3.bf16.msra.mxu1 %v8095_v12 }
 0xcc4   : > { %7331 = vmatprep.subr.bf16.mxu1 %v8120_v14 }
 0xcc7   : > { %7332 = vmatpush3.bf16.msra.mxu1 %v8097_v17 }
 0xcc8   : > { %7333 = vmatprep.subr.bf16.mxu1 %v8120_v14 }
 0xccb   : > { %7334 = vmatpush3.bf16.msra.mxu1 %v8099_v18 }
 0xccc   : > { %7335 = vmatprep.subr.bf16.mxu1 %v8120_v14 }
 0xccf   : > { %7336 = vmatpush3.bf16.msra.mxu1 %v8101_v19 }
 0xcd0   : > { %7337 = vmatprep.subr.bf16.mxu1 %v8120_v14 }
 0xcd3   : > { %7338 = vmatpush3.bf16.msra.mxu1 %v8103_v21 }
 0xcd4   : > { %7339 = vmatprep.subr.bf16.mxu1 %v8120_v14 }
 0xcd7   : > { %7340 = vmatpush3.bf16.msra.mxu1 %v8105_v47 }
 0xd8d   : > { %v7212_v24 = vpop.f32.mrb[48].mxu1 }
 0xd8e   : > { %v7213_v41 = vpop.f32.mrb[49].mxu1 }
 0xd8f   : > { %v7214_v26 = vadd.f32 %v7213_v41, %v7212_v24  ;;  %v7215_v32 = vpop.f32.mrb[50].mxu1 }
 0xd90   : > { %v7216_v20 = vpop.f32.mrb[51].mxu1 }
 0xd95   : > { %v7190_v22 = vpop.f32.mrb[84].mxu0 }
 0xd96   : > { %v7191_v6 = vpop.f32.mrb[85].mxu0 }
 0xd97   : > { %v7192_v43 = vadd.f32 %v7191_v6, %v7190_v22  ;;  %v7193_v23 = vpop.f32.mrb[86].mxu0 }
 0xd98   : > { %v7194_v28 = vpop.f32.mrb[87].mxu0 }
 0xd99   : > { %v5427_v33 = vadd.f32 %v7192_v43, %v5208_v62 }
 0xd9b   : > { %v5642_v36 = vadd.f32 %v7214_v26, %v5427_v33 }
 0xd9d   : > { %v5650_v37 = vadd.f32 %v7039_v34, %v5642_v36 }
 0xd9f   : > { %vm5651_vm10 = vcmp.ge.f32.partialorder %v5650_v37, 0.0  ;;  %v5652_v38 = vmul.f32 0.2, %v5650_v37 }
 0xda1   : > { %v5653_v39 = vsel %vm5651_vm10, %v5650_v37, %v5652_v38 }
 0xda2   : > { %v5654_v40 = vpack.c.bf16 %v5653_v39, %v5653_v39 }
 0xda4   : > { %v5660_v42 = vsel %vm5658_vm11, %v5654_v40, 0 }
 0xda5   : > { %7294 = vmatpush3.bf16.msra.mxu0 %v5660_v42 }
 0xda6   : > { %7299 = vmatprep.subr.bf16.mxu0 %v8120_v14 }
 0xda8   : > { %7296 = vmatmul.mubr.msk.bf16.vlgmr.msra.gmra.mrb[88].mxu0 %vm5655_vm12, %v8946_v30  ;;  %v8098_v30 = vld [vmem:[%s10111_s6 + $0x90] sm:$0xff]  }
 0xda9   : > { %7300 = vmatpush3.bf16.msra.mxu0 %v5660_v42  ;;  %7301 = vmatprep.mubr.msk.bf16.mxu0 %vm8122_vm9, %v8120_v14 }
 0xdaa   : > { %7305 = vmatprep.subr.bf16.mxu0 %v8120_v14 }
 0xdb0   : > { %7302 = vmatmul.mubr.msk.bf16.vlgmr.msra.gmra.mrb[92].mxu0 %vm5655_vm12, %v9151_v2  ;;  %v8100_v2 = vld [vmem:[%s10111_s6 + $0x98] sm:$0xff]  }
 0xdb1   : > { %7306 = vmatpush3.bf16.msra.mxu0 %v8094_v44  ;;  %7321 = vmatprep.mubr.msk.bf16.mxu0 %vm8122_vm9, %v8120_v14 }
 0xdb2   : > { %7307 = vmatprep.subr.bf16.mxu0 %v8120_v14 }
 0xdb5   : > { %7308 = vmatpush3.bf16.msra.mxu0 %v8096_v45 }
 0xdb6   : > { %7309 = vmatprep.subr.bf16.mxu0 %v8120_v14 }
 0xdb9   : > { %7310 = vmatpush3.bf16.msra.mxu0 %v8098_v30 }
 0xdba   : > { %7311 = vmatprep.subr.bf16.mxu0 %v8120_v14 }
 0xdbd   : > { %7312 = vmatpush3.bf16.msra.mxu0 %v8100_v2 }
 0xdbe   : > { %7313 = vmatprep.subr.bf16.mxu0 %v8120_v14 }
 0xdc1   : > { %7314 = vmatpush3.bf16.msra.mxu0 %v8102_v57 }
 0xdc2   : > { %7315 = vmatprep.subr.bf16.mxu0 %v8120_v14 }
 0xdc5   : > { %7316 = vmatpush3.bf16.msra.mxu0 %v8104_v25 }
 0xdc6   : > { %7317 = vmatprep.subr.bf16.mxu0 %v8120_v14 }
 0xdc9   : > { %7318 = vmatpush3.bf16.msra.mxu0 %v8106_v48 }
 0xdca   : > { %7319 = vmatprep.subr.bf16.mxu0 %v8120_v14 }
 0xdcd   : > { %7320 = vmatpush3.bf16.msra.mxu0 %v8107_v35 }
 0xdce   : > { %7345 = vmatprep.subr.bf16.mxu0 %v8120_v14 }
 0xe7b   : > { %v5696_v10 = vpop.f32.mrb[88].mxu0 }
 0xe7c   : > { %v5702_v16 = vpack.c.bf16 %v5696_v10, %v5696_v10  ;;  %v7297_v49 = vpop.f32.mrb[89].mxu0 }
 0xe7d   : > { %v5699_v50 = vpop.f32.mrb[90].mxu0 }
 0xe7e   : > { %v7298_v60 = vpop.f32.mrb[91].mxu0  ;;  %7342 = vmatmul.mubr.bf16.vlgmr.msra.gmra.mrb[52].mxu1 %v5702_v16 }
 0xe83   : > { %v5756_v13 = vpop.f32.mrb[92].mxu0 }
 0xe84   : > { %v5762_v63 = vpack.c.bf16 %v5756_v13, %v5756_v13  ;;  %v7303_v1 = vpop.f32.mrb[93].mxu0 }
 0xe85   : > { %v5759_v46 = vpop.f32.mrb[94].mxu0 }
 0xe86   : > { %7322 = vmatmul.mubr.bf16.vlgmr.msra.gmra.mrb[96].mxu0 %v5762_v63  ;;  %v7304_v53 = vpop.f32.mrb[95].mxu0 }
 0xe87   : > { %7353 = vmatprep.mubr.msk.bf16.mxu0 %vm8122_vm9, %v8120_v14  ;;  %7346 = vmatpush3.bf16.msra.mxu0 %v8108_v52 }
 0xe88   : > { %7347 = vmatprep.subr.bf16.mxu0 %v8120_v14 }
 0xe8b   : > { %7348 = vmatpush3.bf16.msra.mxu0 %v8109_v54 }
 0xe8c   : > { %7349 = vmatprep.subr.bf16.mxu0 %v8120_v14 }
 0xe8f   : > { %7350 = vmatpush3.bf16.msra.mxu0 %v8110_v55 }
 0xe90   : > { %7351 = vmatprep.subr.bf16.mxu0 %v8120_v14 }
 0xe93   : > { %7352 = vmatpush3.bf16.msra.mxu0 %v8111_v56 }
 0xf51   : > { %v5950_v51 = vpop.f32.mrb[52].mxu1 }
 0xf52   : > { %v7343_v15 = vpop.f32.mrb[53].mxu1 }
 0xf53   : > { %v5953_v58 = vpop.f32.mrb[54].mxu1 }
 0xf54   : > { %v7344_v59 = vpop.f32.mrb[55].mxu1 }
 0xf59   : > { %v5862_v61 = vpop.f32.mrb[96].mxu0 }
 0xf5a   : > { %v5951_v29 = vadd.f32 %v5950_v51, %v5862_v61  ;;  %v7323_v31 = vpop.f32.mrb[97].mxu0 }
 0xf5b   : > { %v5865_v62 = vpop.f32.mrb[98].mxu0 }
 0xf5c   : > { %v5957_v0 = vadd.f32 %v5956_v27, %v5951_v29  ;;  %v7324_v14 = vpop.f32.mrb[99].mxu0 }
 0xf5e   : > { %vm5958_vm13 = vcmp.ge.f32.partialorder %v5957_v0, 0.0  ;;  %v5959_v4 = vmul.f32 0.2, %v5957_v0 }
 0xf60   : > { %v5960_v3 = vsel %vm5958_vm13, %v5957_v0, %v5959_v4 }
 0xf61   : > { %v5961_v5 = vpack.c.bf16 %v5960_v3, %v5960_v3 }
 0xf63   : > { %7354 = vmatmul.mubr.msk.bf16.vlgmr.msra.gmra.mrb[100].mxu0 %vm535_vm1, %v5961_v5 }
0x1036   : > { %v6033_v8 = vpop.f32.mrb[100].mxu0 }
0x1037   : > { %v6034_v9 = vadd.f32 %v6033_v8, %v5971_v7  ;;  %v7355_v11 = vpop.f32.mrb[101].mxu0 }
0x1038   : > { %v6036_v12 = vpop.f32.mrb[102].mxu0 }
0x1039   : > { %6040 = vst.msk [vmem:[%s492_s16] sm:$0x1] %vm6039_vm14, %v6034_v9  ;;  %v7356_v17 = vpop.f32.mrb[103].mxu0 }
0x103a PF: > { %s27_s20 = sadd.s32 1, %s8118_s20  }
0x103b   : > { %p24_p4 = scmp.ge.s32.totalorder %s27_s20, 4  }
0x103d   :  { %26 = sbr.rel (!%p24_p4) target bundleno = 3 (0x3), region = 128 }

</bundles_post_ra>
